<compile_context>
chip_gen: v7x
topology: tpu7x:2x2x1
jax: 0.10.0
libtpu: 0.0.40
codegen_flags: <defaults>
</compile_context>

<pallas_src>
import jax
import jax.numpy as jnp
from jax.experimental import pallas as pl
from jax.experimental.pallas import tpu as pltpu

NUM_HEADS = 4
SPLIT = 5
ATT_DIM = 512                       # input_dim of the AttentionModule
PER_DIM = ATT_DIM // NUM_HEADS      # 128 -> per-head blocks are lane aligned
LEAKY_SLOPE = 0.2                   # the module explicitly builds LeakyReLU(0.2)
_HEAD_PAD = 128                     # pad the tiny head axis to one lane group


def _round_up(x, m):
    return (x + m - 1) // m * m


def _glorot(key, fan_in, fan_out, gain=1.0):
    limit = gain * (6.0 / (fan_in + fan_out)) ** 0.5
    return jax.random.uniform(key, (fan_in, fan_out), jnp.float32, -limit, limit)


# ----------------------------------------------------------------------------
# Pallas kernel: fused attention forward for one row tile of nodes
# ----------------------------------------------------------------------------
def _make_attention_kernel(split, input_dim, slope):
    def kernel(x_ref, w_ref, wq_ref, e_ref, o_ref):
        # x_ref : (bn, split*input_dim) bf16   node rows, splits along lanes
        # w_ref : (input_dim, input_dim) bf16  all heads' W side by side
        # wq_ref: (input_dim, 128)       bf16  col h = W_h @ q_h (rest zero)
        # e_ref : (128, input_dim)       bf16  row h = 1 on head-h's lane block
        # o_ref : (bn, input_dim)        f32
        w = w_ref[...]
        wq = wq_ref[...]
        e = e_ref[...]

        proj, score = [], []
        for s in range(split):
            xs = x_ref[:, s * input_dim:(s + 1) * input_dim]   # free 512-aligned lane slice
            proj.append(jnp.dot(xs, w, preferred_element_type=jnp.float32))    # (bn, D)
            score.append(jnp.dot(xs, wq, preferred_element_type=jnp.float32))  # (bn, 128)

        # LeakyReLU + softmax over the split axis: elementwise across the
        # per-split score tiles, so no cross-lane reductions are needed.
        score = [jnp.where(sc > 0, sc, slope * sc) for sc in score]
        m = score[0]
        for sc in score[1:]:
            m = jnp.maximum(m, sc)
        expo = [jnp.exp(sc - m) for sc in score]
        denom = expo[0]
        for ex in expo[1:]:
            denom = denom + ex
        inv = pl.reciprocal(denom, approx=True)                # EUP, off the VALU path

        acc = jnp.zeros_like(proj[0])                          # (bn, D) f32 accumulator
        for s in range(split):
            att = (expo[s] * inv).astype(jnp.bfloat16)         # (bn, 128)
            # broadcast att[:, h] across head h's 128 output lanes with one MXU op
            attw = jnp.dot(att, e, preferred_element_type=jnp.float32)   # (bn, D)
            acc = acc + attw * proj[s]
        o_ref[...] = acc.astype(o_ref.dtype)                   # heads already in cat order

    return kernel


# ----------------------------------------------------------------------------
# Wrapper
# ----------------------------------------------------------------------------
def attention_module(x, att_w, att_q, *, block_n=256):
    """x: (N, split*input_dim) f32, att_w: (H, input_dim, per_dim), att_q: (H, per_dim, 1)."""
    n, row_dim = x.shape
    num_heads, input_dim, per_dim = att_w.shape
    split = row_dim // input_dim
    assert row_dim == split * input_dim
    assert per_dim * num_heads == input_dim
    assert per_dim % 128 == 0 and num_heads <= _HEAD_PAD

    # ---- parameter folding / packing (plain JAX, parameter prep only) ------
    w_cat = jnp.concatenate([att_w[h] for h in range(num_heads)], axis=1)           # (D, D)
    wq = jnp.concatenate([att_w[h] @ att_q[h] for h in range(num_heads)], axis=1)   # (D, H)
    wq = jnp.pad(wq, ((0, 0), (0, _HEAD_PAD - num_heads)))                          # (D, 128)
    e = jnp.kron(jnp.eye(num_heads, dtype=jnp.float32),
                 jnp.ones((1, per_dim), jnp.float32))                               # (H, D)
    e = jnp.pad(e, ((0, _HEAD_PAD - num_heads), (0, 0)))                            # (128, D)

    # bf16 MXU operands (f32 accumulation inside the kernel), halves x's DMA too
    xb = x.astype(jnp.bfloat16)
    w_cat = w_cat.astype(jnp.bfloat16)
    wq = wq.astype(jnp.bfloat16)
    e = e.astype(jnp.bfloat16)

    # ---- row tiling (pad node count to a multiple of the row block) --------
    bn = min(_round_up(block_n, 8), _round_up(n, 8))
    n_pad = _round_up(n, bn)
    if n_pad != n:
        xb = jnp.pad(xb, ((0, n_pad - n), (0, 0)))   # zero rows -> finite, discarded output

    out = pl.pallas_call(
        _make_attention_kernel(split, input_dim, LEAKY_SLOPE),
        out_shape=jax.ShapeDtypeStruct((n_pad, input_dim), jnp.float32),
        grid=(n_pad // bn,),
        in_specs=[
            pl.BlockSpec((bn, split * input_dim), lambda i: (i, 0)),   # row tile of x
            pl.BlockSpec(w_cat.shape, lambda i: (0, 0)),               # resident weights
            pl.BlockSpec(wq.shape, lambda i: (0, 0)),
            pl.BlockSpec(e.shape, lambda i: (0, 0)),
        ],
        out_specs=pl.BlockSpec((bn, input_dim), lambda i: (i, 0)),
        compiler_params=pltpu.CompilerParams(
            dimension_semantics=("parallel",)),        # v7x: shard row tiles on both TCs
    )(xb, w_cat, wq, e)
    return out[:n]


# ----------------------------------------------------------------------------
# Pure-JAX f32 reference (mirrors the PyTorch forward; contiguous x, so
# torch's .resize(N, split, D) == reshape)
# ----------------------------------------------------------------------------
def attention_ref(x, att_w, att_q, split, slope=LEAKY_SLOPE):
    n, row_dim = x.shape
    num_heads, input_dim, _ = att_w.shape
    x3 = x.reshape(n, split, input_dim)
    outs = []
    for h in range(num_heads):
        xh = jnp.einsum('nsd,dp->nsp', x3, att_w[h])           # W_h(x)
        att = jnp.einsum('nsp,pk->nsk', xh, att_q[h])          # x_ @ q
        att = jnp.where(att > 0, att, slope * att)             # LeakyReLU(0.2)
        att = jax.nn.softmax(att, axis=1)                      # softmax over split
        outs.append(jnp.sum(xh * att, axis=1))                 # weighted sum
    return jnp.concatenate(outs, axis=1)


# ----------------------------------------------------------------------------
if __name__ == "__main__":
    key = jax.random.PRNGKey(0)
    kx, kw, kq = jax.random.split(key, 3)

    N = 13                                              # not a multiple of the row block
    x = jax.random.normal(kx, (N, SPLIT * ATT_DIM), jnp.float32)
    att_w = jnp.stack([_glorot(k, ATT_DIM, PER_DIM)
                       for k in jax.random.split(kw, NUM_HEADS)])
    att_q = jnp.stack([_glorot(k, PER_DIM, 1, gain=1.414)
                       for k in jax.random.split(kq, NUM_HEADS)])

    out = attention_module(x, att_w, att_q, block_n=8)  # exercises grid=(2,) + padding
    out = jax.block_until_ready(out)

    ref = attention_ref(x, att_w, att_q, SPLIT)
    assert out.shape == (N, ATT_DIM), out.shape
    err = float(jnp.max(jnp.abs(out - ref)))
    assert err < 0.25, f"max abs error vs f32 reference too large: {err}"
    print("KERNEL_OK")
</pallas_src>

<mosaic_0001>
module attributes {stable_mosaic.version = 11 : i64} {
  func.func @kernel(%arg0: i32, %arg1: memref<8x2560xbf16, #tpu.memory_space<vmem>>, %arg2: memref<512x512xbf16, #tpu.memory_space<vmem>>, %arg3: memref<512x128xbf16, #tpu.memory_space<vmem>>, %arg4: memref<128x512xbf16, #tpu.memory_space<vmem>>, %arg5: memref<8x512xf32, #tpu.memory_space<vmem>>) attributes {dimension_semantics = [#tpu.dimension_semantics<parallel>], iteration_bounds = array<i64: 2>, scalar_prefetch = 0 : i64, scratch_operands = 0 : i64, tpu.core_type = #tpu.core_type<tc>, window_params = [{transform_indices = @transform_0, window_bounds = array<i64: 8, 2560>}, {pipeline_mode = #tpu.pipeline_mode<synchronous>, transform_indices = @transform_1, window_bounds = array<i64: 512, 512>}, {pipeline_mode = #tpu.pipeline_mode<synchronous>, transform_indices = @transform_2, window_bounds = array<i64: 512, 128>}, {pipeline_mode = #tpu.pipeline_mode<synchronous>, transform_indices = @transform_3, window_bounds = array<i64: 128, 512>}, {transform_indices = @transform_4, window_bounds = array<i64: 8, 512>}]} {
    %c0 = arith.constant 0 : index
    %c0_0 = arith.constant 0 : index
    %0 = vector.load %arg2[%c0, %c0_0] : memref<512x512xbf16, #tpu.memory_space<vmem>>, vector<512x512xbf16>
    %c0_1 = arith.constant 0 : index
    %c0_2 = arith.constant 0 : index
    %1 = vector.load %arg3[%c0_1, %c0_2] : memref<512x128xbf16, #tpu.memory_space<vmem>>, vector<512x128xbf16>
    %c0_3 = arith.constant 0 : index
    %c0_4 = arith.constant 0 : index
    %2 = vector.load %arg4[%c0_3, %c0_4] : memref<128x512xbf16, #tpu.memory_space<vmem>>, vector<128x512xbf16>
    %c0_5 = arith.constant 0 : index
    %c0_6 = arith.constant 0 : index
    %3 = vector.load %arg1[%c0_5, %c0_6] : memref<8x2560xbf16, #tpu.memory_space<vmem>>, vector<8x512xbf16>
    %cst = arith.constant dense<0.000000e+00> : vector<8x512xf32>
    %4 = tpu.matmul %3, %0, %cst {dimension_numbers = #tpu.dot_dimension_numbers<[1], [0], [0], [1], [0, 0, 1, 1], [], []>} : vector<8x512xbf16>, vector<512x512xbf16>, vector<8x512xf32> -> vector<8x512xf32>
    %cst_7 = arith.constant dense<0.000000e+00> : vector<8x128xf32>
    %5 = tpu.matmul %3, %1, %cst_7 {dimension_numbers = #tpu.dot_dimension_numbers<[1], [0], [0], [1], [0, 0, 1, 1], [], []>} : vector<8x512xbf16>, vector<512x128xbf16>, vector<8x128xf32> -> vector<8x128xf32>
    %c0_8 = arith.constant 0 : index
    %c512 = arith.constant 512 : index
    %6 = vector.load %arg1[%c0_8, %c512] : memref<8x2560xbf16, #tpu.memory_space<vmem>>, vector<8x512xbf16>
    %cst_9 = arith.constant dense<0.000000e+00> : vector<8x512xf32>
    %7 = tpu.matmul %6, %0, %cst_9 {dimension_numbers = #tpu.dot_dimension_numbers<[1], [0], [0], [1], [0, 0, 1, 1], [], []>} : vector<8x512xbf16>, vector<512x512xbf16>, vector<8x512xf32> -> vector<8x512xf32>
    %cst_10 = arith.constant dense<0.000000e+00> : vector<8x128xf32>
    %8 = tpu.matmul %6, %1, %cst_10 {dimension_numbers = #tpu.dot_dimension_numbers<[1], [0], [0], [1], [0, 0, 1, 1], [], []>} : vector<8x512xbf16>, vector<512x128xbf16>, vector<8x128xf32> -> vector<8x128xf32>
    %c0_11 = arith.constant 0 : index
    %c1024 = arith.constant 1024 : index
    %9 = vector.load %arg1[%c0_11, %c1024] : memref<8x2560xbf16, #tpu.memory_space<vmem>>, vector<8x512xbf16>
    %cst_12 = arith.constant dense<0.000000e+00> : vector<8x512xf32>
    %10 = tpu.matmul %9, %0, %cst_12 {dimension_numbers = #tpu.dot_dimension_numbers<[1], [0], [0], [1], [0, 0, 1, 1], [], []>} : vector<8x512xbf16>, vector<512x512xbf16>, vector<8x512xf32> -> vector<8x512xf32>
    %cst_13 = arith.constant dense<0.000000e+00> : vector<8x128xf32>
    %11 = tpu.matmul %9, %1, %cst_13 {dimension_numbers = #tpu.dot_dimension_numbers<[1], [0], [0], [1], [0, 0, 1, 1], [], []>} : vector<8x512xbf16>, vector<512x128xbf16>, vector<8x128xf32> -> vector<8x128xf32>
    %c0_14 = arith.constant 0 : index
    %c1536 = arith.constant 1536 : index
    %12 = vector.load %arg1[%c0_14, %c1536] : memref<8x2560xbf16, #tpu.memory_space<vmem>>, vector<8x512xbf16>
    %cst_15 = arith.constant dense<0.000000e+00> : vector<8x512xf32>
    %13 = tpu.matmul %12, %0, %cst_15 {dimension_numbers = #tpu.dot_dimension_numbers<[1], [0], [0], [1], [0, 0, 1, 1], [], []>} : vector<8x512xbf16>, vector<512x512xbf16>, vector<8x512xf32> -> vector<8x512xf32>
    %cst_16 = arith.constant dense<0.000000e+00> : vector<8x128xf32>
    %14 = tpu.matmul %12, %1, %cst_16 {dimension_numbers = #tpu.dot_dimension_numbers<[1], [0], [0], [1], [0, 0, 1, 1], [], []>} : vector<8x512xbf16>, vector<512x128xbf16>, vector<8x128xf32> -> vector<8x128xf32>
    %c0_17 = arith.constant 0 : index
    %c2048 = arith.constant 2048 : index
    %15 = vector.load %arg1[%c0_17, %c2048] : memref<8x2560xbf16, #tpu.memory_space<vmem>>, vector<8x512xbf16>
    %cst_18 = arith.constant dense<0.000000e+00> : vector<8x512xf32>
    %16 = tpu.matmul %15, %0, %cst_18 {dimension_numbers = #tpu.dot_dimension_numbers<[1], [0], [0], [1], [0, 0, 1, 1], [], []>} : vector<8x512xbf16>, vector<512x512xbf16>, vector<8x512xf32> -> vector<8x512xf32>
    %cst_19 = arith.constant dense<0.000000e+00> : vector<8x128xf32>
    %17 = tpu.matmul %15, %1, %cst_19 {dimension_numbers = #tpu.dot_dimension_numbers<[1], [0], [0], [1], [0, 0, 1, 1], [], []>} : vector<8x512xbf16>, vector<512x128xbf16>, vector<8x128xf32> -> vector<8x128xf32>
    %cst_20 = arith.constant 0.000000e+00 : f32
    %18 = vector.broadcast %cst_20 : f32 to vector<8x128xf32>
    %19 = arith.cmpf ogt, %5, %18 : vector<8x128xf32>
    %cst_21 = arith.constant 2.000000e-01 : f32
    %20 = vector.broadcast %cst_21 : f32 to vector<8x128xf32>
    %21 = arith.mulf %20, %5 : vector<8x128xf32>
    %22 = arith.select %19, %5, %21 : vector<8x128xi1>, vector<8x128xf32>
    %cst_22 = arith.constant 0.000000e+00 : f32
    %23 = vector.broadcast %cst_22 : f32 to vector<8x128xf32>
    %24 = arith.cmpf ogt, %8, %23 : vector<8x128xf32>
    %cst_23 = arith.constant 2.000000e-01 : f32
    %25 = vector.broadcast %cst_23 : f32 to vector<8x128xf32>
    %26 = arith.mulf %25, %8 : vector<8x128xf32>
    %27 = arith.select %24, %8, %26 : vector<8x128xi1>, vector<8x128xf32>
    %cst_24 = arith.constant 0.000000e+00 : f32
    %28 = vector.broadcast %cst_24 : f32 to vector<8x128xf32>
    %29 = arith.cmpf ogt, %11, %28 : vector<8x128xf32>
    %cst_25 = arith.constant 2.000000e-01 : f32
    %30 = vector.broadcast %cst_25 : f32 to vector<8x128xf32>
    %31 = arith.mulf %30, %11 : vector<8x128xf32>
    %32 = arith.select %29, %11, %31 : vector<8x128xi1>, vector<8x128xf32>
    %cst_26 = arith.constant 0.000000e+00 : f32
    %33 = vector.broadcast %cst_26 : f32 to vector<8x128xf32>
    %34 = arith.cmpf ogt, %14, %33 : vector<8x128xf32>
    %cst_27 = arith.constant 2.000000e-01 : f32
    %35 = vector.broadcast %cst_27 : f32 to vector<8x128xf32>
    %36 = arith.mulf %35, %14 : vector<8x128xf32>
    %37 = arith.select %34, %14, %36 : vector<8x128xi1>, vector<8x128xf32>
    %cst_28 = arith.constant 0.000000e+00 : f32
    %38 = vector.broadcast %cst_28 : f32 to vector<8x128xf32>
    %39 = arith.cmpf ogt, %17, %38 : vector<8x128xf32>
    %cst_29 = arith.constant 2.000000e-01 : f32
    %40 = vector.broadcast %cst_29 : f32 to vector<8x128xf32>
    %41 = arith.mulf %40, %17 : vector<8x128xf32>
    %42 = arith.select %39, %17, %41 : vector<8x128xi1>, vector<8x128xf32>
    %43 = arith.maximumf %22, %27 : vector<8x128xf32>
    %44 = arith.maximumf %43, %32 : vector<8x128xf32>
    %45 = arith.maximumf %44, %37 : vector<8x128xf32>
    %46 = arith.maximumf %45, %42 : vector<8x128xf32>
    %47 = arith.subf %22, %46 : vector<8x128xf32>
    %48 = math.exp %47 : vector<8x128xf32>
    %49 = arith.subf %27, %46 : vector<8x128xf32>
    %50 = math.exp %49 : vector<8x128xf32>
    %51 = arith.subf %32, %46 : vector<8x128xf32>
    %52 = math.exp %51 : vector<8x128xf32>
    %53 = arith.subf %37, %46 : vector<8x128xf32>
    %54 = math.exp %53 : vector<8x128xf32>
    %55 = arith.subf %42, %46 : vector<8x128xf32>
    %56 = math.exp %55 : vector<8x128xf32>
    %57 = arith.addf %48, %50 : vector<8x128xf32>
    %58 = arith.addf %57, %52 : vector<8x128xf32>
    %59 = arith.addf %58, %54 : vector<8x128xf32>
    %60 = arith.addf %59, %56 : vector<8x128xf32>
    %61 = tpu.reciprocal %60 {approx = true} : vector<8x128xf32> -> vector<8x128xf32>
    %cst_30 = arith.constant 0.000000e+00 : f32
    %62 = vector.broadcast %cst_30 : f32 to vector<8x512xf32>
    %63 = arith.mulf %48, %61 : vector<8x128xf32>
    %64 = arith.truncf %63 : vector<8x128xf32> to vector<8x128xbf16>
    %cst_31 = arith.constant dense<0.000000e+00> : vector<8x512xf32>
    %65 = tpu.matmul %64, %2, %cst_31 {dimension_numbers = #tpu.dot_dimension_numbers<[1], [0], [0], [1], [0, 0, 1, 1], [], []>} : vector<8x128xbf16>, vector<128x512xbf16>, vector<8x512xf32> -> vector<8x512xf32>
    %66 = arith.mulf %65, %4 : vector<8x512xf32>
    %67 = arith.addf %62, %66 : vector<8x512xf32>
    %68 = arith.mulf %50, %61 : vector<8x128xf32>
    %69 = arith.truncf %68 : vector<8x128xf32> to vector<8x128xbf16>
    %cst_32 = arith.constant dense<0.000000e+00> : vector<8x512xf32>
    %70 = tpu.matmul %69, %2, %cst_32 {dimension_numbers = #tpu.dot_dimension_numbers<[1], [0], [0], [1], [0, 0, 1, 1], [], []>} : vector<8x128xbf16>, vector<128x512xbf16>, vector<8x512xf32> -> vector<8x512xf32>
    %71 = arith.mulf %70, %7 : vector<8x512xf32>
    %72 = arith.addf %67, %71 : vector<8x512xf32>
    %73 = arith.mulf %52, %61 : vector<8x128xf32>
    %74 = arith.truncf %73 : vector<8x128xf32> to vector<8x128xbf16>
    %cst_33 = arith.constant dense<0.000000e+00> : vector<8x512xf32>
    %75 = tpu.matmul %74, %2, %cst_33 {dimension_numbers = #tpu.dot_dimension_numbers<[1], [0], [0], [1], [0, 0, 1, 1], [], []>} : vector<8x128xbf16>, vector<128x512xbf16>, vector<8x512xf32> -> vector<8x512xf32>
    %76 = arith.mulf %75, %10 : vector<8x512xf32>
    %77 = arith.addf %72, %76 : vector<8x512xf32>
    %78 = arith.mulf %54, %61 : vector<8x128xf32>
    %79 = arith.truncf %78 : vector<8x128xf32> to vector<8x128xbf16>
    %cst_34 = arith.constant dense<0.000000e+00> : vector<8x512xf32>
    %80 = tpu.matmul %79, %2, %cst_34 {dimension_numbers = #tpu.dot_dimension_numbers<[1], [0], [0], [1], [0, 0, 1, 1], [], []>} : vector<8x128xbf16>, vector<128x512xbf16>, vector<8x512xf32> -> vector<8x512xf32>
    %81 = arith.mulf %80, %13 : vector<8x512xf32>
    %82 = arith.addf %77, %81 : vector<8x512xf32>
    %83 = arith.mulf %56, %61 : vector<8x128xf32>
    %84 = arith.truncf %83 : vector<8x128xf32> to vector<8x128xbf16>
    %cst_35 = arith.constant dense<0.000000e+00> : vector<8x512xf32>
    %85 = tpu.matmul %84, %2, %cst_35 {dimension_numbers = #tpu.dot_dimension_numbers<[1], [0], [0], [1], [0, 0, 1, 1], [], []>} : vector<8x128xbf16>, vector<128x512xbf16>, vector<8x512xf32> -> vector<8x512xf32>
    %86 = arith.mulf %85, %16 : vector<8x512xf32>
    %87 = arith.addf %82, %86 : vector<8x512xf32>
    %c0_36 = arith.constant 0 : index
    %c0_37 = arith.constant 0 : index
    %88 = vector.load %arg5[%c0_36, %c0_37] : memref<8x512xf32, #tpu.memory_space<vmem>>, vector<8x512xf32>
    tpu.vector_store %arg5[%c0_36, %c0_37], %87 {strides = array<i32>} : memref<8x512xf32, #tpu.memory_space<vmem>>, vector<8x512xf32>,
    return
  }
  func.func @transform_0(%arg0: i32) -> (i32, i32) {
    %c0_i32 = arith.constant 0 : i32
    %c0_i32_0 = arith.constant 0 : i32
    return %arg0, %c0_i32 : i32, i32
  }
  func.func @transform_1(%arg0: i32) -> (i32, i32) {
    %c0_i32 = arith.constant 0 : i32
    %c0_i32_0 = arith.constant 0 : i32
    %c0_i32_1 = arith.constant 0 : i32
    return %c0_i32, %c0_i32_0 : i32, i32
  }
  func.func @transform_2(%arg0: i32) -> (i32, i32) {
    %c0_i32 = arith.constant 0 : i32
    %c0_i32_0 = arith.constant 0 : i32
    %c0_i32_1 = arith.constant 0 : i32
    return %c0_i32, %c0_i32_0 : i32, i32
  }
  func.func @transform_3(%arg0: i32) -> (i32, i32) {
    %c0_i32 = arith.constant 0 : i32
    %c0_i32_0 = arith.constant 0 : i32
    %c0_i32_1 = arith.constant 0 : i32
    return %c0_i32, %c0_i32_0 : i32, i32
  }
  func.func @transform_4(%arg0: i32) -> (i32, i32) {
    %c0_i32 = arith.constant 0 : i32
    %c0_i32_0 = arith.constant 0 : i32
    return %arg0, %c0_i32 : i32, i32
  }
}

</mosaic_0001>

<bundles_post_ra>
// kernel: tpu_custom_call.1
= control target key start
LH: loop header
LB: loop body
LE: loop exit
PB: predicated region body
PF: predicated region fallthrough
CT: control target
= control target key end

     0   :  { %9 = vsyncpa [#allocation3], 0  ;;  %s6763_s0 = inlined_call_operand.hbm [shape: bf16[16,2560], index: 0, kind: input, shape index: {}]   ;;  %s6764_s1 = inlined_call_operand.hbm [shape: bf16[512,512], index: 1, kind: input, shape index: {}]   ;;  %s6765_s2 = inlined_call_operand.hbm [shape: bf16[512,128], index: 2, kind: input, shape index: {}]   ;;  %s6766_s3 = inlined_call_operand.hbm [shape: bf16[128,512], index: 3, kind: input, shape index: {}]   ;;  %s6767_s4 = inlined_call_operand.hbm [shape: f32[16,512], index: 4, kind: output, shape index: {}]  }
   0x1   :  { %11 = vsyncpa [#allocation3 + $0x1], 0 }
   0x2   :  { %12 = vsyncpa [#allocation6], 0 }
   0x3   :  { %13 = vsyncpa [#allocation9], 0 }
   0x4   :  { %14 = vsyncpa [#allocation4], 0 }
   0x5   :  { %16 = vsyncpa [#allocation4 + $0x1], 0  ;;  %s4682_s15 = smov 0   ;;  %s4684_s16 = smov 0  }
   0x6   :  { %s4686_s17 = smov 0   ;;  %s4688_s18 = smov 0  }
   0x7 LB: > { %s4703_s19 = sadd.s32 4294967295, %s4645_s18   ;;  %s3392_s20 = sadd.s32 4294967294, %s4645_s18   ;;  %s4645_s18 = sphi %s4688_s18, %s7714_s18   ;;  %s4641_s17 = sphi %s4686_s17, %s7713_s17   ;;  %s4637_s16 = sphi %s4684_s16, %s7712_s16   ;;  %s4633_s15 = sphi %s4682_s15, %s7711_s15  }
   0x8   : > { %p42_p0 = scmp.ne.s32.totalorder %s4637_s16, %s4633_s15  ;;  %p6768_p1 = scmp.eq.s32.totalorder %s4703_s19, 0 }
   0x9   : > { %p135_p3 = scmp.eq.s32.totalorder %s3392_s20, 1  ;;  %p3393_p5 = scmp.ge.s32.totalorder %s4645_s18, 1 }
   0xa   : > { %p4712_p4 = por %p6768_p1, %p42_p0  ;;  %p142_p7 = scmp.lt.s32.totalorder %s4645_s18, 3 }
   0xb   : > { %p4717_p6 = por %p135_p3, %p42_p0  ;;  %s4647_s24 = smov [#allocation5]  }
   0xc   : > { %s7146_s21 = scalar_select %p4712_p4, 1, 0 }
   0xd   : > { %s7147_s22 = scalar_select %p4717_p6, 1, 0 }
   0xe   : > { %p4722_p8 = pnand %p3393_p5, %p142_p7  ;;  %s154_s25 = sshll.u32 %s4647_s24, 4  ;;  %s4726_s25 = int_to_ptr.vmem [resolvable:$true] %s154_s25 }
   0xf   : > { %s4648_s27 = smov [#allocation7]   ;;  %s4457_s5 = scalar_lea.hbm %s6764_s1, 16384 }
  0x10   : > { %s7148_s23 = scalar_select %p4722_p8, 1, 0 }
  0x11   : > { %p3901_p9 = pneg %p4722_p8  ;;  %s167_s28 = sshll.u32 %s4648_s27, 4  ;;  %s4737_s28 = int_to_ptr.vmem [resolvable:$true] %s167_s28 }
  0x12   : > { %p4458_p12 = scmp.ne.s32.totalorder %s6764_s1, %s4457_s5  ;;  %p4464_p5 = scmp.lt.u32.totalorder %s4457_s5, %s6764_s1 }
  0x13   : > { %p4733_p11 = pnand %p3901_p9, %p6768_p1 }
  0x15   : > { %p4747_p13 = pneg %p4733_p11 }
  0x17   : > { %p4460_p0 = pnand %p4747_p13, %p4458_p12 }
  0x19   : > { %p4461_p3 = pneg %p4460_p0 }
  0x1b   : > { %p4466_p7 = pnand %p4464_p5, %p4461_p3 }
  0x1d   : > { %4469 = shalt.err (!%p4466_p7)
}
  0x1e   : > { %s4470_s11 = scalar_lea.vmem %s4726_s25, 16384  ;;  %p4478_p2 = scmp.lt.s32.totalorder %s4726_s25, %s4726_s25 }
  0x1f   : > { %p4471_p9 = scmp.ne.s32.totalorder %s4726_s25, %s4470_s11  ;;  %p4479_p6 = scmp.lt.s32.totalorder %s4470_s11, %s4470_s11 }
  0x21   : > { %p4473_p10 = pnand %p4471_p9, %p4747_p13  ;;  %p4480_p12 = por %p4479_p6, %p4478_p2 }
  0x23   : > { %p4474_p1 = pneg %p4473_p10 }
  0x25   : > { %p4481_p0 = pnand %p4480_p12, %p4474_p1 }
  0x27   : > { %4484 = shalt.err (!%p4481_p0)
}
  0x28   : > { %s6769_s12 = smov 256   ;;  %s4650_s13 = smov 16  }
  0x29   : > { %3904 = dma.hbm_to_vmem [thread:$0]  (!%p4733_p11), %s6764_s1, 16384, %s4726_s25, [#allocation6], %s6769_s12, %s6769_s12, %s4650_s13  }
  0x2a   : > { %s4485_s29 = scalar_lea.hbm %s6765_s2, 4096 }
  0x2b   : > { %p4486_p1 = scmp.ne.s32.totalorder %s6765_s2, %s4485_s29  ;;  %p4492_p10 = scmp.lt.u32.totalorder %s4485_s29, %s6765_s2 }
  0x2d   : > { %p4488_p2 = pnand %p4486_p1, %p4747_p13 }
  0x2f   : > { %p4489_p6 = pneg %p4488_p2 }
  0x31   : > { %p4494_p3 = pnand %p4492_p10, %p4489_p6 }
  0x33   : > { %4497 = shalt.err (!%p4494_p3)
}
  0x34   : > { %s4498_s25 = scalar_lea.vmem %s4737_s28, 4096  ;;  %p4506_p12 = scmp.lt.s32.totalorder %s4737_s28, %s4737_s28 }
  0x35   : > { %p4499_p5 = scmp.ne.s32.totalorder %s4737_s28, %s4498_s25  ;;  %p4507_p0 = scmp.lt.s32.totalorder %s4498_s25, %s4498_s25 }
  0x37   : > { %p4501_p7 = pnand %p4499_p5, %p4747_p13  ;;  %p4508_p1 = por %p4507_p0, %p4506_p12 }
  0x39   : > { %p4502_p9 = pneg %p4501_p7 }
  0x3b   : > { %p4509_p2 = pnand %p4508_p1, %p4502_p9 }
  0x3d   : > { %4512 = shalt.err (!%p4509_p2)
}
  0x3e   : > { %s4651_s9 = smov 64   ;;  %s4652_s10 = smov 4  }
  0x3f   : > { %3907 = dma.hbm_to_vmem [thread:$0]  (!%p4733_p11), %s6765_s2, 4096, %s4737_s28, [#allocation6], %s4651_s9, %s4651_s9, %s4652_s10  }
  0x40   : > { %s4653_s20 = smov [#allocation8]   ;;  %s4795_s27 = sadd.s32 1, %s4645_s18  }
  0x41   : > { %s180_s24 = sshll.u32 %s4653_s20, 4  ;;  %s4513_s5 = scalar_lea.hbm %s6766_s3, 4096  ;;  %s181_s24 = int_to_ptr.vmem [resolvable:$true] %s180_s24 }
  0x42   : > { %p4514_p6 = scmp.ne.s32.totalorder %s6766_s3, %s4513_s5  ;;  %p4520_p5 = scmp.lt.u32.totalorder %s4513_s5, %s6766_s3 }
  0x44   : > { %p4516_p10 = pnand %p4514_p6, %p4747_p13 }
  0x46   : > { %p4517_p3 = pneg %p4516_p10 }
  0x48   : > { %p4522_p7 = pnand %p4520_p5, %p4517_p3 }
  0x4a   : > { %4525 = shalt.err (!%p4522_p7)
}
  0x4b   : > { %s4526_s28 = scalar_lea.vmem %s181_s24, 4096  ;;  %p4534_p1 = scmp.lt.s32.totalorder %s181_s24, %s181_s24 }
  0x4c   : > { %p4527_p9 = scmp.ne.s32.totalorder %s181_s24, %s4526_s28  ;;  %p4535_p2 = scmp.lt.s32.totalorder %s4526_s28, %s4526_s28 }
  0x4e   : > { %p4529_p12 = pnand %p4527_p9, %p4747_p13  ;;  %p4536_p4 = por %p4535_p2, %p4534_p1 }
  0x50   : > { %p4530_p0 = pneg %p4529_p12 }
  0x52   : > { %p4537_p8 = pnand %p4536_p4, %p4530_p0 }
  0x54   : > { %4540 = shalt.err (!%p4537_p8)
}
  0x55   : > { %s7151_s9 = smov 256   ;;  %s26_s8 = ssub.s32 %s4645_s18, %s4795_s27 }
  0x56   : > { %3910 = dma.hbm_to_vmem [thread:$0]  (!%p4733_p11), %s6766_s3, 4096, %s181_s24, [#allocation9], %s7151_s9, %s7151_s9, %s4650_s13  }
  0x57   : > { %s29_s26 = sadd.s32 1, %s4641_s17  ;;  %p27_p4 = scmp.eq.s32.totalorder %s26_s8, 0 }
  0x58   : > { %p36_p8 = scmp.ne.s32.totalorder %s4641_s17, %s4637_s16  ;;  %p37_p13 = scmp.eq.s32.totalorder %s4645_s18, 0 }
  0x59   : > { %p3922_p6 = scmp.lt.s32.totalorder %s4645_s18, 2  ;;  %p7152_p3 = scmp.eq.s32.totalorder %s4703_s19, 1 }
  0x5a   : > { %s4826_s11 = scalar_select %p27_p4, %s4641_s17, %s29_s26  }
  0x5b   : > { %p38_p10 = por %p37_p13, %p36_p8  ;;  %p4830_p5 = por %p7152_p3, %p36_p8 }
  0x5c   : > { %s194_s20 = sand.u32 1, %s4641_s17   ;;  %s3883_s29 = smul.u32 1280, %s4645_s18 }
  0x5d   : > { %s3882_s30 = smul.u32 80, %s194_s20  ;;  %p4836_p7 = pnand %p3922_p6, %p38_p10 }
  0x5e   : > { %s4843_s6 = scalar_lea.hbm %s6763_s0, %s3883_s29  ;;  %s195_s28 = scalar_lea.sflag [#allocation3], %s194_s20 }
  0x5f   : > { %s198_s7 = scalar_lea.vmem [#allocation2], %s3882_s30  ;;  %s4541_s9 = scalar_lea.hbm %s4843_s6, 1280 }
  0x60   : > { %s206_s25 = sshll.u32 %s198_s7, 4  ;;  %p4542_p11 = scmp.ne.s32.totalorder %s4843_s6, %s4541_s9  ;;  %s4845_s25 = int_to_ptr.vmem [resolvable:$true] %s206_s25 }
  0x61   : > { %p4543_p9 = pneg %p4836_p7  ;;  %s4546_s8 = scalar_lea.hbm %s6763_s0, 2560 }
  0x62   : > { %p4547_p1 = scmp.lt.u32.totalorder %s4843_s6, %s6763_s0  ;;  %p4548_p2 = scmp.lt.u32.totalorder %s4546_s8, %s4541_s9 }
  0x63   : > { %p4544_p12 = pnand %p4543_p9, %p4542_p11  ;;  %p4550_p8 = scmp.lt.u32.totalorder %s4541_s9, %s4843_s6 }
  0x64   : > { %p4549_p4 = por %p4548_p2, %p4547_p1 }
  0x65   : > { %p4545_p0 = pneg %p4544_p12 }
  0x66   : > { %p4551_p13 = por %p4550_p8, %p4549_p4 }
  0x68   : > { %p4552_p6 = pnand %p4551_p13, %p4545_p0 }
  0x6a   : > { %4555 = shalt.err (!%p4552_p6)
}
  0x6b   : > { %s4556_s20 = scalar_lea.vmem %s4845_s25, 1280  ;;  %s4654_s30 = smov [#allocation2]  }
  0x6c   : > { %p4557_p10 = scmp.ne.s32.totalorder %s4845_s25, %s4556_s20  ;;  %s4561_s13 = sshll.u32 %s4654_s30, 4  ;;  %s4562_s13 = int_to_ptr.vmem [resolvable:$false] %s4561_s13 }
  0x6d   : > { %s4563_s24 = scalar_lea.vmem %s4562_s13, 2560  ;;  %p4564_p12 = scmp.lt.s32.totalorder %s4845_s25, %s4562_s13 }
  0x6e   : > { %p4559_p3 = pnand %p4557_p10, %p4543_p9  ;;  %p4565_p1 = scmp.lt.s32.totalorder %s4563_s24, %s4556_s20 }
  0x70   : > { %p4560_p11 = pneg %p4559_p3  ;;  %p4566_p2 = por %p4565_p1, %p4564_p12 }
  0x72   : > { %p4567_p4 = pnand %p4566_p2, %p4560_p11 }
  0x74   : > { %4570 = shalt.err (!%p4567_p4)
}
  0x75   : > { %3914 = dma.hbm_to_vmem [thread:$0]  (!%p4836_p7), %s4843_s6, 1280, %s4845_s25, %s195_s28  }
  0x76   : > { %p7155_p0 = scmp.ne.s32.totalorder %s7148_s23, 0 }
  0x78   : > { %215 = sbr.rel (%p7155_p0) target bundleno = 1559 (0x617), region = 36 }
  0x7f   : > { %s4875_s7 = sand.u32 1, %s4637_s16   ;;  %p7156_p9 = scmp.ne.s32.totalorder %s7146_s21, 0 }
  0x80   : > { %s3884_s9 = smul.u32 80, %s4875_s7  ;;  %s218_s12 = scalar_lea.sflag [#allocation3], %s4875_s7 }
  0x82   : > { %s4879_s10 = scalar_lea.vmem [#allocation2], %s3884_s9 }
  0x83   : > { %4616 = dma.done.wait (%p7156_p9), %s218_s12, 1280  }
  0x84   : > { %4618 = vsyncadd (%p7156_p9), %s218_s12, 4294966016  ;;  %p7157_p7 = scmp.eq.s32.totalorder %s4703_s19, 0 }
  0x86   : > { %4620 = dma.done.wait (%p7157_p7), [#allocation6], 20480   ;;  %p7158_p8 = pmov %p7157_p7 }
  0x87   : > { %p7159_p13 = pmov %p7157_p7 }
  0x88   : > { %4622 = vsyncadd (%p7158_p8), [#allocation6], 4294946816 }
  0x89   : > { %4624 = dma.done.wait (%p7159_p13), [#allocation9], 4096   ;;  %p7160_p6 = pmov %p7157_p7 }
  0x8a   : > { %v3967_v0 = vld [vmem:[#allocation5 + $0x4] ss:$16 sps:$4 sm:$0xff]   ;;  %v3969_v1 = vld [vmem:[#allocation5 + $0xc] ss:$16 sps:$4 sm:$0xff]   ;;  %v3971_v2 = vld [vmem:[#allocation5] ss:$16 sps:$4 sm:$0xff]  }
  0x8b   : > { %4626 = vsyncadd (%p7160_p6), [#allocation9], 4294963200  ;;  %1139 = vmatprep.subr.bf16.mxu0 %v3967_v0  ;;  %v3972_v3 = vld [vmem:[#allocation5 + $0x8] ss:$16 sps:$4 sm:$0xff]   ;;  %1221 = vmatprep.subr.bf16.mxu1 %v3969_v1  ;;  %v3973_v4 = vld [vmem:[#allocation5 + $0x24] ss:$16 sps:$4 sm:$0xff]  }
  0x8c   : > { %1140 = vmatpush1.bf16.msra.mxu0 %v3971_v2  ;;  %1222 = vmatpush1.bf16.msra.mxu1 %v3972_v3  ;;  %v3975_v5 = vld [vmem:[#allocation5 + $0x2c] ss:$16 sps:$4 sm:$0xff]   ;;  %v3977_v6 = vld [vmem:[#allocation5 + $0x20] ss:$16 sps:$4 sm:$0xff]   ;;  %v3978_v7 = vld [vmem:[#allocation5 + $0x28] ss:$16 sps:$4 sm:$0xff]  }
  0x8d   : > { %1141 = vmatprep.subr.bf16.mxu0 %v3973_v4  ;;  %1223 = vmatprep.subr.bf16.mxu1 %v3975_v5  ;;  %v3979_v8 = vld [vmem:[#allocation5 + $0x44] ss:$16 sps:$4 sm:$0xff]   ;;  %v3981_v9 = vld [vmem:[#allocation5 + $0x4c] ss:$16 sps:$4 sm:$0xff]   ;;  %v3983_v10 = vld [vmem:[#allocation5 + $0x40] ss:$16 sps:$4 sm:$0xff]  }
  0x8e   : > { %v3984_v11 = vld [vmem:[#allocation5 + $0x48] ss:$16 sps:$4 sm:$0xff]   ;;  %v3985_v12 = vld [vmem:[#allocation5 + $0x64] ss:$16 sps:$4 sm:$0xff]   ;;  %v3987_v13 = vld [vmem:[#allocation5 + $0x6c] ss:$16 sps:$4 sm:$0xff]  }
  0x8f   : > { %v3989_v14 = vld [vmem:[#allocation5 + $0x60] ss:$16 sps:$4 sm:$0xff]   ;;  %v3990_v15 = vld [vmem:[#allocation5 + $0x68] ss:$16 sps:$4 sm:$0xff]   ;;  %v3991_v16 = vld [vmem:[#allocation5 + $0x84] ss:$16 sps:$4 sm:$0xff]  }
  0x90   : > { %1142 = vmatpush1.bf16.msra.mxu0 %v3977_v6  ;;  %1224 = vmatpush1.bf16.msra.mxu1 %v3978_v7  ;;  %v3993_v17 = vld [vmem:[#allocation5 + $0x8c] ss:$16 sps:$4 sm:$0xff]   ;;  %v3995_v18 = vld [vmem:[#allocation5 + $0x80] ss:$16 sps:$4 sm:$0xff]   ;;  %v3996_v19 = vld [vmem:[#allocation5 + $0x88] ss:$16 sps:$4 sm:$0xff]  }
  0x91   : > { %1143 = vmatprep.subr.bf16.mxu0 %v3979_v8  ;;  %1225 = vmatprep.subr.bf16.mxu1 %v3981_v9  ;;  %v3997_v20 = vld [vmem:[#allocation5 + $0xa4] ss:$16 sps:$4 sm:$0xff]   ;;  %v3999_v21 = vld [vmem:[#allocation5 + $0xac] ss:$16 sps:$4 sm:$0xff]   ;;  %v4001_v22 = vld [vmem:[#allocation5 + $0xa0] ss:$16 sps:$4 sm:$0xff]  }
  0x92   : > { %v4002_v23 = vld [vmem:[#allocation5 + $0xa8] ss:$16 sps:$4 sm:$0xff]   ;;  %v4003_v24 = vld [vmem:[#allocation5 + $0xc4] ss:$16 sps:$4 sm:$0xff]   ;;  %v4005_v25 = vld [vmem:[#allocation5 + $0xcc] ss:$16 sps:$4 sm:$0xff]  }
  0x93   : > { %v4893_v26 = vld [vmem:[#allocation5 + $0xc0] ss:$16 sps:$4 sm:$0xff]   ;;  %v4895_v27 = vld [vmem:[#allocation5 + $0xc8] ss:$16 sps:$4 sm:$0xff]   ;;  %v4897_v28 = vld [vmem:[#allocation5 + $0xe4] ss:$16 sps:$4 sm:$0xff]  }
  0x94   : > { %1144 = vmatpush1.bf16.msra.mxu0 %v3983_v10  ;;  %1226 = vmatpush1.bf16.msra.mxu1 %v3984_v11  ;;  %v4899_v29 = vld [vmem:[#allocation5 + $0xec] ss:$16 sps:$4 sm:$0xff]   ;;  %v4901_v30 = vld [vmem:[#allocation5 + $0xe0] ss:$16 sps:$4 sm:$0xff]   ;;  %v4905_v31 = vld [vmem:[#allocation5 + $0xe8] ss:$16 sps:$4 sm:$0xff]  }
  0x95   : > { %1145 = vmatprep.subr.bf16.mxu0 %v3985_v12  ;;  %1227 = vmatprep.subr.bf16.mxu1 %v3987_v13  ;;  %v4907_v32 = vld [vmem:[#allocation5 + $0x104] ss:$16 sps:$4 sm:$0xff]   ;;  %v4911_v33 = vld [vmem:[#allocation5 + $0x10c] ss:$16 sps:$4 sm:$0xff]   ;;  %v4913_v34 = vld [vmem:[#allocation5 + $0x100] ss:$16 sps:$4 sm:$0xff]  }
  0x96   : > { %v4915_v35 = vld [vmem:[#allocation5 + $0x108] ss:$16 sps:$4 sm:$0xff]   ;;  %v4919_v36 = vld [vmem:[#allocation5 + $0x124] ss:$16 sps:$4 sm:$0xff]   ;;  %v4923_v37 = vld [vmem:[#allocation5 + $0x12c] ss:$16 sps:$4 sm:$0xff]  }
  0x97   : > { %v4925_v38 = vld [vmem:[#allocation5 + $0x120] ss:$16 sps:$4 sm:$0xff]   ;;  %v4929_v39 = vld [vmem:[#allocation5 + $0x128] ss:$16 sps:$4 sm:$0xff]   ;;  %v4931_v40 = vld [vmem:[#allocation5 + $0x144] ss:$16 sps:$4 sm:$0xff]  }
  0x98   : > { %1146 = vmatpush1.bf16.msra.mxu0 %v3989_v14  ;;  %1228 = vmatpush1.bf16.msra.mxu1 %v3990_v15  ;;  %v4935_v41 = vld [vmem:[#allocation5 + $0x14c] ss:$16 sps:$4 sm:$0xff]   ;;  %v4937_v42 = vld [vmem:[#allocation5 + $0x140] ss:$16 sps:$4 sm:$0xff]   ;;  %v4939_v43 = vld [vmem:[#allocation5 + $0x148] ss:$16 sps:$4 sm:$0xff]  }
  0x99   : > { %1147 = vmatprep.subr.bf16.mxu0 %v3991_v16  ;;  %1229 = vmatprep.subr.bf16.mxu1 %v3993_v17  ;;  %v4943_v44 = vld [vmem:[#allocation5 + $0x164] ss:$16 sps:$4 sm:$0xff]   ;;  %v4947_v45 = vld [vmem:[#allocation5 + $0x16c] ss:$16 sps:$4 sm:$0xff]   ;;  %v4950_v47 = vld [vmem:[#allocation5 + $0x160] ss:$16 sps:$4 sm:$0xff]  }
  0x9a   : > { %v483_v46 = vld [vmem:[%s4879_s10] sm:$0xff]  ;;  %v4956_v49 = vld [vmem:[#allocation5 + $0x168] ss:$16 sps:$4 sm:$0xff]   ;;  %v4962_v51 = vld [vmem:[#allocation5 + $0x18c] ss:$16 sps:$4 sm:$0xff]   ;;  %s3403_s21 = sshll.u32 %s4875_s7, 5 }
  0x9b   : > { %v4952_v48 = vcombine.high %v483_v46, %v483_v46  ;;  %v4960_v50 = vld [vmem:[#allocation5 + $0x184] ss:$16 sps:$4 sm:$0xff]   ;;  %v4966_v52 = vld [vmem:[#allocation5 + $0x180] ss:$16 sps:$4 sm:$0xff]   ;;  %v4968_v53 = vld [vmem:[#allocation5 + $0x188] ss:$16 sps:$4 sm:$0xff]   ;;  %v5014_v4 = vcombine.low %v483_v46, %v483_v46 }
  0x9c   : > { %1148 = vmatpush1.bf16.msra.mxu0 %v3995_v18  ;;  %1230 = vmatpush1.bf16.msra.mxu1 %v3996_v19  ;;  %v4972_v54 = vld [vmem:[#allocation5 + $0x1a4] ss:$16 sps:$4 sm:$0xff]   ;;  %v4976_v55 = vld [vmem:[#allocation5 + $0x1ac] ss:$16 sps:$4 sm:$0xff]   ;;  %v4978_v56 = vld [vmem:[#allocation5 + $0x1a0] ss:$16 sps:$4 sm:$0xff]  }
  0x9d   : > { %1149 = vmatprep.subr.bf16.mxu0 %v3997_v20  ;;  %1231 = vmatprep.subr.bf16.mxu1 %v3999_v21  ;;  %v4982_v57 = vld [vmem:[#allocation5 + $0x1a8] ss:$16 sps:$4 sm:$0xff]   ;;  %v4986_v58 = vld [vmem:[#allocation5 + $0x1c4] ss:$16 sps:$4 sm:$0xff]   ;;  %v4988_v59 = vld [vmem:[#allocation5 + $0x1cc] ss:$16 sps:$4 sm:$0xff]  }
  0x9e   : > { %1171 = vmatprep.mubr.bf16.mxu0 %v4952_v48  ;;  %1253 = vmatprep.mubr.bf16.mxu1 %v4952_v48  ;;  %v4990_v60 = vld [vmem:[#allocation5 + $0x1c0] ss:$16 sps:$4 sm:$0xff]   ;;  %v4992_v61 = vld [vmem:[#allocation5 + $0x1c8] ss:$16 sps:$4 sm:$0xff]   ;;  %v4996_v62 = vld [vmem:[#allocation5 + $0x1e4] ss:$16 sps:$4 sm:$0xff]  }
  0x9f   : > { %v5000_v63 = vld [vmem:[#allocation5 + $0x1ec] ss:$16 sps:$4 sm:$0xff]   ;;  %v5002_v0 = vld [vmem:[#allocation5 + $0x1e0] ss:$16 sps:$4 sm:$0xff]   ;;  %v5006_v1 = vld [vmem:[#allocation5 + $0x1e8] ss:$16 sps:$4 sm:$0xff]  }
  0xa0   : > { %1150 = vmatpush1.bf16.msra.mxu0 %v4001_v22  ;;  %1232 = vmatpush1.bf16.msra.mxu1 %v4002_v23  ;;  %v5010_v2 = vld [vmem:[#allocation5 + $0x204] ss:$16 sps:$4 sm:$0xff]   ;;  %v5012_v3 = vld [vmem:[#allocation5 + $0x20c] ss:$16 sps:$4 sm:$0xff]   ;;  %v5016_v5 = vld [vmem:[#allocation5 + $0x200] ss:$16 sps:$4 sm:$0xff]  }
  0xa1   : > { %1151 = vmatprep.subr.bf16.mxu0 %v4003_v24  ;;  %1233 = vmatprep.subr.bf16.mxu1 %v4005_v25  ;;  %v5018_v6 = vld [vmem:[#allocation5 + $0x208] ss:$16 sps:$4 sm:$0xff]   ;;  %v5022_v7 = vld [vmem:[#allocation5 + $0x224] ss:$16 sps:$4 sm:$0xff]   ;;  %v5026_v8 = vld [vmem:[#allocation5 + $0x22c] ss:$16 sps:$4 sm:$0xff]  }
  0xa2   : > { %v5030_v9 = vld [vmem:[#allocation5 + $0x220] ss:$16 sps:$4 sm:$0xff]   ;;  %v5034_v10 = vld [vmem:[#allocation5 + $0x228] ss:$16 sps:$4 sm:$0xff]   ;;  %v5038_v11 = vld [vmem:[#allocation5 + $0x244] ss:$16 sps:$4 sm:$0xff]  }
  0xa3   : > { %v5040_v12 = vld [vmem:[#allocation5 + $0x24c] ss:$16 sps:$4 sm:$0xff]   ;;  %v5042_v13 = vld [vmem:[#allocation5 + $0x240] ss:$16 sps:$4 sm:$0xff]   ;;  %v5044_v14 = vld [vmem:[#allocation5 + $0x248] ss:$16 sps:$4 sm:$0xff]  }
  0xa4   : > { %1152 = vmatpush1.bf16.msra.mxu0 %v4893_v26  ;;  %1234 = vmatpush1.bf16.msra.mxu1 %v4895_v27  ;;  %7161 = vst [vmem:[#allocation15_spill] sm:$0xff] %v5042_v13  ;;  %7162 = vst [vmem:[#allocation16_spill] sm:$0xff] %v5044_v14  ;;  %v5048_v15 = vld [vmem:[#allocation5 + $0x264] ss:$16 sps:$4 sm:$0xff]   ;;  %v5052_v16 = vld [vmem:[#allocation5 + $0x26c] ss:$16 sps:$4 sm:$0xff]  }
  0xa5   : > { %1153 = vmatprep.subr.bf16.mxu0 %v4897_v28  ;;  %1235 = vmatprep.subr.bf16.mxu1 %v4899_v29  ;;  %7163 = vst [vmem:[#allocation17_spill] sm:$0xff] %v5048_v15  ;;  %7164 = vst [vmem:[#allocation18_spill] sm:$0xff] %v5052_v16  ;;  %v5054_v17 = vld [vmem:[#allocation5 + $0x260] ss:$16 sps:$4 sm:$0xff]   ;;  %v5058_v18 = vld [vmem:[#allocation5 + $0x268] ss:$16 sps:$4 sm:$0xff]  }
  0xa6   : > { %7165 = vst [vmem:[#allocation19_spill] sm:$0xff] %v5054_v17  ;;  %7166 = vst [vmem:[#allocation20_spill] sm:$0xff] %v5058_v18  ;;  %v5062_v19 = vld [vmem:[#allocation5 + $0x284] ss:$16 sps:$4 sm:$0xff]   ;;  %v5064_v20 = vld [vmem:[#allocation5 + $0x28c] ss:$16 sps:$4 sm:$0xff]  }
  0xa7   : > { %7167 = vst [vmem:[#allocation21_spill] sm:$0xff] %v5062_v19  ;;  %7168 = vst [vmem:[#allocation22_spill] sm:$0xff] %v5064_v20  ;;  %v5066_v21 = vld [vmem:[#allocation5 + $0x280] ss:$16 sps:$4 sm:$0xff]   ;;  %v5068_v22 = vld [vmem:[#allocation5 + $0x288] ss:$16 sps:$4 sm:$0xff]  }
  0xa8   : > { %1154 = vmatpush1.bf16.msra.mxu0 %v4901_v30  ;;  %1236 = vmatpush1.bf16.msra.mxu1 %v4905_v31  ;;  %7169 = vst [vmem:[#allocation23_spill] sm:$0xff] %v5066_v21  ;;  %7170 = vst [vmem:[#allocation24_spill] sm:$0xff] %v5068_v22  ;;  %v5072_v23 = vld [vmem:[#allocation5 + $0x2a4] ss:$16 sps:$4 sm:$0xff]   ;;  %v5076_v24 = vld [vmem:[#allocation5 + $0x2ac] ss:$16 sps:$4 sm:$0xff]  }
  0xa9   : > { %1155 = vmatprep.subr.bf16.mxu0 %v4907_v32  ;;  %1237 = vmatprep.subr.bf16.mxu1 %v4911_v33  ;;  %7171 = vst [vmem:[#allocation25_spill] sm:$0xff] %v5072_v23  ;;  %7172 = vst [vmem:[#allocation26_spill] sm:$0xff] %v5076_v24  ;;  %v5078_v25 = vld [vmem:[#allocation5 + $0x2a0] ss:$16 sps:$4 sm:$0xff]   ;;  %v5082_v46 = vld [vmem:[#allocation5 + $0x2a8] ss:$16 sps:$4 sm:$0xff]  }
  0xaa   : > { %7173 = vst [vmem:[#allocation27_spill] sm:$0xff] %v5078_v25  ;;  %7174 = vst [vmem:[#allocation28_spill] sm:$0xff] %v5082_v46  ;;  %s3621_s23 = sshll.u32 %s4703_s19, 9  ;;  %s257_s5 = scalar_lea.vmem [#allocation10], %s3403_s21 }
  0xab   : > { %s3293_s6 = sshll.u32 %s257_s5, 4  ;;  %s6719_s19 = scalar_lea.hbm %s6767_s4, %s3621_s23  ;;  %s6721_s6 = int_to_ptr.vmem [resolvable:$true] %s3293_s6 }
  0xac   : > { %1156 = vmatpush1.bf16.msra.mxu0 %v4913_v34  ;;  %1238 = vmatpush1.bf16.msra.mxu1 %v4915_v35  ;;  %s3279_s8 = scalar_lea.sflag [#allocation4], %s4875_s7  ;;  %s4571_s26 = scalar_lea.vmem %s6721_s6, 512 }
  0xad   : > { %1157 = vmatprep.subr.bf16.mxu0 %v4919_v36  ;;  %1239 = vmatprep.subr.bf16.mxu1 %v4923_v37  ;;  %p4572_p10 = scmp.ne.s32.totalorder %s6721_s6, %s4571_s26  ;;  %s4656_s29 = smov [#allocation10]  }
  0xae   : > { %s4575_s20 = sshll.u32 %s4656_s29, 4  ;;  %s4576_s20 = int_to_ptr.vmem [resolvable:$false] %s4575_s20 }
  0xaf   : > { %p4573_p3 = pnand %p4572_p10, %p4830_p5  ;;  %s4577_s30 = scalar_lea.vmem %s4576_s20, 1024 }
  0xb0   : > { %1158 = vmatpush1.bf16.msra.mxu0 %v4925_v38  ;;  %1240 = vmatpush1.bf16.msra.mxu1 %v4929_v39  ;;  %p4578_p12 = scmp.lt.s32.totalorder %s6721_s6, %s4576_s20  ;;  %p4579_p1 = scmp.lt.s32.totalorder %s4577_s30, %s4571_s26 }
  0xb1   : > { %1159 = vmatprep.subr.bf16.mxu0 %v4931_v40  ;;  %1241 = vmatprep.subr.bf16.mxu1 %v4935_v41  ;;  %p4574_p11 = pneg %p4573_p3 }
  0xb2   : > { %p4580_p2 = por %p4579_p1, %p4578_p12 }
  0xb4   : > { %1160 = vmatpush1.bf16.msra.mxu0 %v4937_v42  ;;  %1242 = vmatpush1.bf16.msra.mxu1 %v4939_v43  ;;  %p4581_p4 = pnand %p4580_p2, %p4574_p11 }
  0xb5   : > { %1161 = vmatprep.subr.bf16.mxu0 %v4943_v44  ;;  %1243 = vmatprep.subr.bf16.mxu1 %v4947_v45 }
  0xb8   : > { %1162 = vmatpush1.bf16.msra.mxu0 %v4950_v47  ;;  %1244 = vmatpush1.bf16.msra.mxu1 %v4956_v49 }
  0xb9   : > { %1163 = vmatprep.subr.bf16.mxu0 %v4960_v50  ;;  %1245 = vmatprep.subr.bf16.mxu1 %v4962_v51 }
  0xbc   : > { %1164 = vmatpush1.bf16.msra.mxu0 %v4966_v52  ;;  %1246 = vmatpush1.bf16.msra.mxu1 %v4968_v53 }
  0xbd   : > { %1165 = vmatprep.subr.bf16.mxu0 %v4972_v54  ;;  %1247 = vmatprep.subr.bf16.mxu1 %v4976_v55 }
  0xc0   : > { %1166 = vmatpush1.bf16.msra.mxu0 %v4978_v56  ;;  %1248 = vmatpush1.bf16.msra.mxu1 %v4982_v57 }
  0xc1   : > { %1167 = vmatprep.subr.bf16.mxu0 %v4986_v58  ;;  %1249 = vmatprep.subr.bf16.mxu1 %v4988_v59 }
  0xc4   : > { %1168 = vmatpush1.bf16.msra.mxu0 %v4990_v60  ;;  %1250 = vmatpush1.bf16.msra.mxu1 %v4992_v61 }
  0xc5   : > { %1169 = vmatprep.subr.bf16.mxu0 %v4996_v62  ;;  %1251 = vmatprep.subr.bf16.mxu1 %v5000_v63 }
  0xc8   : > { %1170 = vmatpush1.bf16.msra.mxu0 %v5002_v0  ;;  %1252 = vmatpush1.bf16.msra.mxu1 %v5006_v1 }
  0xc9   : > { %1180 = vmatprep.subr.bf16.mxu0 %v5010_v2  ;;  %1262 = vmatprep.subr.bf16.mxu1 %v5012_v3 }
  0xcb   : > { %1172 = vmatmul.mubr.bf16.vlgmr.msra.gmra.mrb[0].mxu0 %v5014_v4  ;;  %1254 = vmatmul.mubr.bf16.vlgmr.msra.gmra.mrb[0].mxu1 %v5014_v4 }
  0xcc   : > { %1181 = vmatpush1.bf16.msra.mxu0 %v5016_v5  ;;  %1263 = vmatpush1.bf16.msra.mxu1 %v5018_v6 }
  0xcd   : > { %1182 = vmatprep.subr.bf16.mxu0 %v5022_v7  ;;  %1264 = vmatprep.subr.bf16.mxu1 %v5026_v8 }
  0xd0   : > { %1183 = vmatpush1.bf16.msra.mxu0 %v5030_v9  ;;  %1265 = vmatpush1.bf16.msra.mxu1 %v5034_v10 }
  0xd1   : > { %1184 = vmatprep.subr.bf16.mxu0 %v5038_v11  ;;  %1266 = vmatprep.subr.bf16.mxu1 %v5040_v12 }
  0xd4   : > { %1185 = vmatpush1.bf16.msra.mxu0 %v5042_v13  ;;  %1267 = vmatpush1.bf16.msra.mxu1 %v5044_v14  ;;  %v5129_v14 = vld [vmem:[#allocation5 + $0x324] ss:$16 sps:$4 sm:$0xff]   ;;  %v5201_v13 = vld [vmem:[#allocation5 + $0x3ec] ss:$16 sps:$4 sm:$0xff]  }
  0xd5   : > { %1186 = vmatprep.subr.bf16.mxu0 %v5048_v15  ;;  %1268 = vmatprep.subr.bf16.mxu1 %v5052_v16  ;;  %v5113_v15 = vld [vmem:[#allocation5 + $0x2e8] ss:$16 sps:$4 sm:$0xff]   ;;  %7187 = vst [vmem:[#allocation41_spill] sm:$0xff] %v5129_v14 }
  0xd6   : > { %7182 = vst [vmem:[#allocation36_spill] sm:$0xff] %v5113_v15 }
  0xd8   : > { %1187 = vmatpush1.bf16.msra.mxu0 %v5054_v17  ;;  %1269 = vmatpush1.bf16.msra.mxu1 %v5058_v18  ;;  %v5086_v18 = vld [vmem:[#allocation5 + $0x2c4] ss:$16 sps:$4 sm:$0xff]   ;;  %v5088_v17 = vld [vmem:[#allocation5 + $0x2cc] ss:$16 sps:$4 sm:$0xff]  }
  0xd9   : > { %1188 = vmatprep.subr.bf16.mxu0 %v5062_v19  ;;  %1270 = vmatprep.subr.bf16.mxu1 %v5064_v20  ;;  %7175 = vst [vmem:[#allocation29_spill] sm:$0xff] %v5086_v18  ;;  %7176 = vst [vmem:[#allocation30_spill] sm:$0xff] %v5088_v17  ;;  %v5091_v19 = vld [vmem:[%s4879_s10 + $0x8] sm:$0xff]  ;;  %v5093_v20 = vld [vmem:[#allocation5 + $0x2c0] ss:$16 sps:$4 sm:$0xff]  }
  0xda   : > { %7177 = vst [vmem:[#allocation31_spill] sm:$0xff] %v5093_v20  ;;  %v5097_v16 = vcombine.high %v5091_v19, %v5091_v19 }
  0xdc   : > { %1189 = vmatpush1.bf16.msra.mxu0 %v5066_v21  ;;  %1271 = vmatpush1.bf16.msra.mxu1 %v5068_v22  ;;  %v5099_v21 = vld [vmem:[#allocation5 + $0x2c8] ss:$16 sps:$4 sm:$0xff]   ;;  %v5109_v22 = vld [vmem:[#allocation5 + $0x2e0] ss:$16 sps:$4 sm:$0xff]  }
  0xdd   : > { %1190 = vmatprep.subr.bf16.mxu0 %v5072_v23  ;;  %1272 = vmatprep.subr.bf16.mxu1 %v5076_v24  ;;  %7178 = vst [vmem:[#allocation32_spill] sm:$0xff] %v5099_v21  ;;  %v5103_v23 = vld [vmem:[#allocation5 + $0x2e4] ss:$16 sps:$4 sm:$0xff]   ;;  %v5107_v24 = vld [vmem:[#allocation5 + $0x2ec] ss:$16 sps:$4 sm:$0xff]   ;;  %7181 = vst [vmem:[#allocation35_spill] sm:$0xff] %v5109_v22 }
  0xde   : > { %7179 = vst [vmem:[#allocation33_spill] sm:$0xff] %v5103_v23  ;;  %7180 = vst [vmem:[#allocation34_spill] sm:$0xff] %v5107_v24  ;;  %1212 = vmatprep.mubr.bf16.mxu0 %v5097_v16  ;;  %1294 = vmatprep.mubr.bf16.mxu1 %v5097_v16 }
  0xe0   : > { %1191 = vmatpush1.bf16.msra.mxu0 %v5078_v25  ;;  %1273 = vmatpush1.bf16.msra.mxu1 %v5082_v46  ;;  %v5117_v46 = vld [vmem:[#allocation5 + $0x304] ss:$16 sps:$4 sm:$0xff]   ;;  %v5125_v25 = vld [vmem:[#allocation5 + $0x308] ss:$16 sps:$4 sm:$0xff]  }
  0xe1   : > { %1192 = vmatprep.subr.bf16.mxu0 %v5086_v18  ;;  %1274 = vmatprep.subr.bf16.mxu1 %v5088_v17  ;;  %7183 = vst [vmem:[#allocation37_spill] sm:$0xff] %v5117_v46  ;;  %v5121_v17 = vld [vmem:[#allocation5 + $0x30c] ss:$16 sps:$4 sm:$0xff]   ;;  %v5123_v18 = vld [vmem:[#allocation5 + $0x300] ss:$16 sps:$4 sm:$0xff]   ;;  %7186 = vst [vmem:[#allocation40_spill] sm:$0xff] %v5125_v25 }
  0xe2   : > { %7184 = vst [vmem:[#allocation38_spill] sm:$0xff] %v5121_v17  ;;  %7185 = vst [vmem:[#allocation39_spill] sm:$0xff] %v5123_v18 }
  0xe4   : > { %1193 = vmatpush1.bf16.msra.mxu0 %v5093_v20  ;;  %1275 = vmatpush1.bf16.msra.mxu1 %v5099_v21  ;;  %v5133_v21 = vld [vmem:[#allocation5 + $0x32c] ss:$16 sps:$4 sm:$0xff]   ;;  %v5141_v20 = vld [vmem:[#allocation5 + $0x344] ss:$16 sps:$4 sm:$0xff]  }
  0xe5   : > { %1194 = vmatprep.subr.bf16.mxu0 %v5103_v23  ;;  %1276 = vmatprep.subr.bf16.mxu1 %v5107_v24  ;;  %7188 = vst [vmem:[#allocation42_spill] sm:$0xff] %v5133_v21  ;;  %v5135_v23 = vld [vmem:[#allocation5 + $0x320] ss:$16 sps:$4 sm:$0xff]   ;;  %v5137_v24 = vld [vmem:[#allocation5 + $0x328] ss:$16 sps:$4 sm:$0xff]   ;;  %7191 = vst [vmem:[#allocation45_spill] sm:$0xff] %v5141_v20 }
  0xe6   : > { %7189 = vst [vmem:[#allocation43_spill] sm:$0xff] %v5135_v23  ;;  %7190 = vst [vmem:[#allocation44_spill] sm:$0xff] %v5137_v24 }
  0xe8   : > { %1195 = vmatpush1.bf16.msra.mxu0 %v5109_v22  ;;  %1277 = vmatpush1.bf16.msra.mxu1 %v5113_v15  ;;  %v5145_v15 = vld [vmem:[#allocation5 + $0x34c] ss:$16 sps:$4 sm:$0xff]   ;;  %v5153_v22 = vld [vmem:[#allocation5 + $0x364] ss:$16 sps:$4 sm:$0xff]  }
  0xe9   : > { %1196 = vmatprep.subr.bf16.mxu0 %v5117_v46  ;;  %1278 = vmatprep.subr.bf16.mxu1 %v5121_v17  ;;  %7192 = vst [vmem:[#allocation46_spill] sm:$0xff] %v5145_v15  ;;  %v5147_v46 = vld [vmem:[#allocation5 + $0x340] ss:$16 sps:$4 sm:$0xff]   ;;  %v5149_v17 = vld [vmem:[#allocation5 + $0x348] ss:$16 sps:$4 sm:$0xff]   ;;  %7195 = vst [vmem:[#allocation49_spill] sm:$0xff] %v5153_v22 }
  0xea   : > { %7193 = vst [vmem:[#allocation47_spill] sm:$0xff] %v5147_v46  ;;  %7194 = vst [vmem:[#allocation48_spill] sm:$0xff] %v5149_v17 }
  0xec   : > { %1197 = vmatpush1.bf16.msra.mxu0 %v5123_v18  ;;  %1279 = vmatpush1.bf16.msra.mxu1 %v5125_v25  ;;  %v5157_v25 = vld [vmem:[#allocation5 + $0x36c] ss:$16 sps:$4 sm:$0xff]   ;;  %v5165_v18 = vld [vmem:[#allocation5 + $0x384] ss:$16 sps:$4 sm:$0xff]  }
  0xed   : > { %1198 = vmatprep.subr.bf16.mxu0 %v5129_v14  ;;  %1280 = vmatprep.subr.bf16.mxu1 %v5133_v21  ;;  %7196 = vst [vmem:[#allocation50_spill] sm:$0xff] %v5157_v25  ;;  %v5159_v14 = vld [vmem:[#allocation5 + $0x360] ss:$16 sps:$4 sm:$0xff]   ;;  %v5161_v21 = vld [vmem:[#allocation5 + $0x368] ss:$16 sps:$4 sm:$0xff]   ;;  %7199 = vst [vmem:[#allocation53_spill] sm:$0xff] %v5165_v18 }
  0xee   : > { %7197 = vst [vmem:[#allocation51_spill] sm:$0xff] %v5159_v14  ;;  %7198 = vst [vmem:[#allocation52_spill] sm:$0xff] %v5161_v21 }
  0xf0   : > { %1199 = vmatpush1.bf16.msra.mxu0 %v5135_v23  ;;  %1281 = vmatpush1.bf16.msra.mxu1 %v5137_v24  ;;  %v5169_v24 = vld [vmem:[#allocation5 + $0x38c] ss:$16 sps:$4 sm:$0xff]   ;;  %v5177_v23 = vld [vmem:[#allocation5 + $0x3a4] ss:$16 sps:$4 sm:$0xff]  }
  0xf1   : > { %1200 = vmatprep.subr.bf16.mxu0 %v5141_v20  ;;  %1282 = vmatprep.subr.bf16.mxu1 %v5145_v15  ;;  %7200 = vst [vmem:[#allocation54_spill] sm:$0xff] %v5169_v24  ;;  %v5171_v20 = vld [vmem:[#allocation5 + $0x380] ss:$16 sps:$4 sm:$0xff]   ;;  %v5173_v15 = vld [vmem:[#allocation5 + $0x388] ss:$16 sps:$4 sm:$0xff]   ;;  %7203 = vst [vmem:[#allocation57_spill] sm:$0xff] %v5177_v23 }
  0xf2   : > { %7201 = vst [vmem:[#allocation55_spill] sm:$0xff] %v5171_v20  ;;  %7202 = vst [vmem:[#allocation56_spill] sm:$0xff] %v5173_v15 }
  0xf4   : > { %1201 = vmatpush1.bf16.msra.mxu0 %v5147_v46  ;;  %1283 = vmatpush1.bf16.msra.mxu1 %v5149_v17  ;;  %v5181_v17 = vld [vmem:[#allocation5 + $0x3ac] ss:$16 sps:$4 sm:$0xff]   ;;  %v5189_v46 = vld [vmem:[#allocation5 + $0x3c4] ss:$16 sps:$4 sm:$0xff]  }
  0xf5   : > { %1202 = vmatprep.subr.bf16.mxu0 %v5153_v22  ;;  %1284 = vmatprep.subr.bf16.mxu1 %v5157_v25  ;;  %7204 = vst [vmem:[#allocation58_spill] sm:$0xff] %v5181_v17  ;;  %v5183_v22 = vld [vmem:[#allocation5 + $0x3a0] ss:$16 sps:$4 sm:$0xff]   ;;  %v5185_v25 = vld [vmem:[#allocation5 + $0x3a8] ss:$16 sps:$4 sm:$0xff]   ;;  %7206 = vst [vmem:[#allocation60_spill] sm:$0xff] %v5189_v46 }
  0xf6   : > { %7205 = vst [vmem:[#allocation59_spill] sm:$0xff] %v5185_v25 }
  0xf8   : > { %1203 = vmatpush1.bf16.msra.mxu0 %v5159_v14  ;;  %1285 = vmatpush1.bf16.msra.mxu1 %v5161_v21  ;;  %v5193_v21 = vld [vmem:[#allocation5 + $0x3cc] ss:$16 sps:$4 sm:$0xff]   ;;  %v5199_v14 = vld [vmem:[#allocation5 + $0x3e4] ss:$16 sps:$4 sm:$0xff]  }
  0xf9   : > { %1204 = vmatprep.subr.bf16.mxu0 %v5165_v18  ;;  %1286 = vmatprep.subr.bf16.mxu1 %v5169_v24  ;;  %7207 = vst [vmem:[#allocation61_spill] sm:$0xff] %v5193_v21  ;;  %v5195_v18 = vld [vmem:[#allocation5 + $0x3c0] ss:$16 sps:$4 sm:$0xff]   ;;  %v5197_v24 = vld [vmem:[#allocation5 + $0x3c8] ss:$16 sps:$4 sm:$0xff]   ;;  %7209 = vst [vmem:[#allocation63_spill] sm:$0xff] %v5199_v14 }
  0xfa   : > { %7208 = vst [vmem:[#allocation62_spill] sm:$0xff] %v5197_v24 }
  0xfc   : > { %1205 = vmatpush1.bf16.msra.mxu0 %v5171_v20  ;;  %1287 = vmatpush1.bf16.msra.mxu1 %v5173_v15  ;;  %v5211_v15 = vld [vmem:[#allocation7 + $0x40] sm:$0xff]  }
  0xfd   : > { %1206 = vmatprep.subr.bf16.mxu0 %v5177_v23  ;;  %1288 = vmatprep.subr.bf16.mxu1 %v5181_v17  ;;  %v5207_v23 = vld [vmem:[#allocation5 + $0x3e0] ss:$16 sps:$4 sm:$0xff]   ;;  %v5209_v17 = vld [vmem:[#allocation5 + $0x3e8] ss:$16 sps:$4 sm:$0xff]   ;;  %7211 = vst [vmem:[#allocation65_spill] sm:$0xff] %v5211_v15 }
  0xfe   : > { %7210 = vst [vmem:[#allocation64_spill] sm:$0xff] %v5207_v23  ;;  %v5213_v20 = vld [vmem:[#allocation7 + $0xc0] sm:$0xff]  }
  0xff   : > { %7212 = vst [vmem:[#allocation66_spill] sm:$0xff] %v5213_v20 }
 0x100   : > { %1207 = vmatpush1.bf16.msra.mxu0 %v5183_v22  ;;  %1289 = vmatpush1.bf16.msra.mxu1 %v5185_v25  ;;  %v5219_v25 = vld [vmem:[#allocation7] sm:$0xff]  }
 0x101   : > { %1208 = vmatprep.subr.bf16.mxu0 %v5189_v46  ;;  %1290 = vmatprep.subr.bf16.mxu1 %v5193_v21  ;;  %7213 = vst [vmem:[#allocation67_spill] sm:$0xff] %v5219_v25  ;;  %v5221_v46 = vld [vmem:[#allocation7 + $0x80] sm:$0xff]   ;;  %v5225_v21 = vcombine.low %v5091_v19, %v5091_v19  ;;  %v5239_v19 = vld [vmem:[#allocation7 + $0x8] sm:$0xff]  }
 0x102   : > { %7214 = vst [vmem:[#allocation68_spill] sm:$0xff] %v5221_v46 }
 0x104   : > { %1209 = vmatpush1.bf16.msra.mxu0 %v5195_v18  ;;  %1291 = vmatpush1.bf16.msra.mxu1 %v5197_v24  ;;  %v5231_v24 = vld [vmem:[#allocation7 + $0x48] sm:$0xff]  }
 0x105   : > { %1210 = vmatprep.subr.bf16.mxu0 %v5199_v14  ;;  %1292 = vmatprep.subr.bf16.mxu1 %v5201_v13  ;;  %7215 = vst [vmem:[#allocation69_spill] sm:$0xff] %v5231_v24  ;;  %v5233_v14 = vld [vmem:[#allocation7 + $0xc8] sm:$0xff]  }
 0x106   : > { %7216 = vst [vmem:[#allocation70_spill] sm:$0xff] %v5233_v14 }
 0x108   : > { %1211 = vmatpush1.bf16.msra.mxu0 %v5207_v23  ;;  %1293 = vmatpush1.bf16.msra.mxu1 %v5209_v17  ;;  %v5241_v23 = vld [vmem:[#allocation7 + $0x88] sm:$0xff]  }
 0x109   : > { %3622 = vmatprep.subr.bf16.mxu0 %v5211_v15  ;;  %3644 = vmatprep.subr.bf16.mxu1 %v5213_v20  ;;  %7217 = vst [vmem:[#allocation71_spill] sm:$0xff] %v5241_v23  ;;  %v5245_v20 = vld [vmem:[#allocation7 + $0x50] sm:$0xff]  }
 0x10a   : > { %7218 = vst [vmem:[#allocation72_spill] sm:$0xff] %v5245_v20  ;;  %v5247_v15 = vld [vmem:[#allocation7 + $0xd0] sm:$0xff]  }
 0x10b   : > { %1213 = vmatmul.mubr.bf16.vlgmr.msra.gmra.mrb[0].mxu0 %v5225_v21  ;;  %1295 = vmatmul.mubr.bf16.vlgmr.msra.gmra.mrb[0].mxu1 %v5225_v21  ;;  %7219 = vst [vmem:[#allocation73_spill] sm:$0xff] %v5247_v15 }
 0x10c   : > { %3623 = vmatpush3.bf16.msra.mxu0 %v5219_v25  ;;  %3645 = vmatpush3.bf16.msra.mxu1 %v5221_v46  ;;  %v5253_v46 = vld [vmem:[#allocation7 + $0x10] sm:$0xff]  }
 0x10d   : > { %3624 = vmatprep.subr.bf16.mxu0 %v5231_v24  ;;  %3646 = vmatprep.subr.bf16.mxu1 %v5233_v14  ;;  %7220 = vst [vmem:[#allocation74_spill] sm:$0xff] %v5253_v46  ;;  %v5255_v25 = vld [vmem:[#allocation7 + $0x90] sm:$0xff]   ;;  %v5259_v14 = vld [vmem:[#allocation7 + $0x58] sm:$0xff]  }
 0x10e   : > { %1527 = vmatprep.mubr.bf16.mxu0 %v4952_v48  ;;  %1567 = vmatprep.mubr.bf16.mxu1 %v5097_v16  ;;  %7221 = vst [vmem:[#allocation75_spill] sm:$0xff] %v5255_v25  ;;  %7222 = vst [vmem:[#allocation76_spill] sm:$0xff] %v5259_v14  ;;  %v5261_v24 = vld [vmem:[#allocation7 + $0xd8] sm:$0xff]  }
 0x10f   : > { %7223 = vst [vmem:[#allocation77_spill] sm:$0xff] %v5261_v24  ;;  %v5265_v48 = vld [vmem:[#allocation7 + $0x18] sm:$0xff]  }
 0x110   : > { %3625 = vmatpush3.bf16.msra.mxu0 %v5239_v19  ;;  %3647 = vmatpush3.bf16.msra.mxu1 %v5241_v23  ;;  %7224 = vst [vmem:[#allocation78_spill] sm:$0xff] %v5265_v48  ;;  %v5267_v16 = vld [vmem:[#allocation7 + $0x98] sm:$0xff]   ;;  %v5271_v23 = vld [vmem:[#allocation7 + $0x60] sm:$0xff]  }
 0x111   : > { %3626 = vmatprep.subr.bf16.mxu0 %v5245_v20  ;;  %3648 = vmatprep.subr.bf16.mxu1 %v5247_v15  ;;  %7225 = vst [vmem:[#allocation79_spill] sm:$0xff] %v5267_v16  ;;  %7226 = vst [vmem:[#allocation80_spill] sm:$0xff] %v5271_v23  ;;  %v5273_v20 = vld [vmem:[#allocation7 + $0xe0] sm:$0xff]  }
 0x112   : > { %7227 = vst [vmem:[#allocation81_spill] sm:$0xff] %v5273_v20  ;;  %v5277_v15 = vld [vmem:[#allocation7 + $0x20] sm:$0xff]  }
 0x113   : > { %7228 = vst [vmem:[#allocation82_spill] sm:$0xff] %v5277_v15 }
 0x114   : > { %3627 = vmatpush3.bf16.msra.mxu0 %v5253_v46  ;;  %3649 = vmatpush3.bf16.msra.mxu1 %v5255_v25  ;;  %v5279_v46 = vld [vmem:[#allocation7 + $0xa0] sm:$0xff]   ;;  %v5283_v25 = vld [vmem:[#allocation7 + $0x68] sm:$0xff]  }
 0x115   : > { %3628 = vmatprep.subr.bf16.mxu0 %v5259_v14  ;;  %3650 = vmatprep.subr.bf16.mxu1 %v5261_v24  ;;  %7229 = vst [vmem:[#allocation83_spill] sm:$0xff] %v5279_v46  ;;  %7230 = vst [vmem:[#allocation84_spill] sm:$0xff] %v5283_v25  ;;  %v5285_v14 = vld [vmem:[#allocation7 + $0xe8] sm:$0xff]  }
 0x116   : > { %7231 = vst [vmem:[#allocation85_spill] sm:$0xff] %v5285_v14  ;;  %v5289_v24 = vld [vmem:[#allocation7 + $0x28] sm:$0xff]  }
 0x117   : > { %7232 = vst [vmem:[#allocation86_spill] sm:$0xff] %v5289_v24 }
 0x118   : > { %3629 = vmatpush3.bf16.msra.mxu0 %v5265_v48  ;;  %3651 = vmatpush3.bf16.msra.mxu1 %v5267_v16  ;;  %v5291_v48 = vld [vmem:[#allocation7 + $0xa8] sm:$0xff]   ;;  %v5295_v16 = vld [vmem:[#allocation7 + $0x70] sm:$0xff]  }
 0x119   : > { %3630 = vmatprep.subr.bf16.mxu0 %v5271_v23  ;;  %3652 = vmatprep.subr.bf16.mxu1 %v5273_v20  ;;  %7233 = vst [vmem:[#allocation87_spill] sm:$0xff] %v5291_v48  ;;  %7234 = vst [vmem:[#allocation88_spill] sm:$0xff] %v5295_v16  ;;  %v5297_v20 = vld [vmem:[#allocation7 + $0xf0] sm:$0xff]   ;;  %v5313_v23 = vld [vmem:[#allocation7 + $0x38] sm:$0xff]  }
 0x11a   : > { %7235 = vst [vmem:[#allocation89_spill] sm:$0xff] %v5297_v20  ;;  %7240 = vst [vmem:[#allocation94_spill] sm:$0xff] %v5313_v23 }
 0x11c   : > { %3631 = vmatpush3.bf16.msra.mxu0 %v5277_v15  ;;  %3653 = vmatpush3.bf16.msra.mxu1 %v5279_v46  ;;  %v5301_v15 = vld [vmem:[#allocation7 + $0x30] sm:$0xff]  }
 0x11d   : > { %3632 = vmatprep.subr.bf16.mxu0 %v5283_v25  ;;  %3654 = vmatprep.subr.bf16.mxu1 %v5285_v14  ;;  %7236 = vst [vmem:[#allocation90_spill] sm:$0xff] %v5301_v15  ;;  %v5303_v46 = vld [vmem:[#allocation7 + $0xb0] sm:$0xff]   ;;  %v5307_v25 = vld [vmem:[#allocation7 + $0x78] sm:$0xff]  }
 0x11e   : > { %7237 = vst [vmem:[#allocation91_spill] sm:$0xff] %v5303_v46  ;;  %7238 = vst [vmem:[#allocation92_spill] sm:$0xff] %v5307_v25  ;;  %v5309_v14 = vld [vmem:[#allocation7 + $0xf8] sm:$0xff]  }
 0x11f   : > { %7239 = vst [vmem:[#allocation93_spill] sm:$0xff] %v5309_v14 }
 0x120   : > { %3633 = vmatpush3.bf16.msra.mxu0 %v5289_v24  ;;  %3655 = vmatpush3.bf16.msra.mxu1 %v5291_v48  ;;  %v5315_v24 = vld [vmem:[#allocation7 + $0xb8] sm:$0xff]   ;;  %v5320_v48 = vld [vmem:[%s4879_s10 + $0x10] sm:$0xff] }
 0x121   : > { %3634 = vmatprep.subr.bf16.mxu0 %v5295_v16  ;;  %3656 = vmatprep.subr.bf16.mxu1 %v5297_v20  ;;  %7241 = vst [vmem:[#allocation95_spill] sm:$0xff] %v5315_v24  ;;  %v5324_v20 = vld [vmem:[#allocation5 + $0x4] ss:$16 sps:$4 sm:$0xff]  }
 0x122   : > { %7242 = vst [vmem:[#allocation96_spill] sm:$0xff] %v5324_v20 }
 0x124   : > { %3635 = vmatpush3.bf16.msra.mxu0 %v5301_v15  ;;  %3657 = vmatpush3.bf16.msra.mxu1 %v5303_v46  ;;  %v5327_v15 = vld [vmem:[#allocation5 + $0xc] ss:$16 sps:$4 sm:$0xff]   ;;  %v5332_v46 = vcombine.high %v5320_v48, %v5320_v48 }
 0x125   : > { %3636 = vmatprep.subr.bf16.mxu0 %v5307_v25  ;;  %3658 = vmatprep.subr.bf16.mxu1 %v5309_v14  ;;  %7243 = vst [vmem:[#allocation97_spill] sm:$0xff] %v5327_v15  ;;  %v5336_v14 = vld [vmem:[#allocation5] ss:$16 sps:$4 sm:$0xff]  }
 0x126   : > { %7244 = vst [vmem:[#allocation98_spill] sm:$0xff] %v5336_v14 }
 0x128   : > { %3637 = vmatpush3.bf16.msra.mxu0 %v5313_v23  ;;  %3659 = vmatpush3.bf16.msra.mxu1 %v5315_v24  ;;  %v5339_v24 = vld [vmem:[#allocation5 + $0x8] ss:$16 sps:$4 sm:$0xff]  }
 0x129   : > { %1591 = vmatprep.subr.bf16.mxu0 %v5324_v20  ;;  %1673 = vmatprep.subr.bf16.mxu1 %v5327_v15  ;;  %7245 = vst [vmem:[#allocation99_spill] sm:$0xff] %v5339_v24  ;;  %v5342_v20 = vld [vmem:[#allocation5 + $0x24] ss:$16 sps:$4 sm:$0xff]   ;;  %v5345_v15 = vld [vmem:[#allocation5 + $0x2c] ss:$16 sps:$4 sm:$0xff]  }
 0x12a   : > { %7246 = vst [vmem:[#allocation100_spill] sm:$0xff] %v5342_v20  ;;  %7247 = vst [vmem:[#allocation101_spill] sm:$0xff] %v5345_v15 }
 0x12b   : > { %1528 = vmatmul.mubr.bf16.vlgmr.msra.gmra.mrb[4].mxu0 %v5014_v4  ;;  %1568 = vmatmul.mubr.bf16.vlgmr.msra.gmra.mrb[4].mxu1 %v5225_v21  ;;  %v5350_v4 = vld [vmem:[#allocation5 + $0x20] ss:$16 sps:$4 sm:$0xff]   ;;  %v5353_v21 = vld [vmem:[#allocation5 + $0x28] ss:$16 sps:$4 sm:$0xff]  }
 0x12c   : > { %1592 = vmatpush1.bf16.msra.mxu0 %v5336_v14  ;;  %1674 = vmatpush1.bf16.msra.mxu1 %v5339_v24  ;;  %7248 = vst [vmem:[#allocation102_spill] sm:$0xff] %v5350_v4  ;;  %7249 = vst [vmem:[#allocation103_spill] sm:$0xff] %v5353_v21  ;;  %v5356_v24 = vld [vmem:[#allocation5 + $0x44] ss:$16 sps:$4 sm:$0xff]   ;;  %v5365_v14 = vld [vmem:[#allocation5 + $0x48] ss:$16 sps:$4 sm:$0xff]  }
 0x12d   : > { %1593 = vmatprep.subr.bf16.mxu0 %v5342_v20  ;;  %1675 = vmatprep.subr.bf16.mxu1 %v5345_v15  ;;  %7250 = vst [vmem:[#allocation104_spill] sm:$0xff] %v5356_v24  ;;  %v5359_v20 = vld [vmem:[#allocation5 + $0x4c] ss:$16 sps:$4 sm:$0xff]   ;;  %v5362_v15 = vld [vmem:[#allocation5 + $0x40] ss:$16 sps:$4 sm:$0xff]   ;;  %7253 = vst [vmem:[#allocation107_spill] sm:$0xff] %v5365_v14 }
 0x12e   : > { %1623 = vmatprep.mubr.bf16.mxu0 %v5332_v46  ;;  %1705 = vmatprep.mubr.bf16.mxu1 %v5332_v46  ;;  %7251 = vst [vmem:[#allocation105_spill] sm:$0xff] %v5359_v20  ;;  %7252 = vst [vmem:[#allocation106_spill] sm:$0xff] %v5362_v15 }
 0x130   : > { %1594 = vmatpush1.bf16.msra.mxu0 %v5350_v4  ;;  %1676 = vmatpush1.bf16.msra.mxu1 %v5353_v21  ;;  %v5368_v4 = vld [vmem:[#allocation5 + $0x64] ss:$16 sps:$4 sm:$0xff]   ;;  %v5371_v21 = vld [vmem:[#allocation5 + $0x6c] ss:$16 sps:$4 sm:$0xff]  }
 0x131   : > { %1595 = vmatprep.subr.bf16.mxu0 %v5356_v24  ;;  %1677 = vmatprep.subr.bf16.mxu1 %v5359_v20  ;;  %7254 = vst [vmem:[#allocation108_spill] sm:$0xff] %v5368_v4  ;;  %7255 = vst [vmem:[#allocation109_spill] sm:$0xff] %v5371_v21  ;;  %v5374_v24 = vld [vmem:[#allocation5 + $0x60] ss:$16 sps:$4 sm:$0xff]   ;;  %v5377_v20 = vld [vmem:[#allocation5 + $0x68] ss:$16 sps:$4 sm:$0xff]  }
 0x132   : > { %7256 = vst [vmem:[#allocation110_spill] sm:$0xff] %v5374_v24  ;;  %7257 = vst [vmem:[#allocation111_spill] sm:$0xff] %v5377_v20 }
 0x134   : > { %1596 = vmatpush1.bf16.msra.mxu0 %v5362_v15  ;;  %1678 = vmatpush1.bf16.msra.mxu1 %v5365_v14  ;;  %v5380_v15 = vld [vmem:[#allocation5 + $0x84] ss:$16 sps:$4 sm:$0xff]   ;;  %v5383_v14 = vld [vmem:[#allocation5 + $0x8c] ss:$16 sps:$4 sm:$0xff]  }
 0x135   : > { %1597 = vmatprep.subr.bf16.mxu0 %v5368_v4  ;;  %1679 = vmatprep.subr.bf16.mxu1 %v5371_v21  ;;  %7258 = vst [vmem:[#allocation112_spill] sm:$0xff] %v5380_v15  ;;  %7259 = vst [vmem:[#allocation113_spill] sm:$0xff] %v5383_v14  ;;  %v5386_v4 = vld [vmem:[#allocation5 + $0x80] ss:$16 sps:$4 sm:$0xff]   ;;  %v5389_v21 = vld [vmem:[#allocation5 + $0x88] ss:$16 sps:$4 sm:$0xff]  }
 0x136   : > { %7260 = vst [vmem:[#allocation114_spill] sm:$0xff] %v5386_v4  ;;  %7261 = vst [vmem:[#allocation115_spill] sm:$0xff] %v5389_v21 }
 0x138   : > { %1598 = vmatpush1.bf16.msra.mxu0 %v5374_v24  ;;  %1680 = vmatpush1.bf16.msra.mxu1 %v5377_v20  ;;  %v5392_v24 = vld [vmem:[#allocation5 + $0xa4] ss:$16 sps:$4 sm:$0xff]   ;;  %v5395_v20 = vld [vmem:[#allocation5 + $0xac] ss:$16 sps:$4 sm:$0xff]  }
 0x139   : > { %1599 = vmatprep.subr.bf16.mxu0 %v5380_v15  ;;  %1681 = vmatprep.subr.bf16.mxu1 %v5383_v14  ;;  %7262 = vst [vmem:[#allocation116_spill] sm:$0xff] %v5392_v24  ;;  %7263 = vst [vmem:[#allocation117_spill] sm:$0xff] %v5395_v20  ;;  %v5398_v15 = vld [vmem:[#allocation5 + $0xa0] ss:$16 sps:$4 sm:$0xff]   ;;  %v5401_v14 = vld [vmem:[#allocation5 + $0xa8] ss:$16 sps:$4 sm:$0xff]  }
 0x13a   : > { %7264 = vst [vmem:[#allocation118_spill] sm:$0xff] %v5398_v15  ;;  %7265 = vst [vmem:[#allocation119_spill] sm:$0xff] %v5401_v14 }
 0x13c   : > { %1600 = vmatpush1.bf16.msra.mxu0 %v5386_v4  ;;  %1682 = vmatpush1.bf16.msra.mxu1 %v5389_v21  ;;  %v5404_v4 = vld [vmem:[#allocation5 + $0xc4] ss:$16 sps:$4 sm:$0xff]   ;;  %v5407_v21 = vld [vmem:[#allocation5 + $0xcc] ss:$16 sps:$4 sm:$0xff]  }
 0x13d   : > { %1601 = vmatprep.subr.bf16.mxu0 %v5392_v24  ;;  %1683 = vmatprep.subr.bf16.mxu1 %v5395_v20  ;;  %7266 = vst [vmem:[#allocation120_spill] sm:$0xff] %v5404_v4  ;;  %7267 = vst [vmem:[#allocation121_spill] sm:$0xff] %v5407_v21 }
 0x140   : > { %1602 = vmatpush1.bf16.msra.mxu0 %v5398_v15  ;;  %1684 = vmatpush1.bf16.msra.mxu1 %v5401_v14 }
 0x141   : > { %1603 = vmatprep.subr.bf16.mxu0 %v5404_v4  ;;  %1685 = vmatprep.subr.bf16.mxu1 %v5407_v21 }
 0x144   : > { %1604 = vmatpush1.bf16.msra.mxu0 %v4893_v26  ;;  %1686 = vmatpush1.bf16.msra.mxu1 %v4895_v27  ;;  %v5448_v26 = vcombine.low %v5320_v48, %v5320_v48  ;;  %v5451_v27 = vld [vmem:[%s4879_s10 + $0x18] sm:$0xff] }
 0x145   : > { %1605 = vmatprep.subr.bf16.mxu0 %v4897_v28  ;;  %1687 = vmatprep.subr.bf16.mxu1 %v4899_v29  ;;  %v5459_v28 = vcombine.high %v5451_v27, %v5451_v27  ;;  %v7268_v29 = vld [vmem:[#allocation15_spill] sm:$0xff]  ;;  %v7313_v48 = vld [vmem:[#allocation60_spill] sm:$0xff] }
 0x148   : > { %1606 = vmatpush1.bf16.msra.mxu0 %v4901_v30  ;;  %1688 = vmatpush1.bf16.msra.mxu1 %v4905_v31  ;;  %v7269_v30 = vld [vmem:[#allocation16_spill] sm:$0xff]  ;;  %v7270_v31 = vld [vmem:[#allocation17_spill] sm:$0xff] }
 0x149   : > { %1607 = vmatprep.subr.bf16.mxu0 %v4907_v32  ;;  %1689 = vmatprep.subr.bf16.mxu1 %v4911_v33  ;;  %v7271_v32 = vld [vmem:[#allocation18_spill] sm:$0xff]  ;;  %v7272_v33 = vld [vmem:[#allocation19_spill] sm:$0xff] }
 0x14c   : > { %1608 = vmatpush1.bf16.msra.mxu0 %v4913_v34  ;;  %1690 = vmatpush1.bf16.msra.mxu1 %v4915_v35  ;;  %v7273_v34 = vld [vmem:[#allocation20_spill] sm:$0xff]  ;;  %v7274_v35 = vld [vmem:[#allocation21_spill] sm:$0xff] }
 0x14d   : > { %1609 = vmatprep.subr.bf16.mxu0 %v4919_v36  ;;  %1691 = vmatprep.subr.bf16.mxu1 %v4923_v37  ;;  %v7275_v36 = vld [vmem:[#allocation22_spill] sm:$0xff]  ;;  %v7276_v37 = vld [vmem:[#allocation23_spill] sm:$0xff] }
 0x150   : > { %1610 = vmatpush1.bf16.msra.mxu0 %v4925_v38  ;;  %1692 = vmatpush1.bf16.msra.mxu1 %v4929_v39  ;;  %v7277_v38 = vld [vmem:[#allocation24_spill] sm:$0xff]  ;;  %v7278_v39 = vld [vmem:[#allocation25_spill] sm:$0xff] }
 0x151   : > { %1611 = vmatprep.subr.bf16.mxu0 %v4931_v40  ;;  %1693 = vmatprep.subr.bf16.mxu1 %v4935_v41  ;;  %v7279_v40 = vld [vmem:[#allocation26_spill] sm:$0xff]  ;;  %v7280_v41 = vld [vmem:[#allocation27_spill] sm:$0xff] }
 0x154   : > { %1612 = vmatpush1.bf16.msra.mxu0 %v4937_v42  ;;  %1694 = vmatpush1.bf16.msra.mxu1 %v4939_v43  ;;  %v7281_v42 = vld [vmem:[#allocation28_spill] sm:$0xff]  ;;  %v7282_v43 = vld [vmem:[#allocation29_spill] sm:$0xff] }
 0x155   : > { %1613 = vmatprep.subr.bf16.mxu0 %v4943_v44  ;;  %1695 = vmatprep.subr.bf16.mxu1 %v4947_v45  ;;  %v7283_v44 = vld [vmem:[#allocation30_spill] sm:$0xff]  ;;  %v7284_v45 = vld [vmem:[#allocation31_spill] sm:$0xff] }
 0x158   : > { %1614 = vmatpush1.bf16.msra.mxu0 %v4950_v47  ;;  %1696 = vmatpush1.bf16.msra.mxu1 %v4956_v49  ;;  %v7285_v47 = vld [vmem:[#allocation32_spill] sm:$0xff]  ;;  %v7286_v49 = vld [vmem:[#allocation33_spill] sm:$0xff] }
 0x159   : > { %1615 = vmatprep.subr.bf16.mxu0 %v4960_v50  ;;  %1697 = vmatprep.subr.bf16.mxu1 %v4962_v51  ;;  %v7287_v50 = vld [vmem:[#allocation34_spill] sm:$0xff]  ;;  %v7288_v51 = vld [vmem:[#allocation35_spill] sm:$0xff] }
 0x15c   : > { %1616 = vmatpush1.bf16.msra.mxu0 %v4966_v52  ;;  %1698 = vmatpush1.bf16.msra.mxu1 %v4968_v53  ;;  %v7289_v52 = vld [vmem:[#allocation36_spill] sm:$0xff]  ;;  %v7290_v53 = vld [vmem:[#allocation37_spill] sm:$0xff] }
 0x15d   : > { %1617 = vmatprep.subr.bf16.mxu0 %v4972_v54  ;;  %1699 = vmatprep.subr.bf16.mxu1 %v4976_v55  ;;  %v7291_v54 = vld [vmem:[#allocation38_spill] sm:$0xff]  ;;  %v7292_v55 = vld [vmem:[#allocation39_spill] sm:$0xff] }
 0x160   : > { %1618 = vmatpush1.bf16.msra.mxu0 %v4978_v56  ;;  %1700 = vmatpush1.bf16.msra.mxu1 %v4982_v57  ;;  %v7293_v56 = vld [vmem:[#allocation40_spill] sm:$0xff]  ;;  %v7294_v57 = vld [vmem:[#allocation41_spill] sm:$0xff] }
 0x161   : > { %1619 = vmatprep.subr.bf16.mxu0 %v4986_v58  ;;  %1701 = vmatprep.subr.bf16.mxu1 %v4988_v59  ;;  %v7295_v58 = vld [vmem:[#allocation42_spill] sm:$0xff]  ;;  %v7296_v59 = vld [vmem:[#allocation43_spill] sm:$0xff] }
 0x164   : > { %1620 = vmatpush1.bf16.msra.mxu0 %v4990_v60  ;;  %1702 = vmatpush1.bf16.msra.mxu1 %v4992_v61  ;;  %v7297_v60 = vld [vmem:[#allocation44_spill] sm:$0xff]  ;;  %v7298_v61 = vld [vmem:[#allocation45_spill] sm:$0xff] }
 0x165   : > { %1621 = vmatprep.subr.bf16.mxu0 %v4996_v62  ;;  %1703 = vmatprep.subr.bf16.mxu1 %v5000_v63  ;;  %v7299_v62 = vld [vmem:[#allocation46_spill] sm:$0xff]  ;;  %v7300_v63 = vld [vmem:[#allocation47_spill] sm:$0xff] }
 0x168   : > { %1622 = vmatpush1.bf16.msra.mxu0 %v5002_v0  ;;  %1704 = vmatpush1.bf16.msra.mxu1 %v5006_v1  ;;  %v7301_v0 = vld [vmem:[#allocation48_spill] sm:$0xff]  ;;  %v7302_v1 = vld [vmem:[#allocation49_spill] sm:$0xff] }
 0x169   : > { %1632 = vmatprep.subr.bf16.mxu0 %v5010_v2  ;;  %1714 = vmatprep.subr.bf16.mxu1 %v5012_v3  ;;  %v7303_v2 = vld [vmem:[#allocation50_spill] sm:$0xff]  ;;  %v7304_v3 = vld [vmem:[#allocation51_spill] sm:$0xff] }
 0x16b   : > { %1624 = vmatmul.mubr.bf16.vlgmr.msra.gmra.mrb[8].mxu0 %v5448_v26  ;;  %1706 = vmatmul.mubr.bf16.vlgmr.msra.gmra.mrb[8].mxu1 %v5448_v26 }
 0x16c   : > { %1633 = vmatpush1.bf16.msra.mxu0 %v5016_v5  ;;  %1715 = vmatpush1.bf16.msra.mxu1 %v5018_v6  ;;  %v7305_v5 = vld [vmem:[#allocation52_spill] sm:$0xff]  ;;  %v7306_v6 = vld [vmem:[#allocation53_spill] sm:$0xff] }
 0x16d   : > { %1634 = vmatprep.subr.bf16.mxu0 %v5022_v7  ;;  %1716 = vmatprep.subr.bf16.mxu1 %v5026_v8  ;;  %v7307_v7 = vld [vmem:[#allocation54_spill] sm:$0xff]  ;;  %v7308_v8 = vld [vmem:[#allocation55_spill] sm:$0xff] }
 0x16e   : > { %1664 = vmatprep.mubr.bf16.mxu0 %v5459_v28  ;;  %1746 = vmatprep.mubr.bf16.mxu1 %v5459_v28 }
 0x170   : > { %1635 = vmatpush1.bf16.msra.mxu0 %v5030_v9  ;;  %1717 = vmatpush1.bf16.msra.mxu1 %v5034_v10  ;;  %v7309_v9 = vld [vmem:[#allocation56_spill] sm:$0xff]  ;;  %v7310_v10 = vld [vmem:[#allocation57_spill] sm:$0xff] }
 0x171   : > { %1636 = vmatprep.subr.bf16.mxu0 %v5038_v11  ;;  %1718 = vmatprep.subr.bf16.mxu1 %v5040_v12  ;;  %v7311_v11 = vld [vmem:[#allocation58_spill] sm:$0xff]  ;;  %v7312_v12 = vld [vmem:[#allocation59_spill] sm:$0xff] }
 0x174   : > { %1637 = vmatpush1.bf16.msra.mxu0 %v7268_v29  ;;  %1719 = vmatpush1.bf16.msra.mxu1 %v7269_v30  ;;  %v7314_v29 = vld [vmem:[#allocation61_spill] sm:$0xff]  ;;  %v7315_v30 = vld [vmem:[#allocation62_spill] sm:$0xff] }
 0x175   : > { %1638 = vmatprep.subr.bf16.mxu0 %v7270_v31  ;;  %1720 = vmatprep.subr.bf16.mxu1 %v7271_v32  ;;  %v7316_v31 = vld [vmem:[#allocation63_spill] sm:$0xff]  ;;  %v3570_v32 = vcombine.low %v5451_v27, %v5451_v27 }
 0x176   : > { %v7324_v27 = vld [vmem:[#allocation71_spill] sm:$0xff] }
 0x178   : > { %1639 = vmatpush1.bf16.msra.mxu0 %v7272_v33  ;;  %1721 = vmatpush1.bf16.msra.mxu1 %v7273_v34  ;;  %v7317_v33 = vld [vmem:[#allocation64_spill] sm:$0xff]  ;;  %v7318_v34 = vld [vmem:[#allocation65_spill] sm:$0xff] }
 0x179   : > { %1640 = vmatprep.subr.bf16.mxu0 %v7274_v35  ;;  %1722 = vmatprep.subr.bf16.mxu1 %v7275_v36  ;;  %v7319_v35 = vld [vmem:[#allocation66_spill] sm:$0xff]  ;;  %v7320_v36 = vld [vmem:[#allocation67_spill] sm:$0xff] }
 0x17c   : > { %1641 = vmatpush1.bf16.msra.mxu0 %v7276_v37  ;;  %1723 = vmatpush1.bf16.msra.mxu1 %v7277_v38  ;;  %v7321_v37 = vld [vmem:[#allocation68_spill] sm:$0xff]  ;;  %v7322_v38 = vld [vmem:[#allocation69_spill] sm:$0xff] }
 0x17d   : > { %1642 = vmatprep.subr.bf16.mxu0 %v7278_v39  ;;  %1724 = vmatprep.subr.bf16.mxu1 %v7279_v40  ;;  %v7323_v39 = vld [vmem:[#allocation70_spill] sm:$0xff]  ;;  %v7325_v40 = vld [vmem:[#allocation72_spill] sm:$0xff] }
 0x180   : > { %1643 = vmatpush1.bf16.msra.mxu0 %v7280_v41  ;;  %1725 = vmatpush1.bf16.msra.mxu1 %v7281_v42  ;;  %v7326_v41 = vld [vmem:[#allocation73_spill] sm:$0xff]  ;;  %v7327_v42 = vld [vmem:[#allocation74_spill] sm:$0xff] }
 0x181   : > { %1644 = vmatprep.subr.bf16.mxu0 %v7282_v43  ;;  %1726 = vmatprep.subr.bf16.mxu1 %v7283_v44  ;;  %v7328_v43 = vld [vmem:[#allocation75_spill] sm:$0xff]  ;;  %v7329_v44 = vld [vmem:[#allocation76_spill] sm:$0xff] }
 0x184   : > { %1645 = vmatpush1.bf16.msra.mxu0 %v7284_v45  ;;  %1727 = vmatpush1.bf16.msra.mxu1 %v7285_v47  ;;  %v7330_v45 = vld [vmem:[#allocation77_spill] sm:$0xff]  ;;  %v7331_v47 = vld [vmem:[#allocation78_spill] sm:$0xff] }
 0x185   : > { %1646 = vmatprep.subr.bf16.mxu0 %v7286_v49  ;;  %1728 = vmatprep.subr.bf16.mxu1 %v7287_v50  ;;  %v7334_v49 = vld [vmem:[#allocation81_spill] sm:$0xff]  ;;  %v7335_v50 = vld [vmem:[#allocation82_spill] sm:$0xff] }
 0x188   : > { %1647 = vmatpush1.bf16.msra.mxu0 %v7288_v51  ;;  %1729 = vmatpush1.bf16.msra.mxu1 %v7289_v52  ;;  %v7336_v51 = vld [vmem:[#allocation83_spill] sm:$0xff]  ;;  %v7337_v52 = vld [vmem:[#allocation84_spill] sm:$0xff] }
 0x189   : > { %1648 = vmatprep.subr.bf16.mxu0 %v7290_v53  ;;  %1730 = vmatprep.subr.bf16.mxu1 %v7291_v54  ;;  %v7338_v53 = vld [vmem:[#allocation85_spill] sm:$0xff]  ;;  %v7339_v54 = vld [vmem:[#allocation86_spill] sm:$0xff] }
 0x18c   : > { %1649 = vmatpush1.bf16.msra.mxu0 %v7292_v55  ;;  %1731 = vmatpush1.bf16.msra.mxu1 %v7293_v56  ;;  %v7340_v55 = vld [vmem:[#allocation87_spill] sm:$0xff]  ;;  %v7341_v56 = vld [vmem:[#allocation89_spill] sm:$0xff] }
 0x18d   : > { %1650 = vmatprep.subr.bf16.mxu0 %v7294_v57  ;;  %1732 = vmatprep.subr.bf16.mxu1 %v7295_v58  ;;  %v7342_v57 = vld [vmem:[#allocation90_spill] sm:$0xff] }
 0x190   : > { %1651 = vmatpush1.bf16.msra.mxu0 %v7296_v59  ;;  %1733 = vmatpush1.bf16.msra.mxu1 %v7297_v60 }
 0x191   : > { %1652 = vmatprep.subr.bf16.mxu0 %v7298_v61  ;;  %1734 = vmatprep.subr.bf16.mxu1 %v7299_v62 }
 0x194   : > { %1653 = vmatpush1.bf16.msra.mxu0 %v7300_v63  ;;  %1735 = vmatpush1.bf16.msra.mxu1 %v7301_v0 }
 0x195   : > { %1654 = vmatprep.subr.bf16.mxu0 %v7302_v1  ;;  %1736 = vmatprep.subr.bf16.mxu1 %v7303_v2 }
 0x198   : > { %1655 = vmatpush1.bf16.msra.mxu0 %v7304_v3  ;;  %1737 = vmatpush1.bf16.msra.mxu1 %v7305_v5 }
 0x199   : > { %1656 = vmatprep.subr.bf16.mxu0 %v7306_v6  ;;  %1738 = vmatprep.subr.bf16.mxu1 %v7307_v7 }
 0x19c   : > { %1657 = vmatpush1.bf16.msra.mxu0 %v7308_v8  ;;  %1739 = vmatpush1.bf16.msra.mxu1 %v7309_v9 }
 0x19d   : > { %1658 = vmatprep.subr.bf16.mxu0 %v7310_v10  ;;  %1740 = vmatprep.subr.bf16.mxu1 %v7311_v11 }
 0x1a0   : > { %1659 = vmatpush1.bf16.msra.mxu0 %v5183_v22  ;;  %1741 = vmatpush1.bf16.msra.mxu1 %v7312_v12 }
 0x1a1   : > { %1660 = vmatprep.subr.bf16.mxu0 %v7313_v48  ;;  %1742 = vmatprep.subr.bf16.mxu1 %v7314_v29 }
 0x1a4   : > { %1661 = vmatpush1.bf16.msra.mxu0 %v5195_v18  ;;  %1743 = vmatpush1.bf16.msra.mxu1 %v7315_v30 }
 0x1a5   : > { %1662 = vmatprep.subr.bf16.mxu0 %v7316_v31  ;;  %1744 = vmatprep.subr.bf16.mxu1 %v5201_v13 }
 0x1a8   : > { %1663 = vmatpush1.bf16.msra.mxu0 %v7317_v33  ;;  %1745 = vmatpush1.bf16.msra.mxu1 %v5209_v17 }
 0x1a9   : > { %3666 = vmatprep.subr.bf16.mxu0 %v7318_v34  ;;  %3688 = vmatprep.subr.bf16.mxu1 %v7319_v35 }
 0x1ab   : > { %1665 = vmatmul.mubr.bf16.vlgmr.msra.gmra.mrb[8].mxu0 %v3570_v32  ;;  %1747 = vmatmul.mubr.bf16.vlgmr.msra.gmra.mrb[8].mxu1 %v3570_v32 }
 0x1ac   : > { %3667 = vmatpush3.bf16.msra.mxu0 %v7320_v36  ;;  %3689 = vmatpush3.bf16.msra.mxu1 %v7321_v37 }
 0x1ad   : > { %3668 = vmatprep.subr.bf16.mxu0 %v7322_v38  ;;  %3690 = vmatprep.subr.bf16.mxu1 %v7323_v39 }
 0x1ae   : > { %1787 = vmatprep.mubr.bf16.mxu0 %v5332_v46  ;;  %1827 = vmatprep.mubr.bf16.mxu1 %v5459_v28  ;;  %v7332_v46 = vld [vmem:[#allocation79_spill] sm:$0xff]  ;;  %v7333_v28 = vld [vmem:[#allocation80_spill] sm:$0xff] }
 0x1b0   : > { %3669 = vmatpush3.bf16.msra.mxu0 %v5239_v19  ;;  %3691 = vmatpush3.bf16.msra.mxu1 %v7324_v27 }
 0x1b1   : > { %3670 = vmatprep.subr.bf16.mxu0 %v7325_v40  ;;  %3692 = vmatprep.subr.bf16.mxu1 %v7326_v41 }
 0x1b4   : > { %3671 = vmatpush3.bf16.msra.mxu0 %v7327_v42  ;;  %3693 = vmatpush3.bf16.msra.mxu1 %v7328_v43 }
 0x1b5   : > { %3672 = vmatprep.subr.bf16.mxu0 %v7329_v44  ;;  %3694 = vmatprep.subr.bf16.mxu1 %v7330_v45 }
 0x1b8   : > { %3673 = vmatpush3.bf16.msra.mxu0 %v7331_v47  ;;  %3695 = vmatpush3.bf16.msra.mxu1 %v7332_v46 }
 0x1b9   : > { %3674 = vmatprep.subr.bf16.mxu0 %v7333_v28  ;;  %3696 = vmatprep.subr.bf16.mxu1 %v7334_v49  ;;  %v7343_v28 = vld [vmem:[#allocation91_spill] sm:$0xff] }
 0x1bc   : > { %3675 = vmatpush3.bf16.msra.mxu0 %v7335_v50  ;;  %3697 = vmatpush3.bf16.msra.mxu1 %v7336_v51  ;;  %v7344_v50 = vld [vmem:[#allocation93_spill] sm:$0xff] }
 0x1bd   : > { %3676 = vmatprep.subr.bf16.mxu0 %v7337_v52  ;;  %3698 = vmatprep.subr.bf16.mxu1 %v7338_v53  ;;  %v5562_v51 = vld [vmem:[%s4879_s10 + $0x20] sm:$0xff] }
 0x1be   : > { %v7345_v53 = vld [vmem:[#allocation95_spill] sm:$0xff] }
 0x1c0   : > { %3677 = vmatpush3.bf16.msra.mxu0 %v7339_v54  ;;  %3699 = vmatpush3.bf16.msra.mxu1 %v7340_v55  ;;  %v7346_v54 = vld [vmem:[#allocation96_spill] sm:$0xff]  ;;  %v7347_v55 = vld [vmem:[#allocation97_spill] sm:$0xff] }
 0x1c1   : > { %3678 = vmatprep.subr.bf16.mxu0 %v5295_v16  ;;  %3700 = vmatprep.subr.bf16.mxu1 %v7341_v56  ;;  %v5570_v56 = vcombine.high %v5562_v51, %v5562_v51  ;;  %v7362_v16 = vld [vmem:[#allocation112_spill] sm:$0xff] }
 0x1c4   : > { %3679 = vmatpush3.bf16.msra.mxu0 %v7342_v57  ;;  %3701 = vmatpush3.bf16.msra.mxu1 %v7343_v28  ;;  %v7350_v28 = vld [vmem:[#allocation100_spill] sm:$0xff]  ;;  %v7361_v57 = vld [vmem:[#allocation111_spill] sm:$0xff] }
 0x1c5   : > { %3680 = vmatprep.subr.bf16.mxu0 %v5307_v25  ;;  %3702 = vmatprep.subr.bf16.mxu1 %v7344_v50  ;;  %v7348_v25 = vld [vmem:[#allocation98_spill] sm:$0xff]  ;;  %v7349_v50 = vld [vmem:[#allocation99_spill] sm:$0xff] }
 0x1c8   : > { %3681 = vmatpush3.bf16.msra.mxu0 %v5313_v23  ;;  %3703 = vmatpush3.bf16.msra.mxu1 %v7345_v53  ;;  %v7351_v23 = vld [vmem:[#allocation101_spill] sm:$0xff]  ;;  %v7354_v53 = vld [vmem:[#allocation104_spill] sm:$0xff] }
 0x1c9   : > { %1851 = vmatprep.subr.bf16.mxu0 %v7346_v54  ;;  %1933 = vmatprep.subr.bf16.mxu1 %v7347_v55  ;;  %v7352_v55 = vld [vmem:[#allocation102_spill] sm:$0xff]  ;;  %v7353_v54 = vld [vmem:[#allocation103_spill] sm:$0xff] }
 0x1cb   : > { %1788 = vmatmul.mubr.bf16.vlgmr.msra.gmra.mrb[12].mxu0 %v5448_v26  ;;  %1828 = vmatmul.mubr.bf16.vlgmr.msra.gmra.mrb[12].mxu1 %v3570_v32  ;;  %v7355_v26 = vld [vmem:[#allocation105_spill] sm:$0xff]  ;;  %v7356_v32 = vld [vmem:[#allocation106_spill] sm:$0xff] }
 0x1cc   : > { %1852 = vmatpush1.bf16.msra.mxu0 %v7348_v25  ;;  %1934 = vmatpush1.bf16.msra.mxu1 %v7349_v50  ;;  %v7357_v25 = vld [vmem:[#allocation107_spill] sm:$0xff]  ;;  %v7358_v50 = vld [vmem:[#allocation108_spill] sm:$0xff] }
 0x1cd   : > { %1853 = vmatprep.subr.bf16.mxu0 %v7350_v28  ;;  %1935 = vmatprep.subr.bf16.mxu1 %v7351_v23  ;;  %v7359_v28 = vld [vmem:[#allocation109_spill] sm:$0xff]  ;;  %v7360_v23 = vld [vmem:[#allocation110_spill] sm:$0xff] }
 0x1ce   : > { %1883 = vmatprep.mubr.bf16.mxu0 %v5570_v56  ;;  %1965 = vmatprep.mubr.bf16.mxu1 %v5570_v56 }
 0x1d0   : > { %1854 = vmatpush1.bf16.msra.mxu0 %v7352_v55  ;;  %1936 = vmatpush1.bf16.msra.mxu1 %v7353_v54  ;;  %v7363_v55 = vld [vmem:[#allocation113_spill] sm:$0xff]  ;;  %v7364_v54 = vld [vmem:[#allocation114_spill] sm:$0xff] }
 0x1d1   : > { %1855 = vmatprep.subr.bf16.mxu0 %v7354_v53  ;;  %1937 = vmatprep.subr.bf16.mxu1 %v7355_v26  ;;  %v7365_v53 = vld [vmem:[#allocation115_spill] sm:$0xff] }
 0x1d4   : > { %1856 = vmatpush1.bf16.msra.mxu0 %v7356_v32  ;;  %1938 = vmatpush1.bf16.msra.mxu1 %v7357_v25 }
 0x1d5   : > { %1857 = vmatprep.subr.bf16.mxu0 %v7358_v50  ;;  %1939 = vmatprep.subr.bf16.mxu1 %v7359_v28 }
 0x1d8   : > { %1858 = vmatpush1.bf16.msra.mxu0 %v7360_v23  ;;  %1940 = vmatpush1.bf16.msra.mxu1 %v7361_v57 }
 0x1d9   : > { %1859 = vmatprep.subr.bf16.mxu0 %v7362_v16  ;;  %1941 = vmatprep.subr.bf16.mxu1 %v7363_v55 }
 0x1dc   : > { %1860 = vmatpush1.bf16.msra.mxu0 %v7364_v54  ;;  %1942 = vmatpush1.bf16.msra.mxu1 %v7365_v53 }
 0x1dd   : > { %1861 = vmatprep.subr.bf16.mxu0 %v5392_v24  ;;  %1943 = vmatprep.subr.bf16.mxu1 %v5395_v20  ;;  %v5607_v20 = vld [vmem:[#allocation5 + $0xc0] ss:$16 sps:$4 sm:$0xff]   ;;  %v5700_v24 = vld [vmem:[#allocation5 + $0x1cc] ss:$16 sps:$4 sm:$0xff]  }
 0x1de   : > { %v5595_v25 = vpop.f32.mrb[0].mxu0  ;;  %v5597_v50 = vpop.f32.mrb[0].mxu1  ;;  %7370 = vst [vmem:[#allocation19_spill] sm:$0xff] %v5607_v20 }
 0x1df   : > { %7366 = vst [vmem:[#allocation15_spill] sm:$0xff] %v5595_v25  ;;  %7367 = vst [vmem:[#allocation16_spill] sm:$0xff] %v5597_v50  ;;  %v5599_v28 = vpop.f32.mrb[1].mxu0  ;;  %v5601_v23 = vpop.f32.mrb[1].mxu1  ;;  %v5610_v50 = vld [vmem:[#allocation5 + $0xc8] ss:$16 sps:$4 sm:$0xff]  }
 0x1e0   : > { %7368 = vst [vmem:[#allocation17_spill] sm:$0xff] %v5599_v28  ;;  %7369 = vst [vmem:[#allocation18_spill] sm:$0xff] %v5601_v23  ;;  %v1218_v57 = vpop.f32.mrb[2].mxu0  ;;  %v1300_v16 = vpop.f32.mrb[2].mxu1  ;;  %1862 = vmatpush1.bf16.msra.mxu0 %v5398_v15  ;;  %1944 = vmatpush1.bf16.msra.mxu1 %v5401_v14  ;;  %v5625_v23 = vld [vmem:[#allocation5 + $0x104] ss:$16 sps:$4 sm:$0xff]  }
 0x1e1   : > { %v1219_v54 = vpop.f32.mrb[3].mxu0  ;;  %v1301_v53 = vpop.f32.mrb[3].mxu1  ;;  %1863 = vmatprep.subr.bf16.mxu0 %v5404_v4  ;;  %1945 = vmatprep.subr.bf16.mxu1 %v5407_v21  ;;  %7371 = vst [vmem:[#allocation20_spill] sm:$0xff] %v5610_v50  ;;  %v5613_v57 = vld [vmem:[#allocation5 + $0xe4] ss:$16 sps:$4 sm:$0xff]   ;;  %7376 = vst [vmem:[#allocation25_spill] sm:$0xff] %v5625_v23 }
 0x1e2   : > { %7372 = vst [vmem:[#allocation21_spill] sm:$0xff] %v5613_v57  ;;  %v5616_v16 = vld [vmem:[#allocation5 + $0xec] ss:$16 sps:$4 sm:$0xff]   ;;  %v5619_v53 = vld [vmem:[#allocation5 + $0xe0] ss:$16 sps:$4 sm:$0xff]  }
 0x1e3   : > { %7373 = vst [vmem:[#allocation22_spill] sm:$0xff] %v5616_v16  ;;  %7374 = vst [vmem:[#allocation23_spill] sm:$0xff] %v5619_v53  ;;  %v5622_v54 = vld [vmem:[#allocation5 + $0xe8] ss:$16 sps:$4 sm:$0xff]   ;;  %v5628_v28 = vld [vmem:[#allocation5 + $0x10c] ss:$16 sps:$4 sm:$0xff]  }
 0x1e4   : > { %1864 = vmatpush1.bf16.msra.mxu0 %v5607_v20  ;;  %1946 = vmatpush1.bf16.msra.mxu1 %v5610_v50  ;;  %7375 = vst [vmem:[#allocation24_spill] sm:$0xff] %v5622_v54  ;;  %7377 = vst [vmem:[#allocation26_spill] sm:$0xff] %v5628_v28  ;;  %v5631_v25 = vld [vmem:[#allocation5 + $0x100] ss:$16 sps:$4 sm:$0xff]  }
 0x1e5   : > { %1865 = vmatprep.subr.bf16.mxu0 %v5613_v57  ;;  %1947 = vmatprep.subr.bf16.mxu1 %v5616_v16  ;;  %7378 = vst [vmem:[#allocation27_spill] sm:$0xff] %v5631_v25  ;;  %v5634_v16 = vld [vmem:[#allocation5 + $0x108] ss:$16 sps:$4 sm:$0xff]   ;;  %v5691_v14 = vld [vmem:[#allocation5 + $0x1a0] ss:$16 sps:$4 sm:$0xff]  }
 0x1e6   : > { %7379 = vst [vmem:[#allocation28_spill] sm:$0xff] %v5634_v16 }
 0x1e8   : > { %1866 = vmatpush1.bf16.msra.mxu0 %v5619_v53  ;;  %1948 = vmatpush1.bf16.msra.mxu1 %v5622_v54  ;;  %v5637_v53 = vld [vmem:[#allocation5 + $0x124] ss:$16 sps:$4 sm:$0xff]   ;;  %v5640_v54 = vld [vmem:[#allocation5 + $0x12c] ss:$16 sps:$4 sm:$0xff]  }
 0x1e9   : > { %1867 = vmatprep.subr.bf16.mxu0 %v5625_v23  ;;  %1949 = vmatprep.subr.bf16.mxu1 %v5628_v28  ;;  %7380 = vst [vmem:[#allocation29_spill] sm:$0xff] %v5637_v53  ;;  %7381 = vst [vmem:[#allocation30_spill] sm:$0xff] %v5640_v54  ;;  %v5643_v23 = vld [vmem:[#allocation5 + $0x120] ss:$16 sps:$4 sm:$0xff]   ;;  %v5646_v28 = vld [vmem:[#allocation5 + $0x128] ss:$16 sps:$4 sm:$0xff]  }
 0x1ea   : > { %7382 = vst [vmem:[#allocation31_spill] sm:$0xff] %v5643_v23  ;;  %7383 = vst [vmem:[#allocation32_spill] sm:$0xff] %v5646_v28 }
 0x1ec   : > { %1868 = vmatpush1.bf16.msra.mxu0 %v5631_v25  ;;  %1950 = vmatpush1.bf16.msra.mxu1 %v5634_v16  ;;  %v5649_v25 = vld [vmem:[#allocation5 + $0x144] ss:$16 sps:$4 sm:$0xff]   ;;  %v5652_v16 = vld [vmem:[#allocation5 + $0x14c] ss:$16 sps:$4 sm:$0xff]  }
 0x1ed   : > { %1869 = vmatprep.subr.bf16.mxu0 %v5637_v53  ;;  %1951 = vmatprep.subr.bf16.mxu1 %v5640_v54  ;;  %7384 = vst [vmem:[#allocation33_spill] sm:$0xff] %v5649_v25  ;;  %7385 = vst [vmem:[#allocation34_spill] sm:$0xff] %v5652_v16  ;;  %v5655_v53 = vld [vmem:[#allocation5 + $0x140] ss:$16 sps:$4 sm:$0xff]   ;;  %v5658_v54 = vld [vmem:[#allocation5 + $0x148] ss:$16 sps:$4 sm:$0xff]  }
 0x1ee   : > { %7386 = vst [vmem:[#allocation35_spill] sm:$0xff] %v5655_v53  ;;  %7387 = vst [vmem:[#allocation36_spill] sm:$0xff] %v5658_v54 }
 0x1f0   : > { %1870 = vmatpush1.bf16.msra.mxu0 %v5643_v23  ;;  %1952 = vmatpush1.bf16.msra.mxu1 %v5646_v28  ;;  %v5661_v23 = vld [vmem:[#allocation5 + $0x164] ss:$16 sps:$4 sm:$0xff]   ;;  %v5664_v28 = vld [vmem:[#allocation5 + $0x16c] ss:$16 sps:$4 sm:$0xff]  }
 0x1f1   : > { %1871 = vmatprep.subr.bf16.mxu0 %v5649_v25  ;;  %1953 = vmatprep.subr.bf16.mxu1 %v5652_v16  ;;  %7388 = vst [vmem:[#allocation37_spill] sm:$0xff] %v5661_v23  ;;  %7389 = vst [vmem:[#allocation38_spill] sm:$0xff] %v5664_v28  ;;  %v5667_v25 = vld [vmem:[#allocation5 + $0x160] ss:$16 sps:$4 sm:$0xff]   ;;  %v5670_v16 = vld [vmem:[#allocation5 + $0x168] ss:$16 sps:$4 sm:$0xff]  }
 0x1f2   : > { %7390 = vst [vmem:[#allocation39_spill] sm:$0xff] %v5667_v25  ;;  %7391 = vst [vmem:[#allocation40_spill] sm:$0xff] %v5670_v16 }
 0x1f4   : > { %1872 = vmatpush1.bf16.msra.mxu0 %v5655_v53  ;;  %1954 = vmatpush1.bf16.msra.mxu1 %v5658_v54  ;;  %v5673_v53 = vld [vmem:[#allocation5 + $0x184] ss:$16 sps:$4 sm:$0xff]   ;;  %v5676_v54 = vld [vmem:[#allocation5 + $0x18c] ss:$16 sps:$4 sm:$0xff]  }
 0x1f5   : > { %1873 = vmatprep.subr.bf16.mxu0 %v5661_v23  ;;  %1955 = vmatprep.subr.bf16.mxu1 %v5664_v28  ;;  %7392 = vst [vmem:[#allocation41_spill] sm:$0xff] %v5673_v53  ;;  %7393 = vst [vmem:[#allocation42_spill] sm:$0xff] %v5676_v54  ;;  %v5679_v23 = vld [vmem:[#allocation5 + $0x180] ss:$16 sps:$4 sm:$0xff]   ;;  %v5682_v28 = vld [vmem:[#allocation5 + $0x188] ss:$16 sps:$4 sm:$0xff]  }
 0x1f6   : > { %7394 = vst [vmem:[#allocation43_spill] sm:$0xff] %v5679_v23  ;;  %7395 = vst [vmem:[#allocation44_spill] sm:$0xff] %v5682_v28 }
 0x1f8   : > { %1874 = vmatpush1.bf16.msra.mxu0 %v5667_v25  ;;  %1956 = vmatpush1.bf16.msra.mxu1 %v5670_v16  ;;  %v5685_v25 = vld [vmem:[#allocation5 + $0x1a4] ss:$16 sps:$4 sm:$0xff]   ;;  %v5688_v16 = vld [vmem:[#allocation5 + $0x1ac] ss:$16 sps:$4 sm:$0xff]  }
 0x1f9   : > { %1875 = vmatprep.subr.bf16.mxu0 %v5673_v53  ;;  %1957 = vmatprep.subr.bf16.mxu1 %v5676_v54  ;;  %7396 = vst [vmem:[#allocation45_spill] sm:$0xff] %v5685_v25  ;;  %7397 = vst [vmem:[#allocation46_spill] sm:$0xff] %v5688_v16 }
 0x1fc   : > { %1876 = vmatpush1.bf16.msra.mxu0 %v5679_v23  ;;  %1958 = vmatpush1.bf16.msra.mxu1 %v5682_v28  ;;  %v5694_v28 = vld [vmem:[#allocation5 + $0x1a8] ss:$16 sps:$4 sm:$0xff]  }
 0x1fd   : > { %1877 = vmatprep.subr.bf16.mxu0 %v5685_v25  ;;  %1959 = vmatprep.subr.bf16.mxu1 %v5688_v16  ;;  %v5697_v16 = vld [vmem:[#allocation5 + $0x1c4] ss:$16 sps:$4 sm:$0xff]  }
 0x1fe   : > { %v3638_v53 = vpop.f32.mrb[4].mxu0  ;;  %v3660_v57 = vpop.f32.mrb[4].mxu1 }
 0x1ff   : > { %v3639_v50 = vpop.f32.mrb[5].mxu0  ;;  %v3661_v54 = vpop.f32.mrb[5].mxu1 }
 0x200   : > { %v3640_v20 = vadd.f32 %v3639_v50, %v3638_v53  ;;  %v3662_v21 = vadd.f32 %v3661_v54, %v3660_v57  ;;  %v3641_v4 = vpop.f32.mrb[6].mxu0  ;;  %v3663_v23 = vpop.f32.mrb[6].mxu1  ;;  %1878 = vmatpush1.bf16.msra.mxu0 %v5691_v14  ;;  %1960 = vmatpush1.bf16.msra.mxu1 %v5694_v28  ;;  %v5708_v50 = vld [vmem:[#allocation5 + $0x1c8] ss:$16 sps:$4 sm:$0xff]   ;;  %v5724_v57 = vld [vmem:[#allocation5 + $0x1e0] ss:$16 sps:$4 sm:$0xff]  }
 0x201   : > { %v3642_v25 = vpop.f32.mrb[7].mxu0  ;;  %v3664_v15 = vpop.f32.mrb[7].mxu1  ;;  %1879 = vmatprep.subr.bf16.mxu0 %v5697_v16  ;;  %1961 = vmatprep.subr.bf16.mxu1 %v5700_v24  ;;  %v5705_v4 = vld [vmem:[#allocation5 + $0x1c0] ss:$16 sps:$4 sm:$0xff]   ;;  %7398 = vst [vmem:[#allocation47_spill] sm:$0xff] %v5708_v50  ;;  %7401 = vst [vmem:[#allocation50_spill] sm:$0xff] %v5724_v57 }
 0x202   : > { %v5703_v23 = vadd.f32 %v3662_v21, %v3640_v20  ;;  %v5711_v25 = vld [vmem:[#allocation5 + $0x1e4] ss:$16 sps:$4 sm:$0xff]   ;;  %v5714_v15 = vld [vmem:[#allocation5 + $0x1ec] ss:$16 sps:$4 sm:$0xff]   ;;  %v5719_v20 = vcombine.low %v5562_v51, %v5562_v51  ;;  %v5727_v53 = vld [vmem:[#allocation5 + $0x1e8] ss:$16 sps:$4 sm:$0xff]  }
 0x203   : > { %7399 = vst [vmem:[#allocation48_spill] sm:$0xff] %v5711_v25  ;;  %7400 = vst [vmem:[#allocation49_spill] sm:$0xff] %v5714_v15  ;;  %v5722_v21 = vld [vmem:[%s4879_s10 + $0x28] sm:$0xff]  ;;  %v5730_v54 = vld [vmem:[#allocation5 + $0x204] ss:$16 sps:$4 sm:$0xff]  }
 0x204   : > { %1880 = vmatpush1.bf16.msra.mxu0 %v5705_v4  ;;  %1962 = vmatpush1.bf16.msra.mxu1 %v5708_v50  ;;  %7402 = vst [vmem:[#allocation51_spill] sm:$0xff] %v5727_v53  ;;  %7403 = vst [vmem:[#allocation52_spill] sm:$0xff] %v5730_v54  ;;  %v5738_v51 = vcombine.high %v5722_v21, %v5722_v21  ;;  %v5771_v50 = vld [vmem:[#allocation5 + $0x248] ss:$16 sps:$4 sm:$0xff]   ;;  %vm2615_vm0 = vcmp.gt.f32.partialorder %v5703_v23, 0.0 }
 0x205   : > { %1881 = vmatprep.subr.bf16.mxu0 %v5711_v25  ;;  %1963 = vmatprep.subr.bf16.mxu1 %v5714_v15  ;;  %v5733_v25 = vld [vmem:[#allocation5 + $0x20c] ss:$16 sps:$4 sm:$0xff]   ;;  %v5756_v15 = vld [vmem:[#allocation5 + $0x220] ss:$16 sps:$4 sm:$0xff]   ;;  %7414 = vst [vmem:[#allocation63_spill] sm:$0xff] %v5771_v50 }
 0x206   : > { %7404 = vst [vmem:[#allocation53_spill] sm:$0xff] %v5733_v25  ;;  %7409 = vst [vmem:[#allocation58_spill] sm:$0xff] %v5756_v15 }
 0x208   : > { %1882 = vmatpush1.bf16.msra.mxu0 %v5724_v57  ;;  %1964 = vmatpush1.bf16.msra.mxu1 %v5727_v53  ;;  %v5742_v57 = vld [vmem:[#allocation5 + $0x200] ss:$16 sps:$4 sm:$0xff]   ;;  %v5745_v53 = vld [vmem:[#allocation5 + $0x208] ss:$16 sps:$4 sm:$0xff]  }
 0x209   : > { %1892 = vmatprep.subr.bf16.mxu0 %v5730_v54  ;;  %1974 = vmatprep.subr.bf16.mxu1 %v5733_v25  ;;  %7405 = vst [vmem:[#allocation54_spill] sm:$0xff] %v5742_v57  ;;  %7406 = vst [vmem:[#allocation55_spill] sm:$0xff] %v5745_v53  ;;  %v5748_v54 = vld [vmem:[#allocation5 + $0x224] ss:$16 sps:$4 sm:$0xff]   ;;  %v5751_v25 = vld [vmem:[#allocation5 + $0x22c] ss:$16 sps:$4 sm:$0xff]  }
 0x20a   : > { %7407 = vst [vmem:[#allocation56_spill] sm:$0xff] %v5748_v54  ;;  %7408 = vst [vmem:[#allocation57_spill] sm:$0xff] %v5751_v25 }
 0x20b   : > { %1884 = vmatmul.mubr.bf16.vlgmr.msra.gmra.mrb[16].mxu0 %v5719_v20  ;;  %1966 = vmatmul.mubr.bf16.vlgmr.msra.gmra.mrb[16].mxu1 %v5719_v20 }
 0x20c   : > { %1893 = vmatpush1.bf16.msra.mxu0 %v5742_v57  ;;  %1975 = vmatpush1.bf16.msra.mxu1 %v5745_v53  ;;  %v5759_v57 = vld [vmem:[#allocation5 + $0x228] ss:$16 sps:$4 sm:$0xff]   ;;  %v5762_v53 = vld [vmem:[#allocation5 + $0x244] ss:$16 sps:$4 sm:$0xff]  }
 0x20d   : > { %1894 = vmatprep.subr.bf16.mxu0 %v5748_v54  ;;  %1976 = vmatprep.subr.bf16.mxu1 %v5751_v25  ;;  %7410 = vst [vmem:[#allocation59_spill] sm:$0xff] %v5759_v57  ;;  %7411 = vst [vmem:[#allocation60_spill] sm:$0xff] %v5762_v53  ;;  %v5765_v54 = vld [vmem:[#allocation5 + $0x24c] ss:$16 sps:$4 sm:$0xff]   ;;  %v5768_v25 = vld [vmem:[#allocation5 + $0x240] ss:$16 sps:$4 sm:$0xff]  }
 0x20e   : > { %1924 = vmatprep.mubr.bf16.mxu0 %v5738_v51  ;;  %2006 = vmatprep.mubr.bf16.mxu1 %v5738_v51  ;;  %7412 = vst [vmem:[#allocation61_spill] sm:$0xff] %v5765_v54  ;;  %7413 = vst [vmem:[#allocation62_spill] sm:$0xff] %v5768_v25 }
 0x210   : > { %1895 = vmatpush1.bf16.msra.mxu0 %v5756_v15  ;;  %1977 = vmatpush1.bf16.msra.mxu1 %v5759_v57  ;;  %v5774_v15 = vld [vmem:[#allocation5 + $0x264] ss:$16 sps:$4 sm:$0xff]   ;;  %v5777_v57 = vld [vmem:[#allocation5 + $0x26c] ss:$16 sps:$4 sm:$0xff]  }
 0x211   : > { %1896 = vmatprep.subr.bf16.mxu0 %v5762_v53  ;;  %1978 = vmatprep.subr.bf16.mxu1 %v5765_v54  ;;  %7415 = vst [vmem:[#allocation64_spill] sm:$0xff] %v5774_v15  ;;  %7416 = vst [vmem:[#allocation65_spill] sm:$0xff] %v5777_v57  ;;  %v5780_v53 = vld [vmem:[#allocation5 + $0x260] ss:$16 sps:$4 sm:$0xff]   ;;  %v5783_v54 = vld [vmem:[#allocation5 + $0x268] ss:$16 sps:$4 sm:$0xff]  }
 0x212   : > { %7417 = vst [vmem:[#allocation66_spill] sm:$0xff] %v5780_v53  ;;  %7418 = vst [vmem:[#allocation67_spill] sm:$0xff] %v5783_v54 }
 0x214   : > { %1897 = vmatpush1.bf16.msra.mxu0 %v5768_v25  ;;  %1979 = vmatpush1.bf16.msra.mxu1 %v5771_v50  ;;  %v5786_v25 = vld [vmem:[#allocation5 + $0x284] ss:$16 sps:$4 sm:$0xff]   ;;  %v5789_v50 = vld [vmem:[#allocation5 + $0x28c] ss:$16 sps:$4 sm:$0xff]  }
 0x215   : > { %1898 = vmatprep.subr.bf16.mxu0 %v5774_v15  ;;  %1980 = vmatprep.subr.bf16.mxu1 %v5777_v57  ;;  %7419 = vst [vmem:[#allocation68_spill] sm:$0xff] %v5786_v25  ;;  %7420 = vst [vmem:[#allocation69_spill] sm:$0xff] %v5789_v50  ;;  %v5792_v15 = vld [vmem:[#allocation5 + $0x280] ss:$16 sps:$4 sm:$0xff]   ;;  %v5795_v57 = vld [vmem:[#allocation5 + $0x288] ss:$16 sps:$4 sm:$0xff]  }
 0x216   : > { %7421 = vst [vmem:[#allocation70_spill] sm:$0xff] %v5792_v15  ;;  %7422 = vst [vmem:[#allocation71_spill] sm:$0xff] %v5795_v57 }
 0x218   : > { %1899 = vmatpush1.bf16.msra.mxu0 %v5780_v53  ;;  %1981 = vmatpush1.bf16.msra.mxu1 %v5783_v54  ;;  %v5798_v53 = vld [vmem:[#allocation5 + $0x2a4] ss:$16 sps:$4 sm:$0xff]   ;;  %v5801_v54 = vld [vmem:[#allocation5 + $0x2ac] ss:$16 sps:$4 sm:$0xff]  }
 0x219   : > { %1900 = vmatprep.subr.bf16.mxu0 %v5786_v25  ;;  %1982 = vmatprep.subr.bf16.mxu1 %v5789_v50  ;;  %7423 = vst [vmem:[#allocation72_spill] sm:$0xff] %v5798_v53  ;;  %7424 = vst [vmem:[#allocation73_spill] sm:$0xff] %v5801_v54  ;;  %v5804_v25 = vld [vmem:[#allocation5 + $0x2a0] ss:$16 sps:$4 sm:$0xff]   ;;  %v5807_v50 = vld [vmem:[#allocation5 + $0x2a8] ss:$16 sps:$4 sm:$0xff]  }
 0x21a   : > { %7425 = vst [vmem:[#allocation74_spill] sm:$0xff] %v5804_v25  ;;  %7426 = vst [vmem:[#allocation75_spill] sm:$0xff] %v5807_v50 }
 0x21c   : > { %1901 = vmatpush1.bf16.msra.mxu0 %v5792_v15  ;;  %1983 = vmatpush1.bf16.msra.mxu1 %v5795_v57  ;;  %v5810_v15 = vld [vmem:[#allocation5 + $0x2c4] ss:$16 sps:$4 sm:$0xff]   ;;  %v5813_v57 = vld [vmem:[#allocation5 + $0x2cc] ss:$16 sps:$4 sm:$0xff]  }
 0x21d   : > { %1902 = vmatprep.subr.bf16.mxu0 %v5798_v53  ;;  %1984 = vmatprep.subr.bf16.mxu1 %v5801_v54  ;;  %7427 = vst [vmem:[#allocation76_spill] sm:$0xff] %v5810_v15  ;;  %7428 = vst [vmem:[#allocation77_spill] sm:$0xff] %v5813_v57  ;;  %v5816_v53 = vld [vmem:[#allocation5 + $0x2c0] ss:$16 sps:$4 sm:$0xff]   ;;  %v5819_v54 = vld [vmem:[#allocation5 + $0x2c8] ss:$16 sps:$4 sm:$0xff]  }
 0x21e   : > { %7429 = vst [vmem:[#allocation78_spill] sm:$0xff] %v5816_v53  ;;  %7430 = vst [vmem:[#allocation79_spill] sm:$0xff] %v5819_v54 }
 0x220   : > { %1903 = vmatpush1.bf16.msra.mxu0 %v5804_v25  ;;  %1985 = vmatpush1.bf16.msra.mxu1 %v5807_v50  ;;  %v5822_v25 = vld [vmem:[#allocation5 + $0x2e4] ss:$16 sps:$4 sm:$0xff]   ;;  %v5825_v50 = vld [vmem:[#allocation5 + $0x2ec] ss:$16 sps:$4 sm:$0xff]  }
 0x221   : > { %1904 = vmatprep.subr.bf16.mxu0 %v5810_v15  ;;  %1986 = vmatprep.subr.bf16.mxu1 %v5813_v57  ;;  %7431 = vst [vmem:[#allocation81_spill] sm:$0xff] %v5822_v25  ;;  %7432 = vst [vmem:[#allocation84_spill] sm:$0xff] %v5825_v50  ;;  %v5828_v15 = vld [vmem:[#allocation5 + $0x2e0] ss:$16 sps:$4 sm:$0xff]   ;;  %v5831_v57 = vld [vmem:[#allocation5 + $0x2e8] ss:$16 sps:$4 sm:$0xff]  }
 0x222   : > { %7433 = vst [vmem:[#allocation105_spill] sm:$0xff] %v5828_v15  ;;  %7434 = vst [vmem:[#allocation106_spill] sm:$0xff] %v5831_v57 }
 0x224   : > { %1905 = vmatpush1.bf16.msra.mxu0 %v5816_v53  ;;  %1987 = vmatpush1.bf16.msra.mxu1 %v5819_v54  ;;  %v5834_v53 = vld [vmem:[#allocation5 + $0x304] ss:$16 sps:$4 sm:$0xff]   ;;  %v5837_v54 = vld [vmem:[#allocation5 + $0x30c] ss:$16 sps:$4 sm:$0xff]  }
 0x225   : > { %1906 = vmatprep.subr.bf16.mxu0 %v5822_v25  ;;  %1988 = vmatprep.subr.bf16.mxu1 %v5825_v50  ;;  %7435 = vst [vmem:[#allocation113_spill] sm:$0xff] %v5834_v53  ;;  %7436 = vst [vmem:[#allocation122_spill] sm:$0xff] %v5837_v54  ;;  %v5840_v25 = vld [vmem:[#allocation5 + $0x300] ss:$16 sps:$4 sm:$0xff]   ;;  %v5843_v50 = vld [vmem:[#allocation5 + $0x308] ss:$16 sps:$4 sm:$0xff]  }
 0x226   : > { %7437 = vst [vmem:[#allocation123_spill] sm:$0xff] %v5840_v25  ;;  %7438 = vst [vmem:[#allocation124_spill] sm:$0xff] %v5843_v50 }
 0x228   : > { %1907 = vmatpush1.bf16.msra.mxu0 %v5828_v15  ;;  %1989 = vmatpush1.bf16.msra.mxu1 %v5831_v57  ;;  %v5846_v15 = vld [vmem:[#allocation5 + $0x324] ss:$16 sps:$4 sm:$0xff]  }
 0x229   : > { %1908 = vmatprep.subr.bf16.mxu0 %v5834_v53  ;;  %1990 = vmatprep.subr.bf16.mxu1 %v5837_v54  ;;  %7439 = vst [vmem:[#allocation125_spill] sm:$0xff] %v5846_v15 }
 0x22c   : > { %1909 = vmatpush1.bf16.msra.mxu0 %v5840_v25  ;;  %1991 = vmatpush1.bf16.msra.mxu1 %v5843_v50 }
 0x22d   : > { %1910 = vmatprep.subr.bf16.mxu0 %v5846_v15  ;;  %1992 = vmatprep.subr.bf16.mxu1 %v7295_v58  ;;  %v3574_v58 = vcombine.low %v5722_v21, %v5722_v21  ;;  %v7483_v21 = vld [vmem:[#allocation21_spill] sm:$0xff] }
 0x230   : > { %1911 = vmatpush1.bf16.msra.mxu0 %v7296_v59  ;;  %1993 = vmatpush1.bf16.msra.mxu1 %v7297_v60  ;;  %v7445_v59 = vld [vmem:[#allocation87_spill] sm:$0xff]  ;;  %v7446_v60 = vld [vmem:[#allocation88_spill] sm:$0xff] }
 0x231   : > { %1912 = vmatprep.subr.bf16.mxu0 %v7298_v61  ;;  %1994 = vmatprep.subr.bf16.mxu1 %v7299_v62  ;;  %v7447_v61 = vld [vmem:[#allocation89_spill] sm:$0xff]  ;;  %v7448_v62 = vld [vmem:[#allocation90_spill] sm:$0xff] }
 0x234   : > { %1913 = vmatpush1.bf16.msra.mxu0 %v7300_v63  ;;  %1995 = vmatpush1.bf16.msra.mxu1 %v7301_v0  ;;  %v7449_v63 = vld [vmem:[#allocation91_spill] sm:$0xff]  ;;  %v7450_v0 = vld [vmem:[#allocation92_spill] sm:$0xff] }
 0x235   : > { %1914 = vmatprep.subr.bf16.mxu0 %v7302_v1  ;;  %1996 = vmatprep.subr.bf16.mxu1 %v7303_v2  ;;  %v7451_v1 = vld [vmem:[#allocation93_spill] sm:$0xff] }
 0x236   : > { %v5911_v2 = vld [vmem:[%s4879_s10 + $0x30] sm:$0xff] }
 0x238   : > { %1915 = vmatpush1.bf16.msra.mxu0 %v7304_v3  ;;  %1997 = vmatpush1.bf16.msra.mxu1 %v7305_v5  ;;  %v7452_v3 = vld [vmem:[#allocation94_spill] sm:$0xff]  ;;  %v7453_v5 = vld [vmem:[#allocation95_spill] sm:$0xff] }
 0x239   : > { %1916 = vmatprep.subr.bf16.mxu0 %v7306_v6  ;;  %1998 = vmatprep.subr.bf16.mxu1 %v7307_v7  ;;  %v7454_v6 = vld [vmem:[#allocation96_spill] sm:$0xff]  ;;  %v7455_v7 = vld [vmem:[#allocation97_spill] sm:$0xff] }
 0x23c   : > { %1917 = vmatpush1.bf16.msra.mxu0 %v7308_v8  ;;  %1999 = vmatpush1.bf16.msra.mxu1 %v7309_v9  ;;  %v5919_v8 = vcombine.high %v5911_v2, %v5911_v2  ;;  %v7456_v9 = vld [vmem:[#allocation98_spill] sm:$0xff] }
 0x23d   : > { %1918 = vmatprep.subr.bf16.mxu0 %v7310_v10  ;;  %2000 = vmatprep.subr.bf16.mxu1 %v7311_v11  ;;  %v7457_v10 = vld [vmem:[#allocation99_spill] sm:$0xff]  ;;  %v7458_v11 = vld [vmem:[#allocation100_spill] sm:$0xff] }
 0x240   : > { %1919 = vmatpush1.bf16.msra.mxu0 %v5183_v22  ;;  %2001 = vmatpush1.bf16.msra.mxu1 %v7312_v12  ;;  %v7443_v22 = vld [vmem:[#allocation85_spill] sm:$0xff] }
 0x241   : > { %1920 = vmatprep.subr.bf16.mxu0 %v7313_v48  ;;  %2002 = vmatprep.subr.bf16.mxu1 %v7314_v29  ;;  %v7459_v12 = vld [vmem:[#allocation101_spill] sm:$0xff]  ;;  %v7460_v48 = vld [vmem:[#allocation102_spill] sm:$0xff]  ;;  %v7461_v29 = vld [vmem:[#allocation103_spill] sm:$0xff] }
 0x244   : > { %1921 = vmatpush1.bf16.msra.mxu0 %v5195_v18  ;;  %2003 = vmatpush1.bf16.msra.mxu1 %v7315_v30  ;;  %v7442_v18 = vld [vmem:[#allocation83_spill] sm:$0xff]  ;;  %v7462_v30 = vld [vmem:[#allocation104_spill] sm:$0xff] }
 0x245   : > { %1922 = vmatprep.subr.bf16.mxu0 %v7316_v31  ;;  %2004 = vmatprep.subr.bf16.mxu1 %v5201_v13  ;;  %v7440_v13 = vld [vmem:[#allocation80_spill] sm:$0xff]  ;;  %v7463_v31 = vld [vmem:[#allocation107_spill] sm:$0xff] }
 0x248   : > { %1923 = vmatpush1.bf16.msra.mxu0 %v7317_v33  ;;  %2005 = vmatpush1.bf16.msra.mxu1 %v5209_v17  ;;  %v7441_v17 = vld [vmem:[#allocation82_spill] sm:$0xff]  ;;  %v7464_v33 = vld [vmem:[#allocation108_spill] sm:$0xff] }
 0x249   : > { %3710 = vmatprep.subr.bf16.mxu0 %v7318_v34  ;;  %3732 = vmatprep.subr.bf16.mxu1 %v7319_v35  ;;  %v7465_v34 = vld [vmem:[#allocation109_spill] sm:$0xff]  ;;  %v7466_v35 = vld [vmem:[#allocation110_spill] sm:$0xff] }
 0x24b   : > { %1925 = vmatmul.mubr.bf16.vlgmr.msra.gmra.mrb[16].mxu0 %v3574_v58  ;;  %2007 = vmatmul.mubr.bf16.vlgmr.msra.gmra.mrb[16].mxu1 %v3574_v58 }
 0x24c   : > { %3711 = vmatpush3.bf16.msra.mxu0 %v7320_v36  ;;  %3733 = vmatpush3.bf16.msra.mxu1 %v7321_v37  ;;  %v7467_v36 = vld [vmem:[#allocation111_spill] sm:$0xff]  ;;  %v7468_v37 = vld [vmem:[#allocation112_spill] sm:$0xff] }
 0x24d   : > { %3712 = vmatprep.subr.bf16.mxu0 %v7322_v38  ;;  %3734 = vmatprep.subr.bf16.mxu1 %v7323_v39  ;;  %v7469_v38 = vld [vmem:[#allocation114_spill] sm:$0xff]  ;;  %v7470_v39 = vld [vmem:[#allocation115_spill] sm:$0xff] }
 0x24e   : > { %2047 = vmatprep.mubr.bf16.mxu0 %v5570_v56  ;;  %2087 = vmatprep.mubr.bf16.mxu1 %v5738_v51  ;;  %v7479_v56 = vld [vmem:[#allocation120_spill] sm:$0xff]  ;;  %v7484_v51 = vld [vmem:[#allocation22_spill] sm:$0xff] }
 0x250   : > { %3713 = vmatpush3.bf16.msra.mxu0 %v5239_v19  ;;  %3735 = vmatpush3.bf16.msra.mxu1 %v7324_v27  ;;  %v7444_v19 = vld [vmem:[#allocation86_spill] sm:$0xff]  ;;  %v7471_v27 = vld [vmem:[#allocation116_spill] sm:$0xff] }
 0x251   : > { %3714 = vmatprep.subr.bf16.mxu0 %v7325_v40  ;;  %3736 = vmatprep.subr.bf16.mxu1 %v7326_v41  ;;  %v7472_v40 = vld [vmem:[#allocation117_spill] sm:$0xff] }
 0x254   : > { %3715 = vmatpush3.bf16.msra.mxu0 %v7327_v42  ;;  %3737 = vmatpush3.bf16.msra.mxu1 %v7328_v43 }
 0x255   : > { %3716 = vmatprep.subr.bf16.mxu0 %v7329_v44  ;;  %3738 = vmatprep.subr.bf16.mxu1 %v7330_v45 }
 0x258   : > { %3717 = vmatpush3.bf16.msra.mxu0 %v7331_v47  ;;  %3739 = vmatpush3.bf16.msra.mxu1 %v7332_v46  ;;  %v7477_v46 = vld [vmem:[#allocation118_spill] sm:$0xff] }
 0x259   : > { %3718 = vmatprep.subr.bf16.mxu0 %v7440_v13  ;;  %3740 = vmatprep.subr.bf16.mxu1 %v7334_v49  ;;  %v7478_v49 = vld [vmem:[#allocation119_spill] sm:$0xff]  ;;  %v7486_v13 = vld [vmem:[#allocation24_spill] sm:$0xff] }
 0x25c   : > { %3719 = vmatpush3.bf16.msra.mxu0 %v7441_v17  ;;  %3741 = vmatpush3.bf16.msra.mxu1 %v7442_v18  ;;  %v7487_v17 = vld [vmem:[#allocation25_spill] sm:$0xff]  ;;  %v7488_v18 = vld [vmem:[#allocation26_spill] sm:$0xff] }
 0x25d   : > { %3720 = vmatprep.subr.bf16.mxu0 %v7337_v52  ;;  %3742 = vmatprep.subr.bf16.mxu1 %v7443_v22  ;;  %v7489_v22 = vld [vmem:[#allocation27_spill] sm:$0xff] }
 0x260   : > { %3721 = vmatpush3.bf16.msra.mxu0 %v7444_v19  ;;  %3743 = vmatpush3.bf16.msra.mxu1 %v7445_v59  ;;  %v7490_v19 = vld [vmem:[#allocation28_spill] sm:$0xff]  ;;  %v7491_v59 = vld [vmem:[#allocation29_spill] sm:$0xff] }
 0x261   : > { %3722 = vmatprep.subr.bf16.mxu0 %v7446_v60  ;;  %3744 = vmatprep.subr.bf16.mxu1 %v7447_v61  ;;  %v7492_v60 = vld [vmem:[#allocation30_spill] sm:$0xff]  ;;  %v7493_v61 = vld [vmem:[#allocation31_spill] sm:$0xff] }
 0x264   : > { %3723 = vmatpush3.bf16.msra.mxu0 %v7448_v62  ;;  %3745 = vmatpush3.bf16.msra.mxu1 %v7449_v63  ;;  %v7494_v62 = vld [vmem:[#allocation32_spill] sm:$0xff]  ;;  %v7495_v63 = vld [vmem:[#allocation33_spill] sm:$0xff] }
 0x265   : > { %3724 = vmatprep.subr.bf16.mxu0 %v7450_v0  ;;  %3746 = vmatprep.subr.bf16.mxu1 %v7451_v1  ;;  %v7496_v0 = vld [vmem:[#allocation34_spill] sm:$0xff]  ;;  %v7497_v1 = vld [vmem:[#allocation35_spill] sm:$0xff] }
 0x268   : > { %3725 = vmatpush3.bf16.msra.mxu0 %v7452_v3  ;;  %3747 = vmatpush3.bf16.msra.mxu1 %v7453_v5  ;;  %v7498_v3 = vld [vmem:[#allocation36_spill] sm:$0xff]  ;;  %v7499_v5 = vld [vmem:[#allocation37_spill] sm:$0xff] }
 0x269   : > { %2111 = vmatprep.subr.bf16.mxu0 %v7454_v6  ;;  %2193 = vmatprep.subr.bf16.mxu1 %v7455_v7  ;;  %v7500_v6 = vld [vmem:[#allocation38_spill] sm:$0xff]  ;;  %v7501_v7 = vld [vmem:[#allocation39_spill] sm:$0xff] }
 0x26b   : > { %2048 = vmatmul.mubr.bf16.vlgmr.msra.gmra.mrb[20].mxu0 %v5719_v20  ;;  %2088 = vmatmul.mubr.bf16.vlgmr.msra.gmra.mrb[20].mxu1 %v3574_v58  ;;  %v7482_v20 = vld [vmem:[#allocation20_spill] sm:$0xff]  ;;  %v7485_v58 = vld [vmem:[#allocation23_spill] sm:$0xff] }
 0x26c   : > { %2112 = vmatpush1.bf16.msra.mxu0 %v7456_v9  ;;  %2194 = vmatpush1.bf16.msra.mxu1 %v7457_v10  ;;  %v7502_v9 = vld [vmem:[#allocation40_spill] sm:$0xff]  ;;  %v7503_v10 = vld [vmem:[#allocation41_spill] sm:$0xff] }
 0x26d   : > { %2113 = vmatprep.subr.bf16.mxu0 %v7458_v11  ;;  %2195 = vmatprep.subr.bf16.mxu1 %v7459_v12  ;;  %v7504_v11 = vld [vmem:[#allocation42_spill] sm:$0xff]  ;;  %v7505_v12 = vld [vmem:[#allocation43_spill] sm:$0xff] }
 0x26e   : > { %2143 = vmatprep.mubr.bf16.mxu0 %v5919_v8  ;;  %2225 = vmatprep.mubr.bf16.mxu1 %v5919_v8 }
 0x270   : > { %2114 = vmatpush1.bf16.msra.mxu0 %v7460_v48  ;;  %2196 = vmatpush1.bf16.msra.mxu1 %v7461_v29  ;;  %v7506_v48 = vld [vmem:[#allocation44_spill] sm:$0xff]  ;;  %v7507_v29 = vld [vmem:[#allocation45_spill] sm:$0xff] }
 0x271   : > { %2115 = vmatprep.subr.bf16.mxu0 %v7462_v30  ;;  %2197 = vmatprep.subr.bf16.mxu1 %v7355_v26  ;;  %v7480_v26 = vld [vmem:[#allocation121_spill] sm:$0xff]  ;;  %v7508_v30 = vld [vmem:[#allocation46_spill] sm:$0xff] }
 0x274   : > { %2116 = vmatpush1.bf16.msra.mxu0 %v7356_v32  ;;  %2198 = vmatpush1.bf16.msra.mxu1 %v7463_v31  ;;  %v7481_v32 = vld [vmem:[#allocation19_spill] sm:$0xff] }
 0x275   : > { %2117 = vmatprep.subr.bf16.mxu0 %v7464_v33  ;;  %2199 = vmatprep.subr.bf16.mxu1 %v7465_v34 }
 0x278   : > { %2118 = vmatpush1.bf16.msra.mxu0 %v7466_v35  ;;  %2200 = vmatpush1.bf16.msra.mxu1 %v7467_v36 }
 0x279   : > { %2119 = vmatprep.subr.bf16.mxu0 %v7468_v37  ;;  %2201 = vmatprep.subr.bf16.mxu1 %v7363_v55 }
 0x27c   : > { %2120 = vmatpush1.bf16.msra.mxu0 %v7469_v38  ;;  %2202 = vmatpush1.bf16.msra.mxu1 %v7470_v39 }
 0x27d   : > { %2121 = vmatprep.subr.bf16.mxu0 %v7471_v27  ;;  %2203 = vmatprep.subr.bf16.mxu1 %v7472_v40 }
 0x27e   : > { %v5944_v41 = vpop.f32.mrb[8].mxu0  ;;  %v5946_v42 = vpop.f32.mrb[8].mxu1 }
 0x27f   : > { %7473 = vst [vmem:[#allocation80_spill] sm:$0xff] %v5944_v41  ;;  %7474 = vst [vmem:[#allocation82_spill] sm:$0xff] %v5946_v42  ;;  %v5948_v43 = vpop.f32.mrb[9].mxu0  ;;  %v5950_v44 = vpop.f32.mrb[9].mxu1  ;;  %v7526_v42 = vld [vmem:[#allocation64_spill] sm:$0xff]  ;;  %v7527_v41 = vld [vmem:[#allocation65_spill] sm:$0xff] }
 0x280   : > { %7475 = vst [vmem:[#allocation83_spill] sm:$0xff] %v5948_v43  ;;  %7476 = vst [vmem:[#allocation85_spill] sm:$0xff] %v5950_v44  ;;  %v1670_v45 = vpop.f32.mrb[10].mxu0  ;;  %v1752_v47 = vpop.f32.mrb[10].mxu1  ;;  %2122 = vmatpush1.bf16.msra.mxu0 %v7477_v46  ;;  %2204 = vmatpush1.bf16.msra.mxu1 %v7478_v49  ;;  %v7509_v49 = vld [vmem:[#allocation47_spill] sm:$0xff]  ;;  %v7524_v44 = vld [vmem:[#allocation62_spill] sm:$0xff] }
 0x281   : > { %v1671_v52 = vpop.f32.mrb[11].mxu0  ;;  %v1753_v55 = vpop.f32.mrb[11].mxu1  ;;  %2123 = vmatprep.subr.bf16.mxu0 %v7479_v56  ;;  %2205 = vmatprep.subr.bf16.mxu1 %v7480_v26  ;;  %v2616_v45 = vmul.f32 0.2, %v5703_v23  ;;  %v7525_v43 = vld [vmem:[#allocation63_spill] sm:$0xff] }
 0x282   : > { %v7510_v52 = vld [vmem:[#allocation48_spill] sm:$0xff]  ;;  %v7511_v55 = vld [vmem:[#allocation49_spill] sm:$0xff] }
 0x283   : > { %v5995_v56 = vsel %vm2615_vm0, %v5703_v23, %v2616_v45  ;;  %v7520_v45 = vld [vmem:[#allocation58_spill] sm:$0xff] }
 0x284   : > { %2124 = vmatpush1.bf16.msra.mxu0 %v7481_v32  ;;  %2206 = vmatpush1.bf16.msra.mxu1 %v7482_v20 }
 0x285   : > { %2125 = vmatprep.subr.bf16.mxu0 %v7483_v21  ;;  %2207 = vmatprep.subr.bf16.mxu1 %v7484_v51 }
 0x288   : > { %2126 = vmatpush1.bf16.msra.mxu0 %v7485_v58  ;;  %2208 = vmatpush1.bf16.msra.mxu1 %v7486_v13 }
 0x289   : > { %2127 = vmatprep.subr.bf16.mxu0 %v7487_v17  ;;  %2209 = vmatprep.subr.bf16.mxu1 %v7488_v18 }
 0x28c   : > { %2128 = vmatpush1.bf16.msra.mxu0 %v7489_v22  ;;  %2210 = vmatpush1.bf16.msra.mxu1 %v7490_v19 }
 0x28d   : > { %2129 = vmatprep.subr.bf16.mxu0 %v7491_v59  ;;  %2211 = vmatprep.subr.bf16.mxu1 %v7492_v60 }
 0x290   : > { %2130 = vmatpush1.bf16.msra.mxu0 %v7493_v61  ;;  %2212 = vmatpush1.bf16.msra.mxu1 %v7494_v62 }
 0x291   : > { %2131 = vmatprep.subr.bf16.mxu0 %v7495_v63  ;;  %2213 = vmatprep.subr.bf16.mxu1 %v7496_v0 }
 0x294   : > { %2132 = vmatpush1.bf16.msra.mxu0 %v7497_v1  ;;  %2214 = vmatpush1.bf16.msra.mxu1 %v7498_v3 }
 0x295   : > { %2133 = vmatprep.subr.bf16.mxu0 %v7499_v5  ;;  %2215 = vmatprep.subr.bf16.mxu1 %v7500_v6 }
 0x298   : > { %2134 = vmatpush1.bf16.msra.mxu0 %v7501_v7  ;;  %2216 = vmatpush1.bf16.msra.mxu1 %v7502_v9 }
 0x299   : > { %2135 = vmatprep.subr.bf16.mxu0 %v7503_v10  ;;  %2217 = vmatprep.subr.bf16.mxu1 %v7504_v11 }
 0x29c   : > { %2136 = vmatpush1.bf16.msra.mxu0 %v7505_v12  ;;  %2218 = vmatpush1.bf16.msra.mxu1 %v7506_v48 }
 0x29d   : > { %2137 = vmatprep.subr.bf16.mxu0 %v7507_v29  ;;  %2219 = vmatprep.subr.bf16.mxu1 %v7508_v30 }
 0x29e   : > { %v3682_v31 = vpop.f32.mrb[12].mxu0  ;;  %v3704_v33 = vpop.f32.mrb[12].mxu1 }
 0x29f   : > { %v3683_v34 = vpop.f32.mrb[13].mxu0  ;;  %v3705_v35 = vpop.f32.mrb[13].mxu1 }
 0x2a0   : > { %v3684_v36 = vadd.f32 %v3683_v34, %v3682_v31  ;;  %v3706_v37 = vadd.f32 %v3705_v35, %v3704_v33  ;;  %v3685_v38 = vpop.f32.mrb[14].mxu0  ;;  %v3707_v39 = vpop.f32.mrb[14].mxu1  ;;  %2138 = vmatpush1.bf16.msra.mxu0 %v5691_v14  ;;  %2220 = vmatpush1.bf16.msra.mxu1 %v5694_v28  ;;  %v6003_v33 = vcombine.low %v5911_v2, %v5911_v2  ;;  %v6006_v34 = vld [vmem:[%s4879_s10 + $0x38] sm:$0xff]  ;;  %v7523_v31 = vld [vmem:[#allocation61_spill] sm:$0xff] }
 0x2a1   : > { %v3686_v27 = vpop.f32.mrb[15].mxu0  ;;  %v3708_v40 = vpop.f32.mrb[15].mxu1  ;;  %2139 = vmatprep.subr.bf16.mxu0 %v5697_v16  ;;  %2221 = vmatprep.subr.bf16.mxu1 %v5700_v24  ;;  %v7512_v35 = vld [vmem:[#allocation50_spill] sm:$0xff]  ;;  %v7515_v38 = vld [vmem:[#allocation53_spill] sm:$0xff]  ;;  %v6014_v23 = vcombine.high %v6006_v34, %v6006_v34  ;;  %v7517_v39 = vld [vmem:[#allocation55_spill] sm:$0xff] }
 0x2a2   : > { %v1830_v47 = vadd.f32 %v3706_v37, %v3684_v36  ;;  %v7513_v36 = vld [vmem:[#allocation51_spill] sm:$0xff]  ;;  %v7514_v37 = vld [vmem:[#allocation52_spill] sm:$0xff]  ;;  %v7516_v2 = vld [vmem:[#allocation54_spill] sm:$0xff] }
 0x2a3   : > { %v7518_v27 = vld [vmem:[#allocation56_spill] sm:$0xff]  ;;  %v7519_v40 = vld [vmem:[#allocation57_spill] sm:$0xff] }
 0x2a4   : > { %vm2618_vm1 = vcmp.gt.f32.partialorder %v1830_v47, 0.0  ;;  %v2619_v46 = vmul.f32 0.2, %v1830_v47  ;;  %2140 = vmatpush1.bf16.msra.mxu0 %v5705_v4  ;;  %2222 = vmatpush1.bf16.msra.mxu1 %v7509_v49 }
 0x2a5   : > { %2141 = vmatprep.subr.bf16.mxu0 %v7510_v52  ;;  %2223 = vmatprep.subr.bf16.mxu1 %v7511_v55 }
 0x2a6   : > { %v5997_v26 = vsel %vm2618_vm1, %v1830_v47, %v2619_v46  ;;  %v7521_v47 = vld [vmem:[#allocation59_spill] sm:$0xff]  ;;  %v7522_v46 = vld [vmem:[#allocation60_spill] sm:$0xff] }
 0x2a8   : > { %2142 = vmatpush1.bf16.msra.mxu0 %v7512_v35  ;;  %2224 = vmatpush1.bf16.msra.mxu1 %v7513_v36 }
 0x2a9   : > { %2152 = vmatprep.subr.bf16.mxu0 %v7514_v37  ;;  %2234 = vmatprep.subr.bf16.mxu1 %v7515_v38 }
 0x2ab   : > { %2144 = vmatmul.mubr.bf16.vlgmr.msra.gmra.mrb[24].mxu0 %v6003_v33  ;;  %2226 = vmatmul.mubr.bf16.vlgmr.msra.gmra.mrb[24].mxu1 %v6003_v33 }
 0x2ac   : > { %2153 = vmatpush1.bf16.msra.mxu0 %v7516_v2  ;;  %2235 = vmatpush1.bf16.msra.mxu1 %v7517_v39  ;;  %v7530_v39 = vld [vmem:[#allocation68_spill] sm:$0xff] }
 0x2ad   : > { %2154 = vmatprep.subr.bf16.mxu0 %v7518_v27  ;;  %2236 = vmatprep.subr.bf16.mxu1 %v7519_v40  ;;  %v7528_v40 = vld [vmem:[#allocation66_spill] sm:$0xff]  ;;  %v7529_v27 = vld [vmem:[#allocation67_spill] sm:$0xff] }
 0x2ae   : > { %2184 = vmatprep.mubr.bf16.mxu0 %v6014_v23  ;;  %2266 = vmatprep.mubr.bf16.mxu1 %v6014_v23 }
 0x2b0   : > { %2155 = vmatpush1.bf16.msra.mxu0 %v7520_v45  ;;  %2237 = vmatpush1.bf16.msra.mxu1 %v7521_v47  ;;  %v7531_v45 = vld [vmem:[#allocation69_spill] sm:$0xff]  ;;  %v7532_v47 = vld [vmem:[#allocation70_spill] sm:$0xff] }
 0x2b1   : > { %2156 = vmatprep.subr.bf16.mxu0 %v7522_v46  ;;  %2238 = vmatprep.subr.bf16.mxu1 %v7523_v31  ;;  %v7533_v46 = vld [vmem:[#allocation71_spill] sm:$0xff]  ;;  %v7534_v31 = vld [vmem:[#allocation72_spill] sm:$0xff] }
 0x2b4   : > { %2157 = vmatpush1.bf16.msra.mxu0 %v7524_v44  ;;  %2239 = vmatpush1.bf16.msra.mxu1 %v7525_v43  ;;  %v7535_v44 = vld [vmem:[#allocation73_spill] sm:$0xff]  ;;  %v7536_v43 = vld [vmem:[#allocation74_spill] sm:$0xff] }
 0x2b5   : > { %2158 = vmatprep.subr.bf16.mxu0 %v7526_v42  ;;  %2240 = vmatprep.subr.bf16.mxu1 %v7527_v41  ;;  %v7537_v42 = vld [vmem:[#allocation75_spill] sm:$0xff]  ;;  %v7538_v41 = vld [vmem:[#allocation76_spill] sm:$0xff] }
 0x2b8   : > { %2159 = vmatpush1.bf16.msra.mxu0 %v7528_v40  ;;  %2241 = vmatpush1.bf16.msra.mxu1 %v7529_v27  ;;  %v7539_v40 = vld [vmem:[#allocation77_spill] sm:$0xff]  ;;  %v7540_v27 = vld [vmem:[#allocation78_spill] sm:$0xff] }
 0x2b9   : > { %2160 = vmatprep.subr.bf16.mxu0 %v7530_v39  ;;  %2242 = vmatprep.subr.bf16.mxu1 %v7531_v45  ;;  %v7541_v39 = vld [vmem:[#allocation79_spill] sm:$0xff]  ;;  %v7542_v45 = vld [vmem:[#allocation81_spill] sm:$0xff] }
 0x2bc   : > { %2161 = vmatpush1.bf16.msra.mxu0 %v7532_v47  ;;  %2243 = vmatpush1.bf16.msra.mxu1 %v7533_v46  ;;  %v7543_v47 = vld [vmem:[#allocation84_spill] sm:$0xff]  ;;  %v7544_v46 = vld [vmem:[#allocation105_spill] sm:$0xff] }
 0x2bd   : > { %2162 = vmatprep.subr.bf16.mxu0 %v7534_v31  ;;  %2244 = vmatprep.subr.bf16.mxu1 %v7535_v44 }
 0x2c0   : > { %2163 = vmatpush1.bf16.msra.mxu0 %v7536_v43  ;;  %2245 = vmatpush1.bf16.msra.mxu1 %v7537_v42 }
 0x2c1   : > { %2164 = vmatprep.subr.bf16.mxu0 %v7538_v41  ;;  %2246 = vmatprep.subr.bf16.mxu1 %v7539_v40 }
 0x2c4   : > { %2165 = vmatpush1.bf16.msra.mxu0 %v7540_v27  ;;  %2247 = vmatpush1.bf16.msra.mxu1 %v7541_v39  ;;  %v6055_v27 = vld [vmem:[#allocation5 + $0x32c] ss:$16 sps:$4 sm:$0xff]  }
 0x2c5   : > { %2166 = vmatprep.subr.bf16.mxu0 %v7542_v45  ;;  %2248 = vmatprep.subr.bf16.mxu1 %v7543_v47  ;;  %7545 = vst [vmem:[#allocation86_spill] sm:$0xff] %v6055_v27  ;;  %v6058_v45 = vld [vmem:[#allocation5 + $0x320] ss:$16 sps:$4 sm:$0xff]   ;;  %v4455_v47 = vld [vmem:[#allocation5 + $0xc4] ss:$16 sps:$4 sm:$0xff]  }
 0x2c6   : > { %7546 = vst [vmem:[#allocation87_spill] sm:$0xff] %v6058_v45 }
 0x2c8   : > { %2167 = vmatpush1.bf16.msra.mxu0 %v7544_v46  ;;  %2249 = vmatpush1.bf16.msra.mxu1 %v5831_v57  ;;  %v6061_v46 = vld [vmem:[#allocation5 + $0x328] ss:$16 sps:$4 sm:$0xff]   ;;  %v4453_v57 = vld [vmem:[#allocation5 + $0xa0] ss:$16 sps:$4 sm:$0xff]  }
 0x2c9   : > { %2168 = vmatprep.subr.bf16.mxu0 %v5834_v53  ;;  %2250 = vmatprep.subr.bf16.mxu1 %v5837_v54  ;;  %7547 = vst [vmem:[#allocation88_spill] sm:$0xff] %v6061_v46  ;;  %v6064_v53 = vld [vmem:[#allocation5 + $0x344] ss:$16 sps:$4 sm:$0xff]   ;;  %v4446_v54 = vld [vmem:[#allocation5 + $0x68] ss:$16 sps:$4 sm:$0xff]  }
 0x2ca   : > { %7548 = vst [vmem:[#allocation89_spill] sm:$0xff] %v6064_v53 }
 0x2cc   : > { %2169 = vmatpush1.bf16.msra.mxu0 %v5840_v25  ;;  %2251 = vmatpush1.bf16.msra.mxu1 %v5843_v50  ;;  %v6067_v25 = vld [vmem:[#allocation5 + $0x34c] ss:$16 sps:$4 sm:$0xff]  }
 0x2cd   : > { %2170 = vmatprep.subr.bf16.mxu0 %v5846_v15  ;;  %2252 = vmatprep.subr.bf16.mxu1 %v6055_v27  ;;  %7549 = vst [vmem:[#allocation90_spill] sm:$0xff] %v6067_v25  ;;  %v6070_v15 = vld [vmem:[#allocation5 + $0x340] ss:$16 sps:$4 sm:$0xff]   ;;  %v6073_v27 = vld [vmem:[#allocation5 + $0x348] ss:$16 sps:$4 sm:$0xff]  }
 0x2ce   : > { %7550 = vst [vmem:[#allocation91_spill] sm:$0xff] %v6070_v15  ;;  %7551 = vst [vmem:[#allocation92_spill] sm:$0xff] %v6073_v27  ;;  %v4436_v50 = vld [vmem:[#allocation5 + $0x2c] ss:$16 sps:$4 sm:$0xff]  }
 0x2d0   : > { %2171 = vmatpush1.bf16.msra.mxu0 %v6058_v45  ;;  %2253 = vmatpush1.bf16.msra.mxu1 %v6061_v46  ;;  %v6076_v45 = vld [vmem:[#allocation5 + $0x364] ss:$16 sps:$4 sm:$0xff]   ;;  %v6079_v46 = vld [vmem:[#allocation5 + $0x36c] ss:$16 sps:$4 sm:$0xff]  }
 0x2d1   : > { %2172 = vmatprep.subr.bf16.mxu0 %v6064_v53  ;;  %2254 = vmatprep.subr.bf16.mxu1 %v6067_v25  ;;  %7552 = vst [vmem:[#allocation93_spill] sm:$0xff] %v6076_v45  ;;  %7553 = vst [vmem:[#allocation94_spill] sm:$0xff] %v6079_v46  ;;  %v6082_v53 = vld [vmem:[#allocation5 + $0x360] ss:$16 sps:$4 sm:$0xff]   ;;  %v6085_v25 = vld [vmem:[#allocation5 + $0x368] ss:$16 sps:$4 sm:$0xff]  }
 0x2d2   : > { %7554 = vst [vmem:[#allocation95_spill] sm:$0xff] %v6082_v53  ;;  %7555 = vst [vmem:[#allocation96_spill] sm:$0xff] %v6085_v25 }
 0x2d4   : > { %2173 = vmatpush1.bf16.msra.mxu0 %v6070_v15  ;;  %2255 = vmatpush1.bf16.msra.mxu1 %v6073_v27  ;;  %v6088_v15 = vld [vmem:[#allocation5 + $0x384] ss:$16 sps:$4 sm:$0xff]   ;;  %v6091_v27 = vld [vmem:[#allocation5 + $0x38c] ss:$16 sps:$4 sm:$0xff]  }
 0x2d5   : > { %2174 = vmatprep.subr.bf16.mxu0 %v6076_v45  ;;  %2256 = vmatprep.subr.bf16.mxu1 %v6079_v46  ;;  %7556 = vst [vmem:[#allocation97_spill] sm:$0xff] %v6088_v15  ;;  %7557 = vst [vmem:[#allocation98_spill] sm:$0xff] %v6091_v27  ;;  %v6094_v45 = vld [vmem:[#allocation5 + $0x380] ss:$16 sps:$4 sm:$0xff]   ;;  %v6097_v46 = vld [vmem:[#allocation5 + $0x388] ss:$16 sps:$4 sm:$0xff]  }
 0x2d6   : > { %7558 = vst [vmem:[#allocation99_spill] sm:$0xff] %v6094_v45  ;;  %7559 = vst [vmem:[#allocation100_spill] sm:$0xff] %v6097_v46 }
 0x2d8   : > { %2175 = vmatpush1.bf16.msra.mxu0 %v6082_v53  ;;  %2257 = vmatpush1.bf16.msra.mxu1 %v6085_v25  ;;  %v6100_v53 = vld [vmem:[#allocation5 + $0x3a4] ss:$16 sps:$4 sm:$0xff]   ;;  %v6103_v25 = vld [vmem:[#allocation5 + $0x3ac] ss:$16 sps:$4 sm:$0xff]  }
 0x2d9   : > { %2176 = vmatprep.subr.bf16.mxu0 %v6088_v15  ;;  %2258 = vmatprep.subr.bf16.mxu1 %v6091_v27  ;;  %7560 = vst [vmem:[#allocation101_spill] sm:$0xff] %v6100_v53  ;;  %7561 = vst [vmem:[#allocation102_spill] sm:$0xff] %v6103_v25  ;;  %v6106_v15 = vld [vmem:[#allocation5 + $0x3a0] ss:$16 sps:$4 sm:$0xff]   ;;  %v6109_v27 = vld [vmem:[#allocation5 + $0x3a8] ss:$16 sps:$4 sm:$0xff]  }
 0x2da   : > { %7562 = vst [vmem:[#allocation103_spill] sm:$0xff] %v6106_v15  ;;  %7563 = vst [vmem:[#allocation104_spill] sm:$0xff] %v6109_v27 }
 0x2dc   : > { %2177 = vmatpush1.bf16.msra.mxu0 %v6094_v45  ;;  %2259 = vmatpush1.bf16.msra.mxu1 %v6097_v46  ;;  %v6112_v45 = vld [vmem:[#allocation5 + $0x3c4] ss:$16 sps:$4 sm:$0xff]   ;;  %v6115_v46 = vld [vmem:[#allocation5 + $0x3cc] ss:$16 sps:$4 sm:$0xff]  }
 0x2dd   : > { %2178 = vmatprep.subr.bf16.mxu0 %v6100_v53  ;;  %2260 = vmatprep.subr.bf16.mxu1 %v6103_v25  ;;  %7564 = vst [vmem:[#allocation107_spill] sm:$0xff] %v6112_v45  ;;  %7565 = vst [vmem:[#allocation108_spill] sm:$0xff] %v6115_v46  ;;  %v6118_v53 = vld [vmem:[#allocation5 + $0x3c0] ss:$16 sps:$4 sm:$0xff]   ;;  %v6121_v25 = vld [vmem:[#allocation5 + $0x3c8] ss:$16 sps:$4 sm:$0xff]  }
 0x2de   : > { %7566 = vst [vmem:[#allocation109_spill] sm:$0xff] %v6118_v53  ;;  %7567 = vst [vmem:[#allocation110_spill] sm:$0xff] %v6121_v25 }
 0x2e0   : > { %2179 = vmatpush1.bf16.msra.mxu0 %v6106_v15  ;;  %2261 = vmatpush1.bf16.msra.mxu1 %v6109_v27  ;;  %v6124_v15 = vld [vmem:[#allocation5 + $0x3e4] ss:$16 sps:$4 sm:$0xff]   ;;  %v6127_v27 = vld [vmem:[#allocation5 + $0x3ec] ss:$16 sps:$4 sm:$0xff]  }
 0x2e1   : > { %2180 = vmatprep.subr.bf16.mxu0 %v6112_v45  ;;  %2262 = vmatprep.subr.bf16.mxu1 %v6115_v46  ;;  %7568 = vst [vmem:[#allocation111_spill] sm:$0xff] %v6124_v15  ;;  %7569 = vst [vmem:[#allocation112_spill] sm:$0xff] %v6127_v27  ;;  %v6132_v45 = vcombine.low %v6006_v34, %v6006_v34  ;;  %v6134_v46 = vld [vmem:[#allocation5 + $0x3e0] ss:$16 sps:$4 sm:$0xff]  }
 0x2e2   : > { %7570 = vst [vmem:[#allocation114_spill] sm:$0xff] %v6134_v46  ;;  %v6148_v34 = vld [vmem:[#allocation7] sm:$0xff]  }
 0x2e3   : > { %7574 = vst [vmem:[#allocation118_spill] sm:$0xff] %v6148_v34 }
 0x2e4   : > { %2181 = vmatpush1.bf16.msra.mxu0 %v6118_v53  ;;  %2263 = vmatpush1.bf16.msra.mxu1 %v6121_v25  ;;  %v6137_v53 = vld [vmem:[#allocation5 + $0x3e8] ss:$16 sps:$4 sm:$0xff]   ;;  %v6140_v25 = vld [vmem:[#allocation7 + $0x40] sm:$0xff]  }
 0x2e5   : > { %2182 = vmatprep.subr.bf16.mxu0 %v6124_v15  ;;  %2264 = vmatprep.subr.bf16.mxu1 %v6127_v27  ;;  %7571 = vst [vmem:[#allocation115_spill] sm:$0xff] %v6137_v53  ;;  %7572 = vst [vmem:[#allocation116_spill] sm:$0xff] %v6140_v25  ;;  %v6143_v15 = vld [vmem:[#allocation7 + $0xc0] sm:$0xff]   ;;  %v4434_v27 = vld [vmem:[#allocation5 + $0x8] ss:$16 sps:$4 sm:$0xff]  }
 0x2e6   : > { %7573 = vst [vmem:[#allocation117_spill] sm:$0xff] %v6143_v15 }
 0x2e8   : > { %2183 = vmatpush1.bf16.msra.mxu0 %v6134_v46  ;;  %2265 = vmatpush1.bf16.msra.mxu1 %v6137_v53  ;;  %v6151_v46 = vld [vmem:[#allocation7 + $0x80] sm:$0xff]   ;;  %v6154_v53 = vld [vmem:[#allocation7 + $0x48] sm:$0xff]  }
 0x2e9   : > { %3754 = vmatprep.subr.bf16.mxu0 %v6140_v25  ;;  %3776 = vmatprep.subr.bf16.mxu1 %v6143_v15  ;;  %7575 = vst [vmem:[#allocation119_spill] sm:$0xff] %v6151_v46  ;;  %7576 = vst [vmem:[#allocation120_spill] sm:$0xff] %v6154_v53  ;;  %v6157_v25 = vld [vmem:[#allocation7 + $0xc8] sm:$0xff]  }
 0x2ea   : > { %7577 = vst [vmem:[#allocation121_spill] sm:$0xff] %v6157_v25  ;;  %v6162_v15 = vld [vmem:[#allocation7 + $0x8] sm:$0xff]  }
 0x2eb   : > { %2185 = vmatmul.mubr.bf16.vlgmr.msra.gmra.mrb[24].mxu0 %v6132_v45  ;;  %2267 = vmatmul.mubr.bf16.vlgmr.msra.gmra.mrb[24].mxu1 %v6132_v45  ;;  %7578 = vst [vmem:[#allocation19_spill] sm:$0xff] %v6162_v15 }
 0x2ec   : > { %3755 = vmatpush3.bf16.msra.mxu0 %v6148_v34  ;;  %3777 = vmatpush3.bf16.msra.mxu1 %v6151_v46  ;;  %v6165_v34 = vld [vmem:[#allocation7 + $0x88] sm:$0xff]   ;;  %v6168_v46 = vld [vmem:[#allocation7 + $0x50] sm:$0xff]  }
 0x2ed   : > { %3756 = vmatprep.subr.bf16.mxu0 %v6154_v53  ;;  %3778 = vmatprep.subr.bf16.mxu1 %v6157_v25  ;;  %7579 = vst [vmem:[#allocation20_spill] sm:$0xff] %v6165_v34  ;;  %7580 = vst [vmem:[#allocation21_spill] sm:$0xff] %v6168_v46  ;;  %v6171_v53 = vld [vmem:[#allocation7 + $0xd0] sm:$0xff]  }
 0x2ee   : > { %2307 = vmatprep.mubr.bf16.mxu0 %v5919_v8  ;;  %2347 = vmatprep.mubr.bf16.mxu1 %v6014_v23  ;;  %7581 = vst [vmem:[#allocation22_spill] sm:$0xff] %v6171_v53  ;;  %v6174_v25 = vld [vmem:[#allocation7 + $0x10] sm:$0xff]   ;;  %v6180_v23 = vld [vmem:[#allocation7 + $0x58] sm:$0xff]  }
 0x2ef   : > { %7582 = vst [vmem:[#allocation23_spill] sm:$0xff] %v6174_v25  ;;  %v6177_v8 = vld [vmem:[#allocation7 + $0x90] sm:$0xff]   ;;  %7584 = vst [vmem:[#allocation25_spill] sm:$0xff] %v6180_v23 }
 0x2f0   : > { %3757 = vmatpush3.bf16.msra.mxu0 %v6162_v15  ;;  %3779 = vmatpush3.bf16.msra.mxu1 %v6165_v34  ;;  %7583 = vst [vmem:[#allocation24_spill] sm:$0xff] %v6177_v8  ;;  %v6183_v34 = vld [vmem:[#allocation7 + $0xd8] sm:$0xff]  }
 0x2f1   : > { %3758 = vmatprep.subr.bf16.mxu0 %v6168_v46  ;;  %3780 = vmatprep.subr.bf16.mxu1 %v6171_v53  ;;  %7585 = vst [vmem:[#allocation26_spill] sm:$0xff] %v6183_v34  ;;  %v6186_v46 = vld [vmem:[#allocation7 + $0x18] sm:$0xff]  }
 0x2f2   : > { %7586 = vst [vmem:[#allocation27_spill] sm:$0xff] %v6186_v46  ;;  %v6189_v53 = vld [vmem:[#allocation7 + $0x98] sm:$0xff]  }
 0x2f3   : > { %7587 = vst [vmem:[#allocation28_spill] sm:$0xff] %v6189_v53  ;;  %v6237_v15 = vld [vmem:[#allocation7 + $0x38] sm:$0xff]  }
 0x2f4   : > { %3759 = vmatpush3.bf16.msra.mxu0 %v6174_v25  ;;  %3781 = vmatpush3.bf16.msra.mxu1 %v6177_v8  ;;  %v6192_v25 = vld [vmem:[#allocation7 + $0x60] sm:$0xff]   ;;  %7602 = vst [vmem:[#allocation43_spill] sm:$0xff] %v6237_v15 }
 0x2f5   : > { %3760 = vmatprep.subr.bf16.mxu0 %v6180_v23  ;;  %3782 = vmatprep.subr.bf16.mxu1 %v6183_v34  ;;  %7588 = vst [vmem:[#allocation29_spill] sm:$0xff] %v6192_v25  ;;  %v6195_v8 = vld [vmem:[#allocation7 + $0xe0] sm:$0xff]  }
 0x2f6   : > { %7589 = vst [vmem:[#allocation30_spill] sm:$0xff] %v6195_v8  ;;  %v6198_v23 = vld [vmem:[#allocation7 + $0x20] sm:$0xff]  }
 0x2f7   : > { %7590 = vst [vmem:[#allocation31_spill] sm:$0xff] %v6198_v23  ;;  %v6201_v34 = vld [vmem:[#allocation7 + $0xa0] sm:$0xff]  }
 0x2f8   : > { %3761 = vmatpush3.bf16.msra.mxu0 %v6186_v46  ;;  %3783 = vmatpush3.bf16.msra.mxu1 %v6189_v53  ;;  %7591 = vst [vmem:[#allocation32_spill] sm:$0xff] %v6201_v34  ;;  %v6204_v46 = vld [vmem:[#allocation7 + $0x68] sm:$0xff]  }
 0x2f9   : > { %3762 = vmatprep.subr.bf16.mxu0 %v6192_v25  ;;  %3784 = vmatprep.subr.bf16.mxu1 %v6195_v8  ;;  %7592 = vst [vmem:[#allocation33_spill] sm:$0xff] %v6204_v46  ;;  %v6207_v53 = vld [vmem:[#allocation7 + $0xe8] sm:$0xff]  }
 0x2fa   : > { %7593 = vst [vmem:[#allocation34_spill] sm:$0xff] %v6207_v53  ;;  %v6210_v25 = vld [vmem:[#allocation7 + $0x28] sm:$0xff]  }
 0x2fb   : > { %7594 = vst [vmem:[#allocation35_spill] sm:$0xff] %v6210_v25  ;;  %v6213_v8 = vld [vmem:[#allocation7 + $0xa8] sm:$0xff]  }
 0x2fc   : > { %3763 = vmatpush3.bf16.msra.mxu0 %v6198_v23  ;;  %3785 = vmatpush3.bf16.msra.mxu1 %v6201_v34  ;;  %7595 = vst [vmem:[#allocation36_spill] sm:$0xff] %v6213_v8  ;;  %v6216_v23 = vld [vmem:[#allocation7 + $0x70] sm:$0xff]  }
 0x2fd   : > { %3764 = vmatprep.subr.bf16.mxu0 %v6204_v46  ;;  %3786 = vmatprep.subr.bf16.mxu1 %v6207_v53  ;;  %7596 = vst [vmem:[#allocation37_spill] sm:$0xff] %v6216_v23  ;;  %v6219_v34 = vld [vmem:[#allocation7 + $0xf0] sm:$0xff]  }
 0x2fe   : > { %7597 = vst [vmem:[#allocation38_spill] sm:$0xff] %v6219_v34  ;;  %v6222_v46 = vld [vmem:[#allocation7 + $0x30] sm:$0xff]  }
 0x2ff   : > { %7598 = vst [vmem:[#allocation39_spill] sm:$0xff] %v6222_v46  ;;  %v6225_v53 = vld [vmem:[#allocation7 + $0xb0] sm:$0xff]  }
 0x300   : > { %3765 = vmatpush3.bf16.msra.mxu0 %v6210_v25  ;;  %3787 = vmatpush3.bf16.msra.mxu1 %v6213_v8  ;;  %7599 = vst [vmem:[#allocation40_spill] sm:$0xff] %v6225_v53  ;;  %v6228_v25 = vld [vmem:[#allocation7 + $0x78] sm:$0xff]  }
 0x301   : > { %3766 = vmatprep.subr.bf16.mxu0 %v6216_v23  ;;  %3788 = vmatprep.subr.bf16.mxu1 %v6219_v34  ;;  %7600 = vst [vmem:[#allocation41_spill] sm:$0xff] %v6228_v25  ;;  %v6231_v8 = vld [vmem:[#allocation7 + $0xf8] sm:$0xff]   ;;  %v6235_v23 = vld [vmem:[%s4879_s10 + $0x40] sm:$0xff] }
 0x302   : > { %7601 = vst [vmem:[#allocation42_spill] sm:$0xff] %v6231_v8  ;;  %v6240_v34 = vld [vmem:[#allocation7 + $0xb8] sm:$0xff]  }
 0x303   : > { %7603 = vst [vmem:[#allocation44_spill] sm:$0xff] %v6240_v34 }
 0x304   : > { %3767 = vmatpush3.bf16.msra.mxu0 %v6222_v46  ;;  %3789 = vmatpush3.bf16.msra.mxu1 %v6225_v53  ;;  %v4431_v46 = vld [vmem:[#allocation5 + $0x4] ss:$16 sps:$4 sm:$0xff]   ;;  %v4432_v53 = vld [vmem:[#allocation5 + $0xc] ss:$16 sps:$4 sm:$0xff]  }
 0x305   : > { %3768 = vmatprep.subr.bf16.mxu0 %v6228_v25  ;;  %3790 = vmatprep.subr.bf16.mxu1 %v6231_v8  ;;  %v6245_v25 = vcombine.high %v6235_v23, %v6235_v23  ;;  %v4433_v8 = vld [vmem:[#allocation5] ss:$16 sps:$4 sm:$0xff]  }
 0x307   : > { %7604 = vst [vmem:[#allocation45_spill] sm:$0xff] %v6245_v25 }
 0x308   : > { %3769 = vmatpush3.bf16.msra.mxu0 %v6237_v15  ;;  %3791 = vmatpush3.bf16.msra.mxu1 %v6240_v34  ;;  %v4435_v15 = vld [vmem:[#allocation5 + $0x24] ss:$16 sps:$4 sm:$0xff]  }
 0x309   : > { %2371 = vmatprep.subr.bf16.mxu0 %v4431_v46  ;;  %2453 = vmatprep.subr.bf16.mxu1 %v4432_v53  ;;  %v4437_v53 = vld [vmem:[#allocation5 + $0x20] ss:$16 sps:$4 sm:$0xff]   ;;  %v4438_v46 = vld [vmem:[#allocation5 + $0x28] ss:$16 sps:$4 sm:$0xff]   ;;  %v4439_v34 = vld [vmem:[#allocation5 + $0x44] ss:$16 sps:$4 sm:$0xff]  }
 0x30b   : > { %2308 = vmatmul.mubr.bf16.vlgmr.msra.gmra.mrb[28].mxu0 %v6003_v33  ;;  %2348 = vmatmul.mubr.bf16.vlgmr.msra.gmra.mrb[28].mxu1 %v6132_v45  ;;  %v4440_v33 = vld [vmem:[#allocation5 + $0x4c] ss:$16 sps:$4 sm:$0xff]   ;;  %v4441_v45 = vld [vmem:[#allocation5 + $0x40] ss:$16 sps:$4 sm:$0xff]  }
 0x30c   : > { %2372 = vmatpush1.bf16.msra.mxu0 %v4433_v8  ;;  %2454 = vmatpush1.bf16.msra.mxu1 %v4434_v27  ;;  %v4442_v8 = vld [vmem:[#allocation5 + $0x48] ss:$16 sps:$4 sm:$0xff]   ;;  %v4443_v27 = vld [vmem:[#allocation5 + $0x64] ss:$16 sps:$4 sm:$0xff]  }
 0x30d   : > { %2373 = vmatprep.subr.bf16.mxu0 %v4435_v15  ;;  %2455 = vmatprep.subr.bf16.mxu1 %v4436_v50  ;;  %v4444_v15 = vld [vmem:[#allocation5 + $0x6c] ss:$16 sps:$4 sm:$0xff]   ;;  %v4445_v50 = vld [vmem:[#allocation5 + $0x60] ss:$16 sps:$4 sm:$0xff]  }
 0x30e   : > { %2403 = vmatprep.mubr.bf16.mxu0 %v6245_v25  ;;  %2485 = vmatprep.mubr.bf16.mxu1 %v6245_v25  ;;  %v4447_v25 = vld [vmem:[#allocation5 + $0x84] ss:$16 sps:$4 sm:$0xff]  }
 0x310   : > { %2374 = vmatpush1.bf16.msra.mxu0 %v4437_v53  ;;  %2456 = vmatpush1.bf16.msra.mxu1 %v4438_v46  ;;  %v4448_v53 = vld [vmem:[#allocation5 + $0x8c] ss:$16 sps:$4 sm:$0xff]   ;;  %v4449_v46 = vld [vmem:[#allocation5 + $0x80] ss:$16 sps:$4 sm:$0xff]  }
 0x311   : > { %2375 = vmatprep.subr.bf16.mxu0 %v4439_v34  ;;  %2457 = vmatprep.subr.bf16.mxu1 %v4440_v33  ;;  %v4450_v34 = vld [vmem:[#allocation5 + $0x88] ss:$16 sps:$4 sm:$0xff]   ;;  %v4451_v33 = vld [vmem:[#allocation5 + $0xa4] ss:$16 sps:$4 sm:$0xff]  }
 0x314   : > { %2376 = vmatpush1.bf16.msra.mxu0 %v4441_v45  ;;  %2458 = vmatpush1.bf16.msra.mxu1 %v4442_v8  ;;  %v4452_v45 = vld [vmem:[#allocation5 + $0xac] ss:$16 sps:$4 sm:$0xff]  }
 0x315   : > { %2377 = vmatprep.subr.bf16.mxu0 %v4443_v27  ;;  %2459 = vmatprep.subr.bf16.mxu1 %v4444_v15 }
 0x318   : > { %2378 = vmatpush1.bf16.msra.mxu0 %v4445_v50  ;;  %2460 = vmatpush1.bf16.msra.mxu1 %v4446_v54 }
 0x319   : > { %2379 = vmatprep.subr.bf16.mxu0 %v4447_v25  ;;  %2461 = vmatprep.subr.bf16.mxu1 %v4448_v53  ;;  %v4454_v53 = vld [vmem:[#allocation5 + $0xa8] ss:$16 sps:$4 sm:$0xff]  }
 0x31c   : > { %2380 = vmatpush1.bf16.msra.mxu0 %v4449_v46  ;;  %2462 = vmatpush1.bf16.msra.mxu1 %v4450_v34 }
 0x31d   : > { %2381 = vmatprep.subr.bf16.mxu0 %v4451_v33  ;;  %2463 = vmatprep.subr.bf16.mxu1 %v4452_v45  ;;  %v4456_v33 = vld [vmem:[#allocation5 + $0xcc] ss:$16 sps:$4 sm:$0xff]  }
 0x31e   : > { %v6251_v8 = vpop.f32.mrb[16].mxu0  ;;  %v6253_v27 = vpop.f32.mrb[16].mxu1  ;;  %v7639_v45 = vld [vmem:[#allocation92_spill] sm:$0xff] }
 0x31f   : > { %v6255_v15 = vpop.f32.mrb[17].mxu0  ;;  %v6257_v50 = vpop.f32.mrb[17].mxu1 }
 0x320   : > { %v1930_v54 = vpop.f32.mrb[18].mxu0  ;;  %v2012_v25 = vpop.f32.mrb[18].mxu1  ;;  %2382 = vmatpush1.bf16.msra.mxu0 %v4453_v57  ;;  %2464 = vmatpush1.bf16.msra.mxu1 %v4454_v53  ;;  %v7642_v53 = vld [vmem:[#allocation95_spill] sm:$0xff] }
 0x321   : > { %v1931_v46 = vpop.f32.mrb[19].mxu0  ;;  %v2013_v34 = vpop.f32.mrb[19].mxu1  ;;  %2383 = vmatprep.subr.bf16.mxu0 %v4455_v47  ;;  %2465 = vmatprep.subr.bf16.mxu1 %v4456_v33  ;;  %v7637_v47 = vld [vmem:[#allocation90_spill] sm:$0xff]  ;;  %v7640_v54 = vld [vmem:[#allocation93_spill] sm:$0xff] }
 0x322   : > { %v7641_v25 = vld [vmem:[#allocation94_spill] sm:$0xff]  ;;  %v7643_v46 = vld [vmem:[#allocation96_spill] sm:$0xff]  ;;  %v7644_v34 = vld [vmem:[#allocation97_spill] sm:$0xff] }
 0x323   : > { %v7645_v33 = vld [vmem:[#allocation98_spill] sm:$0xff] }
 0x324   : > { %2384 = vmatpush1.bf16.msra.mxu0 %v7481_v32  ;;  %2466 = vmatpush1.bf16.msra.mxu1 %v7482_v20 }
 0x325   : > { %2385 = vmatprep.subr.bf16.mxu0 %v7483_v21  ;;  %2467 = vmatprep.subr.bf16.mxu1 %v7484_v51 }
 0x328   : > { %2386 = vmatpush1.bf16.msra.mxu0 %v7485_v58  ;;  %2468 = vmatpush1.bf16.msra.mxu1 %v7486_v13 }
 0x329   : > { %2387 = vmatprep.subr.bf16.mxu0 %v7487_v17  ;;  %2469 = vmatprep.subr.bf16.mxu1 %v7488_v18 }
 0x32c   : > { %2388 = vmatpush1.bf16.msra.mxu0 %v7489_v22  ;;  %2470 = vmatpush1.bf16.msra.mxu1 %v7490_v19 }
 0x32d   : > { %2389 = vmatprep.subr.bf16.mxu0 %v7491_v59  ;;  %2471 = vmatprep.subr.bf16.mxu1 %v7492_v60  ;;  %v6308_v60 = vld [vmem:[%s4879_s10 + $0x48] sm:$0xff] }
 0x330   : > { %2390 = vmatpush1.bf16.msra.mxu0 %v7493_v61  ;;  %2472 = vmatpush1.bf16.msra.mxu1 %v7494_v62  ;;  %v7606_v61 = vld [vmem:[#allocation55_spill] sm:$0xff]  ;;  %v7607_v62 = vld [vmem:[#allocation56_spill] sm:$0xff] }
 0x331   : > { %2391 = vmatprep.subr.bf16.mxu0 %v7495_v63  ;;  %2473 = vmatprep.subr.bf16.mxu1 %v7496_v0  ;;  %v7608_v63 = vld [vmem:[#allocation57_spill] sm:$0xff]  ;;  %v7609_v0 = vld [vmem:[#allocation58_spill] sm:$0xff] }
 0x334   : > { %2392 = vmatpush1.bf16.msra.mxu0 %v7497_v1  ;;  %2474 = vmatpush1.bf16.msra.mxu1 %v7498_v3  ;;  %v7610_v1 = vld [vmem:[#allocation59_spill] sm:$0xff]  ;;  %v7611_v3 = vld [vmem:[#allocation60_spill] sm:$0xff] }
 0x335   : > { %2393 = vmatprep.subr.bf16.mxu0 %v7499_v5  ;;  %2475 = vmatprep.subr.bf16.mxu1 %v7500_v6  ;;  %v7612_v5 = vld [vmem:[#allocation61_spill] sm:$0xff]  ;;  %v7613_v6 = vld [vmem:[#allocation62_spill] sm:$0xff] }
 0x338   : > { %2394 = vmatpush1.bf16.msra.mxu0 %v7501_v7  ;;  %2476 = vmatpush1.bf16.msra.mxu1 %v7502_v9  ;;  %v7614_v7 = vld [vmem:[#allocation63_spill] sm:$0xff]  ;;  %v7615_v9 = vld [vmem:[#allocation64_spill] sm:$0xff] }
 0x339   : > { %2395 = vmatprep.subr.bf16.mxu0 %v7503_v10  ;;  %2477 = vmatprep.subr.bf16.mxu1 %v7504_v11  ;;  %v7616_v10 = vld [vmem:[#allocation65_spill] sm:$0xff]  ;;  %v7617_v11 = vld [vmem:[#allocation66_spill] sm:$0xff] }
 0x33c   : > { %2396 = vmatpush1.bf16.msra.mxu0 %v7505_v12  ;;  %2478 = vmatpush1.bf16.msra.mxu1 %v7506_v48  ;;  %v7618_v12 = vld [vmem:[#allocation67_spill] sm:$0xff]  ;;  %v7619_v48 = vld [vmem:[#allocation68_spill] sm:$0xff] }
 0x33d   : > { %2397 = vmatprep.subr.bf16.mxu0 %v7507_v29  ;;  %2479 = vmatprep.subr.bf16.mxu1 %v7508_v30  ;;  %v7620_v29 = vld [vmem:[#allocation69_spill] sm:$0xff]  ;;  %v7621_v30 = vld [vmem:[#allocation70_spill] sm:$0xff] }
 0x33e   : > { %v3726_v57 = vpop.f32.mrb[20].mxu0  ;;  %v3748_v32 = vpop.f32.mrb[20].mxu1 }
 0x33f   : > { %v3727_v20 = vpop.f32.mrb[21].mxu0  ;;  %v3749_v21 = vpop.f32.mrb[21].mxu1 }
 0x340   : > { %v3728_v51 = vadd.f32 %v3727_v20, %v3726_v57  ;;  %v3750_v58 = vadd.f32 %v3749_v21, %v3748_v32  ;;  %v3729_v13 = vpop.f32.mrb[22].mxu0  ;;  %v3751_v17 = vpop.f32.mrb[22].mxu1  ;;  %2398 = vmatpush1.bf16.msra.mxu0 %v5691_v14  ;;  %2480 = vmatpush1.bf16.msra.mxu1 %v5694_v28  ;;  %v7605_v28 = vmax.f32 %v5995_v56, %v5997_v26  ;;  %v7646_v57 = vld [vmem:[#allocation99_spill] sm:$0xff]  ;;  %v7647_v32 = vld [vmem:[#allocation100_spill] sm:$0xff]  ;;  %v7648_v20 = vld [vmem:[#allocation101_spill] sm:$0xff] }
 0x341   : > { %v3730_v18 = vpop.f32.mrb[23].mxu0  ;;  %v3752_v22 = vpop.f32.mrb[23].mxu1  ;;  %2399 = vmatprep.subr.bf16.mxu0 %v5697_v16  ;;  %2481 = vmatprep.subr.bf16.mxu1 %v5700_v24  ;;  %v6305_v24 = vcombine.low %v6235_v23, %v6235_v23  ;;  %v7638_v23 = vld [vmem:[#allocation91_spill] sm:$0xff]  ;;  %v7649_v21 = vld [vmem:[#allocation102_spill] sm:$0xff]  ;;  %v7653_v17 = vld [vmem:[#allocation108_spill] sm:$0xff] }
 0x342   : > { %v2090_v19 = vadd.f32 %v3750_v58, %v3728_v51  ;;  %v7650_v51 = vld [vmem:[#allocation103_spill] sm:$0xff]  ;;  %v7651_v58 = vld [vmem:[#allocation104_spill] sm:$0xff]  ;;  %v7654_v18 = vld [vmem:[#allocation109_spill] sm:$0xff] }
 0x343   : > { %v7652_v13 = vld [vmem:[#allocation107_spill] sm:$0xff]  ;;  %v7655_v22 = vld [vmem:[#allocation110_spill] sm:$0xff] }
 0x344   : > { %vm2621_vm2 = vcmp.gt.f32.partialorder %v2090_v19, 0.0  ;;  %v2622_v59 = vmul.f32 0.2, %v2090_v19  ;;  %2400 = vmatpush1.bf16.msra.mxu0 %v5705_v4  ;;  %2482 = vmatpush1.bf16.msra.mxu1 %v7509_v49  ;;  %v6316_v4 = vcombine.high %v6308_v60, %v6308_v60  ;;  %v7622_v49 = vld [vmem:[#allocation71_spill] sm:$0xff] }
 0x345   : > { %2401 = vmatprep.subr.bf16.mxu0 %v7510_v52  ;;  %2483 = vmatprep.subr.bf16.mxu1 %v7511_v55  ;;  %v7623_v52 = vld [vmem:[#allocation78_spill] sm:$0xff]  ;;  %v7624_v55 = vld [vmem:[#allocation81_spill] sm:$0xff] }
 0x346   : > { %v6295_v14 = vsel %vm2621_vm2, %v2090_v19, %v2622_v59  ;;  %v7656_v19 = vld [vmem:[#allocation111_spill] sm:$0xff]  ;;  %v7657_v59 = vld [vmem:[#allocation112_spill] sm:$0xff] }
 0x347   : > { %v6301_v16 = vmax.f32 %v7605_v28, %v6295_v14  ;;  %v3582_v28 = vcombine.low %v6308_v60, %v6308_v60  ;;  %v7667_v60 = vld [vmem:[#allocation19_spill] sm:$0xff] }
 0x348   : > { %2402 = vmatpush1.bf16.msra.mxu0 %v7512_v35  ;;  %2484 = vmatpush1.bf16.msra.mxu1 %v7513_v36  ;;  %v7625_v35 = vld [vmem:[#allocation84_spill] sm:$0xff]  ;;  %v7626_v36 = vld [vmem:[#allocation105_spill] sm:$0xff] }
 0x349   : > { %2412 = vmatprep.subr.bf16.mxu0 %v7514_v37  ;;  %2494 = vmatprep.subr.bf16.mxu1 %v7515_v38  ;;  %v7632_v37 = vld [vmem:[#allocation125_spill] sm:$0xff]  ;;  %v7633_v38 = vld [vmem:[#allocation86_spill] sm:$0xff] }
 0x34b   : > { %2404 = vmatmul.mubr.bf16.vlgmr.msra.gmra.mrb[32].mxu0 %v6305_v24  ;;  %2486 = vmatmul.mubr.bf16.vlgmr.msra.gmra.mrb[32].mxu1 %v6305_v24 }
 0x34c   : > { %2413 = vmatpush1.bf16.msra.mxu0 %v7516_v2  ;;  %2495 = vmatpush1.bf16.msra.mxu1 %v7606_v61  ;;  %v7634_v2 = vld [vmem:[#allocation87_spill] sm:$0xff]  ;;  %v7658_v61 = vld [vmem:[#allocation114_spill] sm:$0xff] }
 0x34d   : > { %2414 = vmatprep.subr.bf16.mxu0 %v7607_v62  ;;  %2496 = vmatprep.subr.bf16.mxu1 %v7608_v63  ;;  %v7659_v62 = vld [vmem:[#allocation115_spill] sm:$0xff]  ;;  %v7660_v63 = vld [vmem:[#allocation116_spill] sm:$0xff] }
 0x34e   : > { %2444 = vmatprep.mubr.bf16.mxu0 %v6316_v4  ;;  %2526 = vmatprep.mubr.bf16.mxu1 %v6316_v4 }
 0x350   : > { %2415 = vmatpush1.bf16.msra.mxu0 %v7609_v0  ;;  %2497 = vmatpush1.bf16.msra.mxu1 %v7610_v1  ;;  %v7661_v0 = vld [vmem:[#allocation117_spill] sm:$0xff]  ;;  %v7662_v1 = vld [vmem:[#allocation118_spill] sm:$0xff] }
 0x351   : > { %2416 = vmatprep.subr.bf16.mxu0 %v7611_v3  ;;  %2498 = vmatprep.subr.bf16.mxu1 %v7612_v5  ;;  %v7663_v3 = vld [vmem:[#allocation119_spill] sm:$0xff]  ;;  %v7664_v5 = vld [vmem:[#allocation120_spill] sm:$0xff] }
 0x354   : > { %2417 = vmatpush1.bf16.msra.mxu0 %v7613_v6  ;;  %2499 = vmatpush1.bf16.msra.mxu1 %v7614_v7  ;;  %v7665_v6 = vld [vmem:[#allocation121_spill] sm:$0xff] }
 0x355   : > { %2418 = vmatprep.subr.bf16.mxu0 %v7615_v9  ;;  %2500 = vmatprep.subr.bf16.mxu1 %v7616_v10  ;;  %v7666_v7 = vld [vmem:[#allocation45_spill] sm:$0xff]  ;;  %v7668_v9 = vld [vmem:[#allocation20_spill] sm:$0xff] }
 0x356   : > { %v7669_v10 = vld [vmem:[#allocation21_spill] sm:$0xff] }
 0x358   : > { %2419 = vmatpush1.bf16.msra.mxu0 %v7617_v11  ;;  %2501 = vmatpush1.bf16.msra.mxu1 %v7618_v12  ;;  %v7670_v11 = vld [vmem:[#allocation22_spill] sm:$0xff]  ;;  %v7671_v12 = vld [vmem:[#allocation23_spill] sm:$0xff] }
 0x359   : > { %2420 = vmatprep.subr.bf16.mxu0 %v7619_v48  ;;  %2502 = vmatprep.subr.bf16.mxu1 %v7620_v29  ;;  %v7672_v48 = vld [vmem:[#allocation24_spill] sm:$0xff]  ;;  %v7673_v29 = vld [vmem:[#allocation25_spill] sm:$0xff] }
 0x35c   : > { %2421 = vmatpush1.bf16.msra.mxu0 %v7621_v30  ;;  %2503 = vmatpush1.bf16.msra.mxu1 %v7622_v49  ;;  %v7674_v30 = vld [vmem:[#allocation26_spill] sm:$0xff]  ;;  %v7675_v49 = vld [vmem:[#allocation27_spill] sm:$0xff] }
 0x35d   : > { %2422 = vmatprep.subr.bf16.mxu0 %v7534_v31  ;;  %2504 = vmatprep.subr.bf16.mxu1 %v7535_v44  ;;  %v7627_v31 = vld [vmem:[#allocation106_spill] sm:$0xff]  ;;  %v7628_v44 = vld [vmem:[#allocation113_spill] sm:$0xff] }
 0x360   : > { %2423 = vmatpush1.bf16.msra.mxu0 %v7536_v43  ;;  %2505 = vmatpush1.bf16.msra.mxu1 %v7537_v42  ;;  %v7629_v43 = vld [vmem:[#allocation122_spill] sm:$0xff]  ;;  %v7630_v42 = vld [vmem:[#allocation123_spill] sm:$0xff] }
 0x361   : > { %2424 = vmatprep.subr.bf16.mxu0 %v7538_v41  ;;  %2506 = vmatprep.subr.bf16.mxu1 %v7539_v40  ;;  %v7631_v41 = vld [vmem:[#allocation124_spill] sm:$0xff]  ;;  %v7636_v40 = vld [vmem:[#allocation89_spill] sm:$0xff] }
 0x364   : > { %2425 = vmatpush1.bf16.msra.mxu0 %v7623_v52  ;;  %2507 = vmatpush1.bf16.msra.mxu1 %v7541_v39  ;;  %v7635_v39 = vld [vmem:[#allocation88_spill] sm:$0xff] }
 0x365   : > { %2426 = vmatprep.subr.bf16.mxu0 %v7624_v55  ;;  %2508 = vmatprep.subr.bf16.mxu1 %v7625_v35  ;;  %v7676_v52 = vld [vmem:[#allocation28_spill] sm:$0xff]  ;;  %v7678_v55 = vld [vmem:[#allocation30_spill] sm:$0xff]  ;;  %v7679_v35 = vld [vmem:[#allocation31_spill] sm:$0xff] }
 0x368   : > { %2427 = vmatpush1.bf16.msra.mxu0 %v7626_v36  ;;  %2509 = vmatpush1.bf16.msra.mxu1 %v7627_v31  ;;  %v7680_v36 = vld [vmem:[#allocation32_spill] sm:$0xff]  ;;  %v7681_v31 = vld [vmem:[#allocation33_spill] sm:$0xff] }
 0x369   : > { %2428 = vmatprep.subr.bf16.mxu0 %v7628_v44  ;;  %2510 = vmatprep.subr.bf16.mxu1 %v7629_v43  ;;  %v7682_v44 = vld [vmem:[#allocation34_spill] sm:$0xff]  ;;  %v7683_v43 = vld [vmem:[#allocation35_spill] sm:$0xff] }
 0x36c   : > { %2429 = vmatpush1.bf16.msra.mxu0 %v7630_v42  ;;  %2511 = vmatpush1.bf16.msra.mxu1 %v7631_v41  ;;  %v7684_v42 = vld [vmem:[#allocation36_spill] sm:$0xff]  ;;  %v7685_v41 = vld [vmem:[#allocation37_spill] sm:$0xff] }
 0x36d   : > { %2430 = vmatprep.subr.bf16.mxu0 %v7632_v37  ;;  %2512 = vmatprep.subr.bf16.mxu1 %v7633_v38  ;;  %v7686_v37 = vld [vmem:[#allocation38_spill] sm:$0xff]  ;;  %v7687_v38 = vld [vmem:[#allocation39_spill] sm:$0xff] }
 0x370   : > { %2431 = vmatpush1.bf16.msra.mxu0 %v7634_v2  ;;  %2513 = vmatpush1.bf16.msra.mxu1 %v7635_v39  ;;  %v7688_v2 = vld [vmem:[#allocation40_spill] sm:$0xff]  ;;  %v7689_v39 = vld [vmem:[#allocation41_spill] sm:$0xff] }
 0x371   : > { %2432 = vmatprep.subr.bf16.mxu0 %v7636_v40  ;;  %2514 = vmatprep.subr.bf16.mxu1 %v7637_v47  ;;  %v7690_v40 = vld [vmem:[#allocation42_spill] sm:$0xff]  ;;  %v7691_v47 = vld [vmem:[#allocation43_spill] sm:$0xff] }
 0x374   : > { %2433 = vmatpush1.bf16.msra.mxu0 %v7638_v23  ;;  %2515 = vmatpush1.bf16.msra.mxu1 %v7639_v45  ;;  %v7692_v23 = vld [vmem:[#allocation44_spill] sm:$0xff] }
 0x375   : > { %2434 = vmatprep.subr.bf16.mxu0 %v7640_v54  ;;  %2516 = vmatprep.subr.bf16.mxu1 %v7641_v25 }
 0x378   : > { %2435 = vmatpush1.bf16.msra.mxu0 %v7642_v53  ;;  %2517 = vmatpush1.bf16.msra.mxu1 %v7643_v46 }
 0x379   : > { %2436 = vmatprep.subr.bf16.mxu0 %v7644_v34  ;;  %2518 = vmatprep.subr.bf16.mxu1 %v7645_v33 }
 0x37c   : > { %2437 = vmatpush1.bf16.msra.mxu0 %v7646_v57  ;;  %2519 = vmatpush1.bf16.msra.mxu1 %v7647_v32 }
 0x37d   : > { %2438 = vmatprep.subr.bf16.mxu0 %v7648_v20  ;;  %2520 = vmatprep.subr.bf16.mxu1 %v7649_v21 }
 0x380   : > { %2439 = vmatpush1.bf16.msra.mxu0 %v7650_v51  ;;  %2521 = vmatpush1.bf16.msra.mxu1 %v7651_v58 }
 0x381   : > { %2440 = vmatprep.subr.bf16.mxu0 %v7652_v13  ;;  %2522 = vmatprep.subr.bf16.mxu1 %v7653_v17 }
 0x384   : > { %2441 = vmatpush1.bf16.msra.mxu0 %v7654_v18  ;;  %2523 = vmatpush1.bf16.msra.mxu1 %v7655_v22 }
 0x385   : > { %2442 = vmatprep.subr.bf16.mxu0 %v7656_v19  ;;  %2524 = vmatprep.subr.bf16.mxu1 %v7657_v59 }
 0x388   : > { %2443 = vmatpush1.bf16.msra.mxu0 %v7658_v61  ;;  %2525 = vmatpush1.bf16.msra.mxu1 %v7659_v62  ;;  %v6433_v62 = vld [vmem:[#allocation8 + $0x4] ss:$16 sps:$4 sm:$0xff]  }
 0x389   : > { %3798 = vmatprep.subr.bf16.mxu0 %v7660_v63  ;;  %3820 = vmatprep.subr.bf16.mxu1 %v7661_v0  ;;  %v6435_v63 = vld [vmem:[#allocation8 + $0xc] ss:$16 sps:$4 sm:$0xff]   ;;  %v6437_v0 = vld [vmem:[#allocation8] ss:$16 sps:$4 sm:$0xff]  }
 0x38b   : > { %2445 = vmatmul.mubr.bf16.vlgmr.msra.gmra.mrb[32].mxu0 %v3582_v28  ;;  %2527 = vmatmul.mubr.bf16.vlgmr.msra.gmra.mrb[32].mxu1 %v3582_v28 }
 0x38c   : > { %3799 = vmatpush3.bf16.msra.mxu0 %v7662_v1  ;;  %3821 = vmatpush3.bf16.msra.mxu1 %v7663_v3  ;;  %v6439_v1 = vld [vmem:[#allocation8 + $0x8] ss:$16 sps:$4 sm:$0xff]   ;;  %v6441_v3 = vld [vmem:[#allocation8 + $0x24] ss:$16 sps:$4 sm:$0xff]  }
 0x38d   : > { %3800 = vmatprep.subr.bf16.mxu0 %v7664_v5  ;;  %3822 = vmatprep.subr.bf16.mxu1 %v7665_v6  ;;  %v6445_v5 = vld [vmem:[#allocation8 + $0x2c] ss:$16 sps:$4 sm:$0xff]   ;;  %v6449_v6 = vld [vmem:[#allocation8 + $0x20] ss:$16 sps:$4 sm:$0xff]  }
 0x38e   : > { %2567 = vmatprep.mubr.bf16.mxu0 %v7666_v7  ;;  %2607 = vmatprep.mubr.bf16.mxu1 %v6316_v4  ;;  %v7677_v4 = vld [vmem:[#allocation29_spill] sm:$0xff]  ;;  %v6451_v7 = vld [vmem:[#allocation8 + $0x28] ss:$16 sps:$4 sm:$0xff]  }
 0x390   : > { %3801 = vmatpush3.bf16.msra.mxu0 %v7667_v60  ;;  %3823 = vmatpush3.bf16.msra.mxu1 %v7668_v9  ;;  %v6455_v60 = vld [vmem:[#allocation8 + $0x44] ss:$16 sps:$4 sm:$0xff]   ;;  %v6457_v9 = vld [vmem:[#allocation8 + $0x4c] ss:$16 sps:$4 sm:$0xff]  }
 0x391   : > { %3802 = vmatprep.subr.bf16.mxu0 %v7669_v10  ;;  %3824 = vmatprep.subr.bf16.mxu1 %v7670_v11  ;;  %v6461_v10 = vld [vmem:[#allocation8 + $0x40] ss:$16 sps:$4 sm:$0xff]   ;;  %v6463_v11 = vld [vmem:[#allocation8 + $0x48] ss:$16 sps:$4 sm:$0xff]  }
 0x394   : > { %3803 = vmatpush3.bf16.msra.mxu0 %v7671_v12  ;;  %3825 = vmatpush3.bf16.msra.mxu1 %v7672_v48  ;;  %v6467_v12 = vld [vmem:[#allocation8 + $0x64] ss:$16 sps:$4 sm:$0xff]   ;;  %v6469_v48 = vld [vmem:[#allocation8 + $0x6c] ss:$16 sps:$4 sm:$0xff]  }
 0x395   : > { %3804 = vmatprep.subr.bf16.mxu0 %v7673_v29  ;;  %3826 = vmatprep.subr.bf16.mxu1 %v7674_v30  ;;  %v6473_v29 = vld [vmem:[#allocation8 + $0x60] ss:$16 sps:$4 sm:$0xff]   ;;  %v6475_v30 = vld [vmem:[#allocation8 + $0x68] ss:$16 sps:$4 sm:$0xff]  }
 0x398   : > { %3805 = vmatpush3.bf16.msra.mxu0 %v7675_v49  ;;  %3827 = vmatpush3.bf16.msra.mxu1 %v7676_v52  ;;  %v6479_v49 = vld [vmem:[#allocation8 + $0x84] ss:$16 sps:$4 sm:$0xff]   ;;  %v6481_v52 = vld [vmem:[#allocation8 + $0x8c] ss:$16 sps:$4 sm:$0xff]  }
 0x399   : > { %3806 = vmatprep.subr.bf16.mxu0 %v7677_v4  ;;  %3828 = vmatprep.subr.bf16.mxu1 %v7678_v55  ;;  %v7144_v4 = vmov 0   ;;  %v6487_v55 = vld [vmem:[#allocation8 + $0x80] ss:$16 sps:$4 sm:$0xff]  }
 0x39c   : > { %3807 = vmatpush3.bf16.msra.mxu0 %v7679_v35  ;;  %3829 = vmatpush3.bf16.msra.mxu1 %v7680_v36  ;;  %v6489_v35 = vld [vmem:[#allocation8 + $0x88] ss:$16 sps:$4 sm:$0xff]   ;;  %v6493_v36 = vld [vmem:[#allocation8 + $0xa4] ss:$16 sps:$4 sm:$0xff]  }
 0x39d   : > { %3808 = vmatprep.subr.bf16.mxu0 %v7681_v31  ;;  %3830 = vmatprep.subr.bf16.mxu1 %v7682_v44  ;;  %v6495_v31 = vld [vmem:[#allocation8 + $0xac] ss:$16 sps:$4 sm:$0xff]   ;;  %v6499_v44 = vld [vmem:[#allocation8 + $0xa0] ss:$16 sps:$4 sm:$0xff]  }
 0x3a0   : > { %3809 = vmatpush3.bf16.msra.mxu0 %v7683_v43  ;;  %3831 = vmatpush3.bf16.msra.mxu1 %v7684_v42  ;;  %v6501_v43 = vld [vmem:[#allocation8 + $0xa8] ss:$16 sps:$4 sm:$0xff]   ;;  %v6505_v42 = vld [vmem:[#allocation8 + $0xc4] ss:$16 sps:$4 sm:$0xff]  }
 0x3a1   : > { %3810 = vmatprep.subr.bf16.mxu0 %v7685_v41  ;;  %3832 = vmatprep.subr.bf16.mxu1 %v7686_v37  ;;  %v6507_v41 = vld [vmem:[#allocation8 + $0xcc] ss:$16 sps:$4 sm:$0xff]   ;;  %v6511_v37 = vld [vmem:[#allocation8 + $0xc0] ss:$16 sps:$4 sm:$0xff]  }
 0x3a4   : > { %3811 = vmatpush3.bf16.msra.mxu0 %v7687_v38  ;;  %3833 = vmatpush3.bf16.msra.mxu1 %v7688_v2  ;;  %v6513_v38 = vld [vmem:[#allocation8 + $0xc8] ss:$16 sps:$4 sm:$0xff]   ;;  %v6517_v2 = vld [vmem:[#allocation8 + $0xe4] ss:$16 sps:$4 sm:$0xff]  }
 0x3a5   : > { %3812 = vmatprep.subr.bf16.mxu0 %v7689_v39  ;;  %3834 = vmatprep.subr.bf16.mxu1 %v7690_v40  ;;  %v6519_v39 = vld [vmem:[#allocation8 + $0xec] ss:$16 sps:$4 sm:$0xff]   ;;  %v6523_v40 = vld [vmem:[#allocation8 + $0xe0] ss:$16 sps:$4 sm:$0xff]  }
 0x3a8   : > { %3813 = vmatpush3.bf16.msra.mxu0 %v7691_v47  ;;  %3835 = vmatpush3.bf16.msra.mxu1 %v7692_v23  ;;  %v6525_v47 = vld [vmem:[#allocation8 + $0xe8] ss:$16 sps:$4 sm:$0xff]  }
 0x3a9   : > { %2816 = vmatprep.subr.bf16.mxu0 %v6433_v62  ;;  %2857 = vmatprep.subr.bf16.mxu1 %v6435_v63 }
 0x3ab   : > { %2568 = vmatmul.mubr.bf16.vlgmr.msra.gmra.mrb[36].mxu0 %v6305_v24  ;;  %2608 = vmatmul.mubr.bf16.vlgmr.msra.gmra.mrb[36].mxu1 %v3582_v28 }
 0x3ac   : > { %2817 = vmatpush1.bf16.msra.mxu0 %v6437_v0  ;;  %2858 = vmatpush1.bf16.msra.mxu1 %v6439_v1 }
 0x3ad   : > { %2818 = vmatprep.subr.bf16.mxu0 %v6441_v3  ;;  %2859 = vmatprep.subr.bf16.mxu1 %v6445_v5 }
 0x3ae   : > { %2848 = vmatprep.mubr.bf16.mxu0 %v7144_v4  ;;  %2889 = vmatprep.mubr.bf16.mxu1 %v7144_v4 }
 0x3b0   : > { %2819 = vmatpush1.bf16.msra.mxu0 %v6449_v6  ;;  %2860 = vmatpush1.bf16.msra.mxu1 %v6451_v7 }
 0x3b1   : > { %2820 = vmatprep.subr.bf16.mxu0 %v6455_v60  ;;  %2861 = vmatprep.subr.bf16.mxu1 %v6457_v9 }
 0x3b4   : > { %2821 = vmatpush1.bf16.msra.mxu0 %v6461_v10  ;;  %2862 = vmatpush1.bf16.msra.mxu1 %v6463_v11 }
 0x3b5   : > { %2822 = vmatprep.subr.bf16.mxu0 %v6467_v12  ;;  %2863 = vmatprep.subr.bf16.mxu1 %v6469_v48 }
 0x3b8   : > { %2823 = vmatpush1.bf16.msra.mxu0 %v6473_v29  ;;  %2864 = vmatpush1.bf16.msra.mxu1 %v6475_v30 }
 0x3b9   : > { %2824 = vmatprep.subr.bf16.mxu0 %v6479_v49  ;;  %2865 = vmatprep.subr.bf16.mxu1 %v6481_v52 }
 0x3bc   : > { %2825 = vmatpush1.bf16.msra.mxu0 %v6487_v55  ;;  %2866 = vmatpush1.bf16.msra.mxu1 %v6489_v35 }
 0x3bd   : > { %2826 = vmatprep.subr.bf16.mxu0 %v6493_v36  ;;  %2867 = vmatprep.subr.bf16.mxu1 %v6495_v31 }
 0x3be   : > { %v6421_v45 = vpop.f32.mrb[24].mxu0  ;;  %v6423_v54 = vpop.f32.mrb[24].mxu1 }
 0x3bf   : > { %v6425_v25 = vpop.f32.mrb[25].mxu0  ;;  %v6427_v53 = vpop.f32.mrb[25].mxu1 }
 0x3c0   : > { %v2190_v46 = vpop.f32.mrb[26].mxu0  ;;  %v2272_v34 = vpop.f32.mrb[26].mxu1  ;;  %2827 = vmatpush1.bf16.msra.mxu0 %v6499_v44  ;;  %2868 = vmatpush1.bf16.msra.mxu1 %v6501_v43 }
 0x3c1   : > { %v2191_v33 = vpop.f32.mrb[27].mxu0  ;;  %v2273_v57 = vpop.f32.mrb[27].mxu1  ;;  %2828 = vmatprep.subr.bf16.mxu0 %v6505_v42  ;;  %2869 = vmatprep.subr.bf16.mxu1 %v6507_v41 }
 0x3c4   : > { %2829 = vmatpush1.bf16.msra.mxu0 %v6511_v37  ;;  %2870 = vmatpush1.bf16.msra.mxu1 %v6513_v38 }
 0x3c5   : > { %2830 = vmatprep.subr.bf16.mxu0 %v6517_v2  ;;  %2871 = vmatprep.subr.bf16.mxu1 %v6519_v39 }
 0x3c8   : > { %2831 = vmatpush1.bf16.msra.mxu0 %v6523_v40  ;;  %2872 = vmatpush1.bf16.msra.mxu1 %v6525_v47 }
 0x3c9   : > { %2908 = vmatprep.subr.bf16.mxu0 %v6433_v62  ;;  %2949 = vmatprep.subr.bf16.mxu1 %v6435_v63 }
 0x3de   : > { %v3770_v32 = vpop.f32.mrb[28].mxu0  ;;  %v3792_v20 = vpop.f32.mrb[28].mxu1 }
 0x3df   : > { %v3771_v21 = vpop.f32.mrb[29].mxu0  ;;  %v3793_v51 = vpop.f32.mrb[29].mxu1 }
 0x3e0   : > { %v3772_v58 = vadd.f32 %v3771_v21, %v3770_v32  ;;  %v3794_v13 = vadd.f32 %v3793_v51, %v3792_v20  ;;  %v3773_v24 = vpop.f32.mrb[30].mxu0  ;;  %v3795_v17 = vpop.f32.mrb[30].mxu1 }
 0x3e1   : > { %v3774_v18 = vpop.f32.mrb[31].mxu0  ;;  %v3796_v22 = vpop.f32.mrb[31].mxu1 }
 0x3e2   : > { %v2350_v19 = vadd.f32 %v3794_v13, %v3772_v58 }
 0x3e4   : > { %vm2624_vm3 = vcmp.gt.f32.partialorder %v2350_v19, 0.0  ;;  %v2625_v59 = vmul.f32 0.2, %v2350_v19 }
 0x3e6   : > { %v6429_v28 = vsel %vm2624_vm3, %v2350_v19, %v2625_v59 }
 0x45e   : > { %v6533_v23 = vpop.f32.mrb[32].mxu0  ;;  %v6535_v46 = vpop.f32.mrb[32].mxu1 }
 0x45f   : > { %7693 = vst [vmem:[#allocation46_spill] sm:$0xff] %v6535_v46  ;;  %v6537_v34 = vpop.f32.mrb[33].mxu0  ;;  %v6539_v33 = vpop.f32.mrb[33].mxu1 }
 0x460   : > { %7694 = vst [vmem:[#allocation47_spill] sm:$0xff] %v6537_v34  ;;  %7695 = vst [vmem:[#allocation48_spill] sm:$0xff] %v6539_v33  ;;  %v2450_v57 = vpop.f32.mrb[34].mxu0  ;;  %v2532_v32 = vpop.f32.mrb[34].mxu1 }
 0x461   : > { %v2451_v20 = vpop.f32.mrb[35].mxu0  ;;  %v2533_v21 = vpop.f32.mrb[35].mxu1  ;;  %v7696_v57 = vmax.f32 %v6301_v16, %v6429_v28 }
 0x47e   : > { %v3814_v51 = vpop.f32.mrb[36].mxu0  ;;  %v3836_v58 = vpop.f32.mrb[36].mxu1 }
 0x47f   : > { %v3815_v13 = vpop.f32.mrb[37].mxu0  ;;  %v3837_v24 = vpop.f32.mrb[37].mxu1 }
 0x480   : > { %v3816_v17 = vadd.f32 %v3815_v13, %v3814_v51  ;;  %v3838_v18 = vadd.f32 %v3837_v24, %v3836_v58  ;;  %v3817_v22 = vpop.f32.mrb[38].mxu0  ;;  %v3839_v19 = vpop.f32.mrb[38].mxu1 }
 0x481   : > { %v3818_v59 = vpop.f32.mrb[39].mxu0  ;;  %v3840_v4 = vpop.f32.mrb[39].mxu1 }
 0x482   : > { %v2610_v61 = vadd.f32 %v3838_v18, %v3816_v17 }
 0x484   : > { %vm2627_vm4 = vcmp.gt.f32.partialorder %v2610_v61, 0.0  ;;  %v2628_v46 = vmul.f32 0.2, %v2610_v61 }
 0x486   : > { %v2629_v34 = vsel %vm2627_vm4, %v2610_v61, %v2628_v46 }
 0x487   : > { %v2633_v32 = vmax.f32 %v7696_v57, %v2629_v34 }
 0x489   : > { %v2637_v20 = vsub.f32 %v5997_v26, %v2633_v32  ;;  %v2640_v21 = vsub.f32 %v6295_v14, %v2633_v32  ;;  %v2643_v33 = vsub.f32 %v6429_v28, %v2633_v32  ;;  %v2646_v51 = vsub.f32 %v2629_v34, %v2633_v32 }
 0x48a   : > { %v2634_v58 = vsub.f32 %v5995_v56, %v2633_v32 }
 0x48b   : > { %v2638_v13 = vmul.f32 1.442695, %v2637_v20  ;;  %v2641_v4 = vmul.f32 1.442695, %v2640_v21  ;;  %v2644_v17 = vmul.f32 1.442695, %v2643_v33 }
 0x48c   : > { %v2635_v24 = vmul.f32 1.442695, %v2634_v58  ;;  %v2647_v61 = vmul.f32 1.442695, %v2646_v51  ;;  %v7697_v51 = vmov 0  }
 0x48d   : > { %4259 = vpow2.f32 %v2638_v13 }
 0x48e   : > { %4261 = vpow2.f32 %v2635_v24 }
 0x48f   : > { %4263 = vpow2.f32 %v2641_v4 }
 0x490   : > { %4265 = vpow2.f32 %v2644_v17 }
 0x491   : > { %4267 = vpow2.f32 %v2647_v61 }
 0x497   : > { %v4260_v16 = vpop.eup %4259 }
 0x498   : > { %v4262_v46 = vpop.eup %4261 }
 0x499   : > { %v2649_v26 = vadd.f32 %v4262_v46, %v4260_v16  ;;  %v4264_v18 = vpop.eup %4263 }
 0x49a   : > { %v4266_v22 = vpop.eup %4265 }
 0x49b   : > { %v2650_v14 = vadd.f32 %v4264_v18, %v2649_v26  ;;  %v4268_v34 = vpop.eup %4267 }
 0x49d   : > { %v2651_v28 = vadd.f32 %v4266_v22, %v2650_v14 }
 0x49f   : > { %v2652_v19 = vadd.f32 %v4268_v34, %v2651_v28 }
 0x4a1   : > { %4269 = vrcp.f32 %v2652_v19 }
 0x4ab   : > { %v4270_v56 = vpop.eup %4269 }
 0x4ac   : > { %v2654_v59 = vmul.f32 %v4270_v56, %v4262_v46  ;;  %v2906_v57 = vmul.f32 %v4270_v56, %v4260_v16  ;;  %v6548_v32 = vmul.f32 %v4270_v56, %v4264_v18  ;;  %v6550_v33 = vmul.f32 %v4270_v56, %v4266_v22 }
 0x4ad   : > { %v6552_v20 = vmul.f32 %v4270_v56, %v4268_v34 }
 0x4ae   : > { %v2655_v21 = vpack.c.bf16 %v2654_v59, %v2654_v59  ;;  %v2907_v58 = vpack.c.bf16 %v2906_v57, %v2906_v57  ;;  %v2999_v13 = vpack.c.bf16 %v6548_v32, %v6548_v32  ;;  %v3091_v24 = vpack.c.bf16 %v6550_v33, %v6550_v33 }
 0x4b0   : > { %2849 = vmatmul.mubr.bf16.vlgmr.msra.gmra.mrb[40].mxu0 %v2655_v21  ;;  %2890 = vmatmul.mubr.bf16.vlgmr.msra.gmra.mrb[40].mxu1 %v2655_v21 }
 0x4b1   : > { %2909 = vmatpush1.bf16.msra.mxu0 %v6437_v0  ;;  %2950 = vmatpush1.bf16.msra.mxu1 %v6439_v1 }
 0x4b2   : > { %2910 = vmatprep.subr.bf16.mxu0 %v6441_v3  ;;  %2951 = vmatprep.subr.bf16.mxu1 %v6445_v5 }
 0x4b3   : > { %2940 = vmatprep.mubr.bf16.mxu0 %v7697_v51  ;;  %2981 = vmatprep.mubr.bf16.mxu1 %v7697_v51 }
 0x4b5   : > { %2911 = vmatpush1.bf16.msra.mxu0 %v6449_v6  ;;  %2952 = vmatpush1.bf16.msra.mxu1 %v6451_v7 }
 0x4b6   : > { %2912 = vmatprep.subr.bf16.mxu0 %v6455_v60  ;;  %2953 = vmatprep.subr.bf16.mxu1 %v6457_v9 }
 0x4b9   : > { %2913 = vmatpush1.bf16.msra.mxu0 %v6461_v10  ;;  %2954 = vmatpush1.bf16.msra.mxu1 %v6463_v11 }
 0x4ba   : > { %2914 = vmatprep.subr.bf16.mxu0 %v6467_v12  ;;  %2955 = vmatprep.subr.bf16.mxu1 %v6469_v48 }
 0x4bd   : > { %2915 = vmatpush1.bf16.msra.mxu0 %v6473_v29  ;;  %2956 = vmatpush1.bf16.msra.mxu1 %v6475_v30 }
 0x4be   : > { %2916 = vmatprep.subr.bf16.mxu0 %v6479_v49  ;;  %2957 = vmatprep.subr.bf16.mxu1 %v6481_v52 }
 0x4c1   : > { %2917 = vmatpush1.bf16.msra.mxu0 %v6487_v55  ;;  %2958 = vmatpush1.bf16.msra.mxu1 %v6489_v35 }
 0x4c2   : > { %2918 = vmatprep.subr.bf16.mxu0 %v6493_v36  ;;  %2959 = vmatprep.subr.bf16.mxu1 %v6495_v31 }
 0x4c5   : > { %2919 = vmatpush1.bf16.msra.mxu0 %v6499_v44  ;;  %2960 = vmatpush1.bf16.msra.mxu1 %v6501_v43 }
 0x4c6   : > { %2920 = vmatprep.subr.bf16.mxu0 %v6505_v42  ;;  %2961 = vmatprep.subr.bf16.mxu1 %v6507_v41 }
 0x4c9   : > { %2921 = vmatpush1.bf16.msra.mxu0 %v6511_v37  ;;  %2962 = vmatpush1.bf16.msra.mxu1 %v6513_v38 }
 0x4ca   : > { %2922 = vmatprep.subr.bf16.mxu0 %v6517_v2  ;;  %2963 = vmatprep.subr.bf16.mxu1 %v6519_v39 }
 0x4cd   : > { %2923 = vmatpush1.bf16.msra.mxu0 %v6523_v40  ;;  %2964 = vmatpush1.bf16.msra.mxu1 %v6525_v47 }
 0x4ce   : > { %3000 = vmatprep.subr.bf16.mxu0 %v6433_v62  ;;  %3041 = vmatprep.subr.bf16.mxu1 %v6435_v63 }
 0x4d0   : > { %2941 = vmatmul.mubr.bf16.vlgmr.msra.gmra.mrb[44].mxu0 %v2907_v58  ;;  %2982 = vmatmul.mubr.bf16.vlgmr.msra.gmra.mrb[44].mxu1 %v2907_v58 }
 0x4d1   : > { %3001 = vmatpush1.bf16.msra.mxu0 %v6437_v0  ;;  %3042 = vmatpush1.bf16.msra.mxu1 %v6439_v1 }
 0x4d2   : > { %3002 = vmatprep.subr.bf16.mxu0 %v6441_v3  ;;  %3043 = vmatprep.subr.bf16.mxu1 %v6445_v5 }
 0x4d3   : > { %3032 = vmatprep.mubr.bf16.mxu0 %v7697_v51  ;;  %3073 = vmatprep.mubr.bf16.mxu1 %v7697_v51 }
 0x4d5   : > { %3003 = vmatpush1.bf16.msra.mxu0 %v6449_v6  ;;  %3044 = vmatpush1.bf16.msra.mxu1 %v6451_v7 }
 0x4d6   : > { %3004 = vmatprep.subr.bf16.mxu0 %v6455_v60  ;;  %3045 = vmatprep.subr.bf16.mxu1 %v6457_v9 }
 0x4d9   : > { %3005 = vmatpush1.bf16.msra.mxu0 %v6461_v10  ;;  %3046 = vmatpush1.bf16.msra.mxu1 %v6463_v11 }
 0x4da   : > { %3006 = vmatprep.subr.bf16.mxu0 %v6467_v12  ;;  %3047 = vmatprep.subr.bf16.mxu1 %v6469_v48 }
 0x4dd   : > { %3007 = vmatpush1.bf16.msra.mxu0 %v6473_v29  ;;  %3048 = vmatpush1.bf16.msra.mxu1 %v6475_v30 }
 0x4de   : > { %3008 = vmatprep.subr.bf16.mxu0 %v6479_v49  ;;  %3049 = vmatprep.subr.bf16.mxu1 %v6481_v52 }
 0x4e1   : > { %3009 = vmatpush1.bf16.msra.mxu0 %v6487_v55  ;;  %3050 = vmatpush1.bf16.msra.mxu1 %v6489_v35 }
 0x4e2   : > { %3010 = vmatprep.subr.bf16.mxu0 %v6493_v36  ;;  %3051 = vmatprep.subr.bf16.mxu1 %v6495_v31 }
 0x4e5   : > { %3011 = vmatpush1.bf16.msra.mxu0 %v6499_v44  ;;  %3052 = vmatpush1.bf16.msra.mxu1 %v6501_v43 }
 0x4e6   : > { %3012 = vmatprep.subr.bf16.mxu0 %v6505_v42  ;;  %3053 = vmatprep.subr.bf16.mxu1 %v6507_v41 }
 0x4e9   : > { %3013 = vmatpush1.bf16.msra.mxu0 %v6511_v37  ;;  %3054 = vmatpush1.bf16.msra.mxu1 %v6513_v38 }
 0x4ea   : > { %3014 = vmatprep.subr.bf16.mxu0 %v6517_v2  ;;  %3055 = vmatprep.subr.bf16.mxu1 %v6519_v39 }
 0x4ed   : > { %3015 = vmatpush1.bf16.msra.mxu0 %v6523_v40  ;;  %3056 = vmatpush1.bf16.msra.mxu1 %v6525_v47 }
 0x4ee   : > { %3092 = vmatprep.subr.bf16.mxu0 %v6433_v62  ;;  %3133 = vmatprep.subr.bf16.mxu1 %v6435_v63 }
 0x4f0   : > { %3033 = vmatmul.mubr.bf16.vlgmr.msra.gmra.mrb[48].mxu0 %v2999_v13  ;;  %3074 = vmatmul.mubr.bf16.vlgmr.msra.gmra.mrb[48].mxu1 %v2999_v13 }
 0x4f1   : > { %3093 = vmatpush1.bf16.msra.mxu0 %v6437_v0  ;;  %3134 = vmatpush1.bf16.msra.mxu1 %v6439_v1 }
 0x4f2   : > { %3094 = vmatprep.subr.bf16.mxu0 %v6441_v3  ;;  %3135 = vmatprep.subr.bf16.mxu1 %v6445_v5 }
 0x4f3   : > { %3124 = vmatprep.mubr.bf16.mxu0 %v7697_v51  ;;  %3165 = vmatprep.mubr.bf16.mxu1 %v7697_v51 }
 0x4f5   : > { %3095 = vmatpush1.bf16.msra.mxu0 %v6449_v6  ;;  %3136 = vmatpush1.bf16.msra.mxu1 %v6451_v7 }
 0x4f6   : > { %3096 = vmatprep.subr.bf16.mxu0 %v6455_v60  ;;  %3137 = vmatprep.subr.bf16.mxu1 %v6457_v9 }
 0x4f9   : > { %3097 = vmatpush1.bf16.msra.mxu0 %v6461_v10  ;;  %3138 = vmatpush1.bf16.msra.mxu1 %v6463_v11 }
 0x4fa   : > { %3098 = vmatprep.subr.bf16.mxu0 %v6467_v12  ;;  %3139 = vmatprep.subr.bf16.mxu1 %v6469_v48 }
 0x4fd   : > { %3099 = vmatpush1.bf16.msra.mxu0 %v6473_v29  ;;  %3140 = vmatpush1.bf16.msra.mxu1 %v6475_v30 }
 0x4fe   : > { %3100 = vmatprep.subr.bf16.mxu0 %v6479_v49  ;;  %3141 = vmatprep.subr.bf16.mxu1 %v6481_v52 }
 0x501   : > { %3101 = vmatpush1.bf16.msra.mxu0 %v6487_v55  ;;  %3142 = vmatpush1.bf16.msra.mxu1 %v6489_v35 }
 0x502   : > { %3102 = vmatprep.subr.bf16.mxu0 %v6493_v36  ;;  %3143 = vmatprep.subr.bf16.mxu1 %v6495_v31 }
 0x505   : > { %3103 = vmatpush1.bf16.msra.mxu0 %v6499_v44  ;;  %3144 = vmatpush1.bf16.msra.mxu1 %v6501_v43 }
 0x506   : > { %3104 = vmatprep.subr.bf16.mxu0 %v6505_v42  ;;  %3145 = vmatprep.subr.bf16.mxu1 %v6507_v41 }
 0x509   : > { %3105 = vmatpush1.bf16.msra.mxu0 %v6511_v37  ;;  %3146 = vmatpush1.bf16.msra.mxu1 %v6513_v38 }
 0x50a   : > { %3106 = vmatprep.subr.bf16.mxu0 %v6517_v2  ;;  %3147 = vmatprep.subr.bf16.mxu1 %v6519_v39 }
 0x50d   : > { %3107 = vmatpush1.bf16.msra.mxu0 %v6523_v40  ;;  %3148 = vmatpush1.bf16.msra.mxu1 %v6525_v47 }
 0x50e   : > { %3184 = vmatprep.subr.bf16.mxu0 %v6433_v62  ;;  %3225 = vmatprep.subr.bf16.mxu1 %v6435_v63  ;;  %v3183_v62 = vpack.c.bf16 %v6552_v20, %v6552_v20 }
 0x510   : > { %3125 = vmatmul.mubr.bf16.vlgmr.msra.gmra.mrb[52].mxu0 %v3091_v24  ;;  %3166 = vmatmul.mubr.bf16.vlgmr.msra.gmra.mrb[52].mxu1 %v3091_v24 }
 0x511   : > { %3185 = vmatpush1.bf16.msra.mxu0 %v6437_v0  ;;  %3226 = vmatpush1.bf16.msra.mxu1 %v6439_v1  ;;  %v7698_v1 = vld [vmem:[#allocation15_spill] sm:$0xff] }
 0x512   : > { %3186 = vmatprep.subr.bf16.mxu0 %v6441_v3  ;;  %3227 = vmatprep.subr.bf16.mxu1 %v6445_v5  ;;  %v7699_v5 = vld [vmem:[#allocation16_spill] sm:$0xff] }
 0x513   : > { %3216 = vmatprep.mubr.bf16.mxu0 %v7697_v51  ;;  %3257 = vmatprep.mubr.bf16.mxu1 %v7697_v51 }
 0x515   : > { %3187 = vmatpush1.bf16.msra.mxu0 %v6449_v6  ;;  %3228 = vmatpush1.bf16.msra.mxu1 %v6451_v7 }
 0x516   : > { %3188 = vmatprep.subr.bf16.mxu0 %v6455_v60  ;;  %3229 = vmatprep.subr.bf16.mxu1 %v6457_v9  ;;  %v7700_v9 = vld [vmem:[#allocation17_spill] sm:$0xff] }
 0x519   : > { %3189 = vmatpush1.bf16.msra.mxu0 %v6461_v10  ;;  %3230 = vmatpush1.bf16.msra.mxu1 %v6463_v11  ;;  %v7701_v11 = vld [vmem:[#allocation18_spill] sm:$0xff] }
 0x51a   : > { %3190 = vmatprep.subr.bf16.mxu0 %v6467_v12  ;;  %3231 = vmatprep.subr.bf16.mxu1 %v6469_v48 }
 0x51d   : > { %3191 = vmatpush1.bf16.msra.mxu0 %v6473_v29  ;;  %3232 = vmatpush1.bf16.msra.mxu1 %v6475_v30 }
 0x51e   : > { %3192 = vmatprep.subr.bf16.mxu0 %v6479_v49  ;;  %3233 = vmatprep.subr.bf16.mxu1 %v6481_v52 }
 0x521   : > { %3193 = vmatpush1.bf16.msra.mxu0 %v6487_v55  ;;  %3234 = vmatpush1.bf16.msra.mxu1 %v6489_v35  ;;  %v7702_v35 = vld [vmem:[#allocation80_spill] sm:$0xff] }
 0x522   : > { %3194 = vmatprep.subr.bf16.mxu0 %v6493_v36  ;;  %3235 = vmatprep.subr.bf16.mxu1 %v6495_v31  ;;  %v7703_v31 = vld [vmem:[#allocation82_spill] sm:$0xff] }
 0x525   : > { %3195 = vmatpush1.bf16.msra.mxu0 %v6499_v44  ;;  %3236 = vmatpush1.bf16.msra.mxu1 %v6501_v43 }
 0x526   : > { %3196 = vmatprep.subr.bf16.mxu0 %v6505_v42  ;;  %3237 = vmatprep.subr.bf16.mxu1 %v6507_v41  ;;  %v7704_v41 = vld [vmem:[#allocation83_spill] sm:$0xff] }
 0x529   : > { %3197 = vmatpush1.bf16.msra.mxu0 %v6511_v37  ;;  %3238 = vmatpush1.bf16.msra.mxu1 %v6513_v38  ;;  %v7705_v38 = vld [vmem:[#allocation85_spill] sm:$0xff] }
 0x52a   : > { %3198 = vmatprep.subr.bf16.mxu0 %v6517_v2  ;;  %3239 = vmatprep.subr.bf16.mxu1 %v6519_v39 }
 0x52d   : > { %3199 = vmatpush1.bf16.msra.mxu0 %v6523_v40  ;;  %3240 = vmatpush1.bf16.msra.mxu1 %v6525_v47 }
 0x530   : > { %3217 = vmatmul.mubr.bf16.vlgmr.msra.gmra.mrb[56].mxu0 %v3183_v62  ;;  %3258 = vmatmul.mubr.bf16.vlgmr.msra.gmra.mrb[56].mxu1 %v3183_v62 }
 0x583   : > { %v2850_v63 = vpop.f32.mrb[40].mxu0  ;;  %v2891_v0 = vpop.f32.mrb[40].mxu1 }
 0x584   : > { %v2898_v3 = vmul.f32 %v2850_v63, %v7698_v1  ;;  %v2900_v6 = vmul.f32 %v2891_v0, %v7699_v5  ;;  %v2852_v7 = vpop.f32.mrb[41].mxu0  ;;  %v2893_v60 = vpop.f32.mrb[41].mxu1 }
 0x585   : > { %v2899_v10 = vmul.f32 %v2852_v7, %v7700_v9  ;;  %v2901_v12 = vmul.f32 %v2893_v60, %v7701_v11  ;;  %v2854_v48 = vpop.f32.mrb[42].mxu0  ;;  %v2895_v29 = vpop.f32.mrb[42].mxu1  ;;  %v7706_v11 = vld [vmem:[#allocation46_spill] sm:$0xff] }
 0x586   : > { %v2855_v30 = vpop.f32.mrb[43].mxu0  ;;  %v2896_v49 = vpop.f32.mrb[43].mxu1 }
 0x587   : > { %v7708_v30 = vld [vmem:[#allocation48_spill] sm:$0xff] }
 0x5a3   : > { %v2942_v52 = vpop.f32.mrb[44].mxu0  ;;  %v2983_v55 = vpop.f32.mrb[44].mxu1 }
 0x5a4   : > { %v2990_v36 = vmul.f32 %v2942_v52, %v7702_v35  ;;  %v2992_v44 = vmul.f32 %v2983_v55, %v7703_v31  ;;  %v2944_v43 = vpop.f32.mrb[45].mxu0  ;;  %v2985_v42 = vpop.f32.mrb[45].mxu1 }
 0x5a5   : > { %v2991_v37 = vmul.f32 %v2944_v43, %v7704_v41  ;;  %v2993_v2 = vmul.f32 %v2985_v42, %v7705_v38  ;;  %v2946_v39 = vpop.f32.mrb[46].mxu0  ;;  %v2987_v40 = vpop.f32.mrb[46].mxu1 }
 0x5a6   : > { %v2994_v47 = vadd.f32 %v2990_v36, %v2898_v3  ;;  %v2996_v4 = vadd.f32 %v2992_v44, %v2900_v6  ;;  %v2947_v17 = vpop.f32.mrb[47].mxu0  ;;  %v2988_v61 = vpop.f32.mrb[47].mxu1 }
 0x5a7   : > { %v2995_v16 = vadd.f32 %v2991_v37, %v2899_v10  ;;  %v2997_v46 = vadd.f32 %v2993_v2, %v2901_v12 }
 0x5c3   : > { %v3034_v26 = vpop.f32.mrb[48].mxu0  ;;  %v3075_v18 = vpop.f32.mrb[48].mxu1 }
 0x5c4   : > { %v3082_v14 = vmul.f32 %v3034_v26, %v6251_v8  ;;  %v3084_v22 = vmul.f32 %v3075_v18, %v6253_v27  ;;  %v3036_v28 = vpop.f32.mrb[49].mxu0  ;;  %v3077_v34 = vpop.f32.mrb[49].mxu1 }
 0x5c5   : > { %v3083_v19 = vmul.f32 %v3036_v28, %v6255_v15  ;;  %v3085_v56 = vmul.f32 %v3077_v34, %v6257_v50  ;;  %v3038_v59 = vpop.f32.mrb[50].mxu0  ;;  %v3079_v57 = vpop.f32.mrb[50].mxu1 }
 0x5c6   : > { %v3086_v32 = vadd.f32 %v3082_v14, %v2994_v47  ;;  %v3088_v33 = vadd.f32 %v3084_v22, %v2996_v4  ;;  %v3039_v20 = vpop.f32.mrb[51].mxu0  ;;  %v3080_v21 = vpop.f32.mrb[51].mxu1 }
 0x5c7   : > { %v3087_v51 = vadd.f32 %v3083_v19, %v2995_v16  ;;  %v3089_v58 = vadd.f32 %v3085_v56, %v2997_v46 }
 0x5e3   : > { %v3126_v13 = vpop.f32.mrb[52].mxu0  ;;  %v3167_v24 = vpop.f32.mrb[52].mxu1 }
 0x5e4   : > { %v3174_v8 = vmul.f32 %v3126_v13, %v6421_v45  ;;  %v3176_v27 = vmul.f32 %v3167_v24, %v6423_v54  ;;  %v3128_v62 = vpop.f32.mrb[53].mxu0  ;;  %v3169_v63 = vpop.f32.mrb[53].mxu1 }
 0x5e5   : > { %v3175_v15 = vmul.f32 %v3128_v62, %v6425_v25  ;;  %v3177_v50 = vmul.f32 %v3169_v63, %v6427_v53  ;;  %v3130_v0 = vpop.f32.mrb[54].mxu0  ;;  %v3171_v1 = vpop.f32.mrb[54].mxu1  ;;  %v7707_v53 = vld [vmem:[#allocation47_spill] sm:$0xff] }
 0x5e6   : > { %v3178_v3 = vadd.f32 %v3174_v8, %v3086_v32  ;;  %v3180_v5 = vadd.f32 %v3176_v27, %v3088_v33  ;;  %v3131_v6 = vpop.f32.mrb[55].mxu0  ;;  %v3172_v7 = vpop.f32.mrb[55].mxu1 }
 0x5e7   : > { %v3179_v60 = vadd.f32 %v3175_v15, %v3087_v51  ;;  %v3181_v9 = vadd.f32 %v3177_v50, %v3089_v58 }
 0x603   : > { %v3218_v10 = vpop.f32.mrb[56].mxu0  ;;  %v3259_v45 = vpop.f32.mrb[56].mxu1 }
 0x604   : > { %v3266_v54 = vmul.f32 %v3218_v10, %v6533_v23  ;;  %v3268_v12 = vmul.f32 %v3259_v45, %v7706_v11  ;;  %v3220_v48 = vpop.f32.mrb[57].mxu0  ;;  %v3261_v25 = vpop.f32.mrb[57].mxu1 }
 0x605   : > { %v3267_v29 = vmul.f32 %v3220_v48, %v7707_v53  ;;  %v3269_v49 = vmul.f32 %v3261_v25, %v7708_v30  ;;  %v3222_v52 = vpop.f32.mrb[58].mxu0  ;;  %v3263_v55 = vpop.f32.mrb[58].mxu1 }
 0x606   : > { %v3270_v35 = vadd.f32 %v3266_v54, %v3178_v3  ;;  %v3272_v36 = vadd.f32 %v3268_v12, %v3180_v5  ;;  %v3223_v31 = vpop.f32.mrb[59].mxu0  ;;  %v3264_v44 = vpop.f32.mrb[59].mxu1 }
 0x607   : > { %v3271_v23 = vadd.f32 %v3267_v29, %v3179_v60  ;;  %v3273_v43 = vadd.f32 %v3269_v49, %v3181_v9 }
 0x608   : > { %3274 = vst [vmem:[%s257_s5] sm:$0xff] %v3270_v35  ;;  %3276 = vst [vmem:[%s257_s5 + $0x10] sm:$0xff] %v3272_v36 }
 0x609   : > { %3275 = vst [vmem:[%s257_s5 + $0x8] sm:$0xff] %v3271_v23  ;;  %3277 = vst [vmem:[%s257_s5 + $0x18] sm:$0xff] %v3273_v43 }
 0x60a   : > { %4584 = shalt.err (!%p4581_p4)
}
 0x60b   : > { %s4585_s13 = scalar_lea.hbm %s6719_s19, 512  ;;  %s4589_s9 = scalar_lea.hbm %s6767_s4, 1024 }
 0x60c   : > { %p4586_p0 = scmp.ne.s32.totalorder %s6719_s19, %s4585_s13  ;;  %p4590_p8 = scmp.lt.u32.totalorder %s6719_s19, %s6767_s4 }
 0x60d   : > { %p4591_p13 = scmp.lt.u32.totalorder %s4589_s9, %s4585_s13  ;;  %p4593_p10 = scmp.lt.u32.totalorder %s4585_s13, %s6719_s19 }
 0x60e   : > { %p4587_p9 = pnand %p4586_p0, %p4830_p5 }
 0x60f   : > { %p4592_p6 = por %p4591_p13, %p4590_p8 }
 0x610   : > { %p4588_p7 = pneg %p4587_p9 }
 0x611   : > { %p4594_p3 = por %p4593_p10, %p4592_p6 }
 0x613   : > { %p4595_p11 = pnand %p4594_p3, %p4588_p7 }
 0x615   : > { %4598 = shalt.err (!%p4595_p11)
}
 0x616   : > { %3899 = dma.vmem_to_hbm [thread:$0]  (%p4830_p5), %s6721_s6, 512, %s6719_s19, %s3279_s8  }
 0x617 PF: > { %s3305_s21 = sand.u32 1, %s4633_s15   ;;  %p7709_p12 = scmp.ne.s32.totalorder %s7147_s22, 0 }
 0x618   : > { %p7710_p1 = scmp.ge.s32.totalorder %s4645_s18, 2  ;;  %s3306_s23 = scalar_lea.sflag [#allocation4], %s3305_s21 }
 0x61a   : > { %p3916_p2 = pnand %p7710_p1, %p7709_p12 }
 0x61c   : > { %4628 = dma.done.wait (!%p3916_p2), %s3306_s23, 512  }
 0x61d   : > { %4630 = vsyncadd (!%p3916_p2), %s3306_s23, 4294966784  ;;  %p19_p4 = scmp.ge.s32.totalorder %s4795_s27, 4   ;;  %s7711_s15 = smov %s4637_s16 }
 0x61e   : > { %s7712_s16 = smov %s4641_s17  ;;  %s7713_s17 = smov %s4826_s11 }
 0x61f   : > { %s7714_s18 = smov %s4795_s27  ;;  %21 = sbr.rel (!%p19_p4) target bundleno = 7 (0x7), region = 93 }
 0x626   :  { %3311 = vsyncpa [#allocation3], 1 }
 0x627   :  { %3313 = vsyncpa [#allocation3 + $0x1], 1 }
 0x628   :  { %3314 = vsyncpa [#allocation6], 1 }
 0x629   :  { %3315 = vsyncpa [#allocation9], 1 }
 0x62a   :  { %3316 = vsyncpa [#allocation4], 1 }
 0x62b   :  { %3318 = vsyncpa [#allocation4 + $0x1], 1 }

</bundles_post_ra>
